<compile_context>
chip_gen: v6e
topology: v6e:2x2x1
jax: 0.10.0
libtpu: 0.0.40
codegen_flags: <defaults>
</compile_context>

<pallas_src>
import jax
import jax.numpy as jnp
from jax.experimental import pallas as pl
from jax.experimental.pallas import tpu as pltpu

_LANE = 128


# ----------------------------- Pallas kernel -------------------------------


def _basic_block_kernel(x_ref, w1_ref, w2_ref, sb1_ref, sb2_ref, out_ref,
                        xp_ref, mid_ref):
    """Fused BasicBlock forward for one batch element.

    x_ref:   (1, H, W, C)   input, C already padded to a lane multiple
    w1_ref:  (9, C, C)      conv1 weight, tap-major (dy*3+dx, Cin, Cout)
    w2_ref:  (9, C, C)      conv2 weight
    sb1_ref: (2, C)         folded BN1 (row 0: scale, row 1: bias)
    sb2_ref: (2, C)         folded BN2
    out_ref: (1, H, W, C)
    xp_ref:  (H+2, W+2, C)  f32 VMEM scratch: zero-padded input
    mid_ref: (H+2, W+2, C)  f32 VMEM scratch: zero-padded relu(bn1(conv1(x)))
    """
    _, H, W, C = out_ref.shape

    # Build the halo'd buffers in VMEM (no host-side jnp.pad / HBM pass).
    # Zeroing the full scratch each grid step keeps the border correct
    # regardless of how a parallel grid axis is split across TensorCores.
    xp_ref[...] = jnp.zeros_like(xp_ref)
    mid_ref[...] = jnp.zeros_like(mid_ref)

    x = x_ref[0].astype(jnp.float32)                     # (H, W, C)
    xp_ref[1:H + 1, 1:W + 1, :] = x

    def conv3x3(src_ref, w_ref):
        acc = jnp.zeros((H * W, C), jnp.float32)
        for t in range(9):                               # static unroll
            dy, dx = t // 3, t % 3
            patch = src_ref[dy:dy + H, dx:dx + W, :].reshape(H * W, C)
            acc += jnp.dot(patch, w_ref[t],
                           preferred_element_type=jnp.float32)
        return acc

    # conv1 -> bn1 -> relu   (result stays resident in VMEM)
    y1 = conv3x3(xp_ref, w1_ref)
    y1 = jnp.maximum(y1 * sb1_ref[0:1] + sb1_ref[1:2], 0.0)
    mid_ref[1:H + 1, 1:W + 1, :] = y1.reshape(H, W, C)

    # conv2 -> bn2 -> + residual -> relu
    y2 = conv3x3(mid_ref, w2_ref)
    y2 = y2 * sb2_ref[0:1] + sb2_ref[1:2] + x.reshape(H * W, C)
    out_ref[0] = jnp.maximum(y2, 0.0).reshape(H, W, C).astype(out_ref.dtype)


# ------------------------------ host wrappers -------------------------------


def _fold_bn(gamma, beta, mean, var, eps=1e-5):
    scale = gamma / jnp.sqrt(var + eps)
    bias = beta - mean * scale
    return scale, bias


def _pad_to(a, axis, target):
    pad = target - a.shape[axis]
    if pad == 0:
        return a
    widths = [(0, 0)] * a.ndim
    widths[axis] = (0, pad)
    return jnp.pad(a, widths)


def basic_block_forward_nhwc(x_nhwc, params):
    """BasicBlock forward in NHWC (stride=1, downsample=None)."""
    N, H, W, C = x_nhwc.shape
    Cp = ((C + _LANE - 1) // _LANE) * _LANE              # lane-dense channels

    s1, b1 = _fold_bn(params["bn1_gamma"], params["bn1_beta"],
                      params["bn1_mean"], params["bn1_var"])
    s2, b2 = _fold_bn(params["bn2_gamma"], params["bn2_beta"],
                      params["bn2_mean"], params["bn2_var"])

    # conv weights: PyTorch (Cout, Cin, 3, 3) -> tap-major (9, Cin_p, Cout_p)
    def prep_w(w):
        w = jnp.transpose(w, (2, 3, 1, 0))               # HWIO
        w = _pad_to(_pad_to(w, 2, Cp), 3, Cp)            # zero-pad Cin, Cout
        return w.reshape(9, Cp, Cp).astype(jnp.float32)

    w1 = prep_w(params["conv1_w"])
    w2 = prep_w(params["conv2_w"])

    sb1 = jnp.stack([_pad_to(s1, 0, Cp),
                     _pad_to(b1, 0, Cp)]).astype(jnp.float32)
    sb2 = jnp.stack([_pad_to(s2, 0, Cp),
                     _pad_to(b2, 0, Cp)]).astype(jnp.float32)

    xpad = _pad_to(x_nhwc, 3, Cp)

    out = pl.pallas_call(
        _basic_block_kernel,
        out_shape=jax.ShapeDtypeStruct((N, H, W, Cp), x_nhwc.dtype),
        grid_spec=pltpu.PrefetchScalarGridSpec(
            num_scalar_prefetch=0,
            grid=(N,),
            in_specs=[
                pl.BlockSpec((1, H, W, Cp), lambda n: (n, 0, 0, 0)),
                pl.BlockSpec((9, Cp, Cp), lambda n: (0, 0, 0)),
                pl.BlockSpec((9, Cp, Cp), lambda n: (0, 0, 0)),
                pl.BlockSpec((2, Cp), lambda n: (0, 0)),
                pl.BlockSpec((2, Cp), lambda n: (0, 0)),
            ],
            out_specs=pl.BlockSpec((1, H, W, Cp), lambda n: (n, 0, 0, 0)),
            scratch_shapes=[
                pltpu.VMEM((H + 2, W + 2, Cp), jnp.float32),
                pltpu.VMEM((H + 2, W + 2, Cp), jnp.float32),
            ],
        ),
        compiler_params=pltpu.CompilerParams(
            dimension_semantics=("parallel",)),
    )(xpad, w1, w2, sb1, sb2)

    return out[..., :C]


def basic_block_forward(x_nchw, params):
    """PyTorch-layout (NCHW) entry point."""
    x = jnp.transpose(x_nchw, (0, 2, 3, 1))              # NCHW -> NHWC
    out = basic_block_forward_nhwc(x, params)
    return jnp.transpose(out, (0, 3, 1, 2))              # NHWC -> NCHW


# ------------------------------ pure-JAX ref --------------------------------


def _ref_forward(x_nchw, params):
    def conv(x, w):
        return jax.lax.conv_general_dilated(
            x, w, window_strides=(1, 1), padding="SAME",
            dimension_numbers=("NCHW", "OIHW", "NCHW"))

    def bn(x, g, b, m, v, eps=1e-5):
        g = g[None, :, None, None]
        b = b[None, :, None, None]
        m = m[None, :, None, None]
        v = v[None, :, None, None]
        return g * (x - m) / jnp.sqrt(v + eps) + b

    out = jax.nn.relu(bn(conv(x_nchw, params["conv1_w"]), params["bn1_gamma"],
                         params["bn1_beta"], params["bn1_mean"],
                         params["bn1_var"]))
    out = bn(conv(out, params["conv2_w"]), params["bn2_gamma"],
             params["bn2_beta"], params["bn2_mean"], params["bn2_var"])
    return jax.nn.relu(out + x_nchw)


# --------------------------------- main --------------------------------------


def _make_params(key, inplanes, planes):
    ks = jax.random.split(key, 8)
    return {
        "conv1_w": 0.1 * jax.random.normal(ks[0], (planes, inplanes, 3, 3),
                                           jnp.float32),
        "conv2_w": 0.1 * jax.random.normal(ks[1], (planes, planes, 3, 3),
                                           jnp.float32),
        "bn1_gamma": 1.0 + 0.1 * jax.random.normal(ks[2], (planes,), jnp.float32),
        "bn1_beta": 0.1 * jax.random.normal(ks[3], (planes,), jnp.float32),
        "bn1_mean": 0.1 * jax.random.normal(ks[4], (planes,), jnp.float32),
        "bn1_var": jnp.abs(1.0 + 0.1 * jax.random.normal(ks[5], (planes,),
                                                         jnp.float32)),
        "bn2_gamma": 1.0 + 0.1 * jax.random.normal(ks[6], (planes,), jnp.float32),
        "bn2_beta": 0.1 * jax.random.normal(ks[7], (planes,), jnp.float32),
        "bn2_mean": jnp.zeros((planes,), jnp.float32),
        "bn2_var": jnp.ones((planes,), jnp.float32),
    }


if __name__ == "__main__":
    N, C, H, W = 2, 4, 16, 16            # inplanes = planes = 4, stride = 1
    key = jax.random.PRNGKey(0)
    kx, kp = jax.random.split(key)
    x = jax.random.normal(kx, (N, C, H, W), jnp.float32)
    params = _make_params(kp, C, C)

    fwd = jax.jit(basic_block_forward)
    out = jax.block_until_ready(fwd(x, params))
    ref = jax.block_until_ready(_ref_forward(x, params))

    assert out.shape == (N, C, H, W)
    assert jnp.max(jnp.abs(out - ref)) < 1e-4, "mismatch vs pure-JAX reference"

    print("KERNEL_OK")
</pallas_src>

<mosaic_0001>
module attributes {stable_mosaic.version = 11 : i64} {
  func.func @_basic_block_kernel(%arg0: i32, %arg1: memref<1x16x16x128xf32, #tpu.memory_space<vmem>>, %arg2: memref<9x128x128xf32, #tpu.memory_space<vmem>>, %arg3: memref<9x128x128xf32, #tpu.memory_space<vmem>>, %arg4: memref<2x128xf32, #tpu.memory_space<vmem>>, %arg5: memref<2x128xf32, #tpu.memory_space<vmem>>, %arg6: memref<1x16x16x128xf32, #tpu.memory_space<vmem>>, %arg7: memref<18x18x128xf32, #tpu.memory_space<vmem>>, %arg8: memref<18x18x128xf32, #tpu.memory_space<vmem>>) attributes {dimension_semantics = [#tpu.dimension_semantics<parallel>], iteration_bounds = array<i64: 2>, scalar_prefetch = 0 : i64, scratch_operands = 2 : i64, tpu.core_type = #tpu.core_type<tc>, window_params = [{transform_indices = @transform_0, window_bounds = array<i64: 1, 16, 16, 128>}, {pipeline_mode = #tpu.pipeline_mode<synchronous>, transform_indices = @transform_1, window_bounds = array<i64: 9, 128, 128>}, {pipeline_mode = #tpu.pipeline_mode<synchronous>, transform_indices = @transform_2, window_bounds = array<i64: 9, 128, 128>}, {pipeline_mode = #tpu.pipeline_mode<synchronous>, transform_indices = @transform_3, window_bounds = array<i64: 2, 128>}, {pipeline_mode = #tpu.pipeline_mode<synchronous>, transform_indices = @transform_4, window_bounds = array<i64: 2, 128>}, {transform_indices = @transform_5, window_bounds = array<i64: 1, 16, 16, 128>}]} {
    %cst = arith.constant 0.000000e+00 : f32
    %0 = vector.broadcast %cst : f32 to vector<18x18x128xf32>
    %c0 = arith.constant 0 : index
    %c0_0 = arith.constant 0 : index
    %c0_1 = arith.constant 0 : index
    %1 = vector.load %arg7[%c0, %c0_0, %c0_1] : memref<18x18x128xf32, #tpu.memory_space<vmem>>, vector<18x18x128xf32>
    tpu.vector_store %arg7[%c0, %c0_0, %c0_1], %0 {strides = array<i32>} : memref<18x18x128xf32, #tpu.memory_space<vmem>>, vector<18x18x128xf32>,
    %cst_2 = arith.constant 0.000000e+00 : f32
    %2 = vector.broadcast %cst_2 : f32 to vector<18x18x128xf32>
    %c0_3 = arith.constant 0 : index
    %c0_4 = arith.constant 0 : index
    %c0_5 = arith.constant 0 : index
    %3 = vector.load %arg8[%c0_3, %c0_4, %c0_5] : memref<18x18x128xf32, #tpu.memory_space<vmem>>, vector<18x18x128xf32>
    tpu.vector_store %arg8[%c0_3, %c0_4, %c0_5], %2 {strides = array<i32>} : memref<18x18x128xf32, #tpu.memory_space<vmem>>, vector<18x18x128xf32>,
    %c0_6 = arith.constant 0 : index
    %c0_7 = arith.constant 0 : index
    %c0_8 = arith.constant 0 : index
    %c0_9 = arith.constant 0 : index
    %4 = vector.load %arg1[%c0_6, %c0_7, %c0_8, %c0_9] : memref<1x16x16x128xf32, #tpu.memory_space<vmem>>, vector<1x16x16x128xf32>
    %5 = vector.shape_cast %4 : vector<1x16x16x128xf32> to vector<16x16x128xf32>
    %c1 = arith.constant 1 : index
    %c1_10 = arith.constant 1 : index
    %c0_11 = arith.constant 0 : index
    %6 = vector.load %arg7[%c1, %c1_10, %c0_11] : memref<18x18x128xf32, #tpu.memory_space<vmem>>, vector<16x16x128xf32>
    tpu.vector_store %arg7[%c1, %c1_10, %c0_11], %5 {strides = array<i32>} : memref<18x18x128xf32, #tpu.memory_space<vmem>>, vector<16x16x128xf32>,
    %cst_12 = arith.constant 0.000000e+00 : f32
    %7 = vector.broadcast %cst_12 : f32 to vector<256x128xf32>
    %c0_13 = arith.constant 0 : index
    %c0_14 = arith.constant 0 : index
    %c0_15 = arith.constant 0 : index
    %8 = vector.load %arg7[%c0_13, %c0_14, %c0_15] : memref<18x18x128xf32, #tpu.memory_space<vmem>>, vector<16x16x128xf32>
    %9 = vector.shape_cast %8 : vector<16x16x128xf32> to vector<256x128xf32>
    %c0_16 = arith.constant 0 : index
    %c0_17 = arith.constant 0 : index
    %c0_18 = arith.constant 0 : index
    %10 = vector.load %arg2[%c0_16, %c0_17, %c0_18] : memref<9x128x128xf32, #tpu.memory_space<vmem>>, vector<1x128x128xf32>
    %11 = vector.shape_cast %10 : vector<1x128x128xf32> to vector<128x128xf32>
    %cst_19 = arith.constant dense<0.000000e+00> : vector<256x128xf32>
    %12 = tpu.matmul %9, %11, %cst_19 {dimension_numbers = #tpu.dot_dimension_numbers<[1], [0], [0], [1], [0, 0, 1, 1], [], []>} : vector<256x128xf32>, vector<128x128xf32>, vector<256x128xf32> -> vector<256x128xf32>
    %13 = arith.addf %7, %12 : vector<256x128xf32>
    %c0_20 = arith.constant 0 : index
    %c1_21 = arith.constant 1 : index
    %c0_22 = arith.constant 0 : index
    %14 = vector.load %arg7[%c0_20, %c1_21, %c0_22] : memref<18x18x128xf32, #tpu.memory_space<vmem>>, vector<16x16x128xf32>
    %15 = vector.shape_cast %14 : vector<16x16x128xf32> to vector<256x128xf32>
    %c1_23 = arith.constant 1 : index
    %c0_24 = arith.constant 0 : index
    %c0_25 = arith.constant 0 : index
    %16 = vector.load %arg2[%c1_23, %c0_24, %c0_25] : memref<9x128x128xf32, #tpu.memory_space<vmem>>, vector<1x128x128xf32>
    %17 = vector.shape_cast %16 : vector<1x128x128xf32> to vector<128x128xf32>
    %cst_26 = arith.constant dense<0.000000e+00> : vector<256x128xf32>
    %18 = tpu.matmul %15, %17, %cst_26 {dimension_numbers = #tpu.dot_dimension_numbers<[1], [0], [0], [1], [0, 0, 1, 1], [], []>} : vector<256x128xf32>, vector<128x128xf32>, vector<256x128xf32> -> vector<256x128xf32>
    %19 = arith.addf %13, %18 : vector<256x128xf32>
    %c0_27 = arith.constant 0 : index
    %c2 = arith.constant 2 : index
    %c0_28 = arith.constant 0 : index
    %20 = vector.load %arg7[%c0_27, %c2, %c0_28] : memref<18x18x128xf32, #tpu.memory_space<vmem>>, vector<16x16x128xf32>
    %21 = vector.shape_cast %20 : vector<16x16x128xf32> to vector<256x128xf32>
    %c2_29 = arith.constant 2 : index
    %c0_30 = arith.constant 0 : index
    %c0_31 = arith.constant 0 : index
    %22 = vector.load %arg2[%c2_29, %c0_30, %c0_31] : memref<9x128x128xf32, #tpu.memory_space<vmem>>, vector<1x128x128xf32>
    %23 = vector.shape_cast %22 : vector<1x128x128xf32> to vector<128x128xf32>
    %cst_32 = arith.constant dense<0.000000e+00> : vector<256x128xf32>
    %24 = tpu.matmul %21, %23, %cst_32 {dimension_numbers = #tpu.dot_dimension_numbers<[1], [0], [0], [1], [0, 0, 1, 1], [], []>} : vector<256x128xf32>, vector<128x128xf32>, vector<256x128xf32> -> vector<256x128xf32>
    %25 = arith.addf %19, %24 : vector<256x128xf32>
    %c1_33 = arith.constant 1 : index
    %c0_34 = arith.constant 0 : index
    %c0_35 = arith.constant 0 : index
    %26 = vector.load %arg7[%c1_33, %c0_34, %c0_35] : memref<18x18x128xf32, #tpu.memory_space<vmem>>, vector<16x16x128xf32>
    %27 = vector.shape_cast %26 : vector<16x16x128xf32> to vector<256x128xf32>
    %c3 = arith.constant 3 : index
    %c0_36 = arith.constant 0 : index
    %c0_37 = arith.constant 0 : index
    %28 = vector.load %arg2[%c3, %c0_36, %c0_37] : memref<9x128x128xf32, #tpu.memory_space<vmem>>, vector<1x128x128xf32>
    %29 = vector.shape_cast %28 : vector<1x128x128xf32> to vector<128x128xf32>
    %cst_38 = arith.constant dense<0.000000e+00> : vector<256x128xf32>
    %30 = tpu.matmul %27, %29, %cst_38 {dimension_numbers = #tpu.dot_dimension_numbers<[1], [0], [0], [1], [0, 0, 1, 1], [], []>} : vector<256x128xf32>, vector<128x128xf32>, vector<256x128xf32> -> vector<256x128xf32>
    %31 = arith.addf %25, %30 : vector<256x128xf32>
    %c1_39 = arith.constant 1 : index
    %c1_40 = arith.constant 1 : index
    %c0_41 = arith.constant 0 : index
    %32 = vector.load %arg7[%c1_39, %c1_40, %c0_41] : memref<18x18x128xf32, #tpu.memory_space<vmem>>, vector<16x16x128xf32>
    %33 = vector.shape_cast %32 : vector<16x16x128xf32> to vector<256x128xf32>
    %c4 = arith.constant 4 : index
    %c0_42 = arith.constant 0 : index
    %c0_43 = arith.constant 0 : index
    %34 = vector.load %arg2[%c4, %c0_42, %c0_43] : memref<9x128x128xf32, #tpu.memory_space<vmem>>, vector<1x128x128xf32>
    %35 = vector.shape_cast %34 : vector<1x128x128xf32> to vector<128x128xf32>
    %cst_44 = arith.constant dense<0.000000e+00> : vector<256x128xf32>
    %36 = tpu.matmul %33, %35, %cst_44 {dimension_numbers = #tpu.dot_dimension_numbers<[1], [0], [0], [1], [0, 0, 1, 1], [], []>} : vector<256x128xf32>, vector<128x128xf32>, vector<256x128xf32> -> vector<256x128xf32>
    %37 = arith.addf %31, %36 : vector<256x128xf32>
    %c1_45 = arith.constant 1 : index
    %c2_46 = arith.constant 2 : index
    %c0_47 = arith.constant 0 : index
    %38 = vector.load %arg7[%c1_45, %c2_46, %c0_47] : memref<18x18x128xf32, #tpu.memory_space<vmem>>, vector<16x16x128xf32>
    %39 = vector.shape_cast %38 : vector<16x16x128xf32> to vector<256x128xf32>
    %c5 = arith.constant 5 : index
    %c0_48 = arith.constant 0 : index
    %c0_49 = arith.constant 0 : index
    %40 = vector.load %arg2[%c5, %c0_48, %c0_49] : memref<9x128x128xf32, #tpu.memory_space<vmem>>, vector<1x128x128xf32>
    %41 = vector.shape_cast %40 : vector<1x128x128xf32> to vector<128x128xf32>
    %cst_50 = arith.constant dense<0.000000e+00> : vector<256x128xf32>
    %42 = tpu.matmul %39, %41, %cst_50 {dimension_numbers = #tpu.dot_dimension_numbers<[1], [0], [0], [1], [0, 0, 1, 1], [], []>} : vector<256x128xf32>, vector<128x128xf32>, vector<256x128xf32> -> vector<256x128xf32>
    %43 = arith.addf %37, %42 : vector<256x128xf32>
    %c2_51 = arith.constant 2 : index
    %c0_52 = arith.constant 0 : index
    %c0_53 = arith.constant 0 : index
    %44 = vector.load %arg7[%c2_51, %c0_52, %c0_53] : memref<18x18x128xf32, #tpu.memory_space<vmem>>, vector<16x16x128xf32>
    %45 = vector.shape_cast %44 : vector<16x16x128xf32> to vector<256x128xf32>
    %c6 = arith.constant 6 : index
    %c0_54 = arith.constant 0 : index
    %c0_55 = arith.constant 0 : index
    %46 = vector.load %arg2[%c6, %c0_54, %c0_55] : memref<9x128x128xf32, #tpu.memory_space<vmem>>, vector<1x128x128xf32>
    %47 = vector.shape_cast %46 : vector<1x128x128xf32> to vector<128x128xf32>
    %cst_56 = arith.constant dense<0.000000e+00> : vector<256x128xf32>
    %48 = tpu.matmul %45, %47, %cst_56 {dimension_numbers = #tpu.dot_dimension_numbers<[1], [0], [0], [1], [0, 0, 1, 1], [], []>} : vector<256x128xf32>, vector<128x128xf32>, vector<256x128xf32> -> vector<256x128xf32>
    %49 = arith.addf %43, %48 : vector<256x128xf32>
    %c2_57 = arith.constant 2 : index
    %c1_58 = arith.constant 1 : index
    %c0_59 = arith.constant 0 : index
    %50 = vector.load %arg7[%c2_57, %c1_58, %c0_59] : memref<18x18x128xf32, #tpu.memory_space<vmem>>, vector<16x16x128xf32>
    %51 = vector.shape_cast %50 : vector<16x16x128xf32> to vector<256x128xf32>
    %c7 = arith.constant 7 : index
    %c0_60 = arith.constant 0 : index
    %c0_61 = arith.constant 0 : index
    %52 = vector.load %arg2[%c7, %c0_60, %c0_61] : memref<9x128x128xf32, #tpu.memory_space<vmem>>, vector<1x128x128xf32>
    %53 = vector.shape_cast %52 : vector<1x128x128xf32> to vector<128x128xf32>
    %cst_62 = arith.constant dense<0.000000e+00> : vector<256x128xf32>
    %54 = tpu.matmul %51, %53, %cst_62 {dimension_numbers = #tpu.dot_dimension_numbers<[1], [0], [0], [1], [0, 0, 1, 1], [], []>} : vector<256x128xf32>, vector<128x128xf32>, vector<256x128xf32> -> vector<256x128xf32>
    %55 = arith.addf %49, %54 : vector<256x128xf32>
    %c2_63 = arith.constant 2 : index
    %c2_64 = arith.constant 2 : index
    %c0_65 = arith.constant 0 : index
    %56 = vector.load %arg7[%c2_63, %c2_64, %c0_65] : memref<18x18x128xf32, #tpu.memory_space<vmem>>, vector<16x16x128xf32>
    %57 = vector.shape_cast %56 : vector<16x16x128xf32> to vector<256x128xf32>
    %c8 = arith.constant 8 : index
    %c0_66 = arith.constant 0 : index
    %c0_67 = arith.constant 0 : index
    %58 = vector.load %arg2[%c8, %c0_66, %c0_67] : memref<9x128x128xf32, #tpu.memory_space<vmem>>, vector<1x128x128xf32>
    %59 = vector.shape_cast %58 : vector<1x128x128xf32> to vector<128x128xf32>
    %cst_68 = arith.constant dense<0.000000e+00> : vector<256x128xf32>
    %60 = tpu.matmul %57, %59, %cst_68 {dimension_numbers = #tpu.dot_dimension_numbers<[1], [0], [0], [1], [0, 0, 1, 1], [], []>} : vector<256x128xf32>, vector<128x128xf32>, vector<256x128xf32> -> vector<256x128xf32>
    %61 = arith.addf %55, %60 : vector<256x128xf32>
    %c0_69 = arith.constant 0 : index
    %c0_70 = arith.constant 0 : index
    %62 = vector.load %arg4[%c0_69, %c0_70] : memref<2x128xf32, #tpu.memory_space<vmem>>, vector<1x128xf32>
    %63 = vector.broadcast %62 : vector<1x128xf32> to vector<256x128xf32>
    %64 = arith.mulf %61, %63 : vector<256x128xf32>
    %c1_71 = arith.constant 1 : index
    %c0_72 = arith.constant 0 : index
    %65 = vector.load %arg4[%c1_71, %c0_72] : memref<2x128xf32, #tpu.memory_space<vmem>>, vector<1x128xf32>
    %66 = vector.broadcast %65 : vector<1x128xf32> to vector<256x128xf32>
    %67 = arith.addf %64, %66 : vector<256x128xf32>
    %cst_73 = arith.constant 0.000000e+00 : f32
    %68 = vector.broadcast %cst_73 : f32 to vector<256x128xf32>
    %69 = arith.maximumf %67, %68 : vector<256x128xf32>
    %70 = vector.shape_cast %69 : vector<256x128xf32> to vector<16x16x128xf32>
    %c1_74 = arith.constant 1 : index
    %c1_75 = arith.constant 1 : index
    %c0_76 = arith.constant 0 : index
    %71 = vector.load %arg8[%c1_74, %c1_75, %c0_76] : memref<18x18x128xf32, #tpu.memory_space<vmem>>, vector<16x16x128xf32>
    tpu.vector_store %arg8[%c1_74, %c1_75, %c0_76], %70 {strides = array<i32>} : memref<18x18x128xf32, #tpu.memory_space<vmem>>, vector<16x16x128xf32>,
    %cst_77 = arith.constant 0.000000e+00 : f32
    %72 = vector.broadcast %cst_77 : f32 to vector<256x128xf32>
    %c0_78 = arith.constant 0 : index
    %c0_79 = arith.constant 0 : index
    %c0_80 = arith.constant 0 : index
    %73 = vector.load %arg8[%c0_78, %c0_79, %c0_80] : memref<18x18x128xf32, #tpu.memory_space<vmem>>, vector<16x16x128xf32>
    %74 = vector.shape_cast %73 : vector<16x16x128xf32> to vector<256x128xf32>
    %c0_81 = arith.constant 0 : index
    %c0_82 = arith.constant 0 : index
    %c0_83 = arith.constant 0 : index
    %75 = vector.load %arg3[%c0_81, %c0_82, %c0_83] : memref<9x128x128xf32, #tpu.memory_space<vmem>>, vector<1x128x128xf32>
    %76 = vector.shape_cast %75 : vector<1x128x128xf32> to vector<128x128xf32>
    %cst_84 = arith.constant dense<0.000000e+00> : vector<256x128xf32>
    %77 = tpu.matmul %74, %76, %cst_84 {dimension_numbers = #tpu.dot_dimension_numbers<[1], [0], [0], [1], [0, 0, 1, 1], [], []>} : vector<256x128xf32>, vector<128x128xf32>, vector<256x128xf32> -> vector<256x128xf32>
    %78 = arith.addf %72, %77 : vector<256x128xf32>
    %c0_85 = arith.constant 0 : index
    %c1_86 = arith.constant 1 : index
    %c0_87 = arith.constant 0 : index
    %79 = vector.load %arg8[%c0_85, %c1_86, %c0_87] : memref<18x18x128xf32, #tpu.memory_space<vmem>>, vector<16x16x128xf32>
    %80 = vector.shape_cast %79 : vector<16x16x128xf32> to vector<256x128xf32>
    %c1_88 = arith.constant 1 : index
    %c0_89 = arith.constant 0 : index
    %c0_90 = arith.constant 0 : index
    %81 = vector.load %arg3[%c1_88, %c0_89, %c0_90] : memref<9x128x128xf32, #tpu.memory_space<vmem>>, vector<1x128x128xf32>
    %82 = vector.shape_cast %81 : vector<1x128x128xf32> to vector<128x128xf32>
    %cst_91 = arith.constant dense<0.000000e+00> : vector<256x128xf32>
    %83 = tpu.matmul %80, %82, %cst_91 {dimension_numbers = #tpu.dot_dimension_numbers<[1], [0], [0], [1], [0, 0, 1, 1], [], []>} : vector<256x128xf32>, vector<128x128xf32>, vector<256x128xf32> -> vector<256x128xf32>
    %84 = arith.addf %78, %83 : vector<256x128xf32>
    %c0_92 = arith.constant 0 : index
    %c2_93 = arith.constant 2 : index
    %c0_94 = arith.constant 0 : index
    %85 = vector.load %arg8[%c0_92, %c2_93, %c0_94] : memref<18x18x128xf32, #tpu.memory_space<vmem>>, vector<16x16x128xf32>
    %86 = vector.shape_cast %85 : vector<16x16x128xf32> to vector<256x128xf32>
    %c2_95 = arith.constant 2 : index
    %c0_96 = arith.constant 0 : index
    %c0_97 = arith.constant 0 : index
    %87 = vector.load %arg3[%c2_95, %c0_96, %c0_97] : memref<9x128x128xf32, #tpu.memory_space<vmem>>, vector<1x128x128xf32>
    %88 = vector.shape_cast %87 : vector<1x128x128xf32> to vector<128x128xf32>
    %cst_98 = arith.constant dense<0.000000e+00> : vector<256x128xf32>
    %89 = tpu.matmul %86, %88, %cst_98 {dimension_numbers = #tpu.dot_dimension_numbers<[1], [0], [0], [1], [0, 0, 1, 1], [], []>} : vector<256x128xf32>, vector<128x128xf32>, vector<256x128xf32> -> vector<256x128xf32>
    %90 = arith.addf %84, %89 : vector<256x128xf32>
    %c1_99 = arith.constant 1 : index
    %c0_100 = arith.constant 0 : index
    %c0_101 = arith.constant 0 : index
    %91 = vector.load %arg8[%c1_99, %c0_100, %c0_101] : memref<18x18x128xf32, #tpu.memory_space<vmem>>, vector<16x16x128xf32>
    %92 = vector.shape_cast %91 : vector<16x16x128xf32> to vector<256x128xf32>
    %c3_102 = arith.constant 3 : index
    %c0_103 = arith.constant 0 : index
    %c0_104 = arith.constant 0 : index
    %93 = vector.load %arg3[%c3_102, %c0_103, %c0_104] : memref<9x128x128xf32, #tpu.memory_space<vmem>>, vector<1x128x128xf32>
    %94 = vector.shape_cast %93 : vector<1x128x128xf32> to vector<128x128xf32>
    %cst_105 = arith.constant dense<0.000000e+00> : vector<256x128xf32>
    %95 = tpu.matmul %92, %94, %cst_105 {dimension_numbers = #tpu.dot_dimension_numbers<[1], [0], [0], [1], [0, 0, 1, 1], [], []>} : vector<256x128xf32>, vector<128x128xf32>, vector<256x128xf32> -> vector<256x128xf32>
    %96 = arith.addf %90, %95 : vector<256x128xf32>
    %c1_106 = arith.constant 1 : index
    %c1_107 = arith.constant 1 : index
    %c0_108 = arith.constant 0 : index
    %97 = vector.load %arg8[%c1_106, %c1_107, %c0_108] : memref<18x18x128xf32, #tpu.memory_space<vmem>>, vector<16x16x128xf32>
    %98 = vector.shape_cast %97 : vector<16x16x128xf32> to vector<256x128xf32>
    %c4_109 = arith.constant 4 : index
    %c0_110 = arith.constant 0 : index
    %c0_111 = arith.constant 0 : index
    %99 = vector.load %arg3[%c4_109, %c0_110, %c0_111] : memref<9x128x128xf32, #tpu.memory_space<vmem>>, vector<1x128x128xf32>
    %100 = vector.shape_cast %99 : vector<1x128x128xf32> to vector<128x128xf32>
    %cst_112 = arith.constant dense<0.000000e+00> : vector<256x128xf32>
    %101 = tpu.matmul %98, %100, %cst_112 {dimension_numbers = #tpu.dot_dimension_numbers<[1], [0], [0], [1], [0, 0, 1, 1], [], []>} : vector<256x128xf32>, vector<128x128xf32>, vector<256x128xf32> -> vector<256x128xf32>
    %102 = arith.addf %96, %101 : vector<256x128xf32>
    %c1_113 = arith.constant 1 : index
    %c2_114 = arith.constant 2 : index
    %c0_115 = arith.constant 0 : index
    %103 = vector.load %arg8[%c1_113, %c2_114, %c0_115] : memref<18x18x128xf32, #tpu.memory_space<vmem>>, vector<16x16x128xf32>
    %104 = vector.shape_cast %103 : vector<16x16x128xf32> to vector<256x128xf32>
    %c5_116 = arith.constant 5 : index
    %c0_117 = arith.constant 0 : index
    %c0_118 = arith.constant 0 : index
    %105 = vector.load %arg3[%c5_116, %c0_117, %c0_118] : memref<9x128x128xf32, #tpu.memory_space<vmem>>, vector<1x128x128xf32>
    %106 = vector.shape_cast %105 : vector<1x128x128xf32> to vector<128x128xf32>
    %cst_119 = arith.constant dense<0.000000e+00> : vector<256x128xf32>
    %107 = tpu.matmul %104, %106, %cst_119 {dimension_numbers = #tpu.dot_dimension_numbers<[1], [0], [0], [1], [0, 0, 1, 1], [], []>} : vector<256x128xf32>, vector<128x128xf32>, vector<256x128xf32> -> vector<256x128xf32>
    %108 = arith.addf %102, %107 : vector<256x128xf32>
    %c2_120 = arith.constant 2 : index
    %c0_121 = arith.constant 0 : index
    %c0_122 = arith.constant 0 : index
    %109 = vector.load %arg8[%c2_120, %c0_121, %c0_122] : memref<18x18x128xf32, #tpu.memory_space<vmem>>, vector<16x16x128xf32>
    %110 = vector.shape_cast %109 : vector<16x16x128xf32> to vector<256x128xf32>
    %c6_123 = arith.constant 6 : index
    %c0_124 = arith.constant 0 : index
    %c0_125 = arith.constant 0 : index
    %111 = vector.load %arg3[%c6_123, %c0_124, %c0_125] : memref<9x128x128xf32, #tpu.memory_space<vmem>>, vector<1x128x128xf32>
    %112 = vector.shape_cast %111 : vector<1x128x128xf32> to vector<128x128xf32>
    %cst_126 = arith.constant dense<0.000000e+00> : vector<256x128xf32>
    %113 = tpu.matmul %110, %112, %cst_126 {dimension_numbers = #tpu.dot_dimension_numbers<[1], [0], [0], [1], [0, 0, 1, 1], [], []>} : vector<256x128xf32>, vector<128x128xf32>, vector<256x128xf32> -> vector<256x128xf32>
    %114 = arith.addf %108, %113 : vector<256x128xf32>
    %c2_127 = arith.constant 2 : index
    %c1_128 = arith.constant 1 : index
    %c0_129 = arith.constant 0 : index
    %115 = vector.load %arg8[%c2_127, %c1_128, %c0_129] : memref<18x18x128xf32, #tpu.memory_space<vmem>>, vector<16x16x128xf32>
    %116 = vector.shape_cast %115 : vector<16x16x128xf32> to vector<256x128xf32>
    %c7_130 = arith.constant 7 : index
    %c0_131 = arith.constant 0 : index
    %c0_132 = arith.constant 0 : index
    %117 = vector.load %arg3[%c7_130, %c0_131, %c0_132] : memref<9x128x128xf32, #tpu.memory_space<vmem>>, vector<1x128x128xf32>
    %118 = vector.shape_cast %117 : vector<1x128x128xf32> to vector<128x128xf32>
    %cst_133 = arith.constant dense<0.000000e+00> : vector<256x128xf32>
    %119 = tpu.matmul %116, %118, %cst_133 {dimension_numbers = #tpu.dot_dimension_numbers<[1], [0], [0], [1], [0, 0, 1, 1], [], []>} : vector<256x128xf32>, vector<128x128xf32>, vector<256x128xf32> -> vector<256x128xf32>
    %120 = arith.addf %114, %119 : vector<256x128xf32>
    %c2_134 = arith.constant 2 : index
    %c2_135 = arith.constant 2 : index
    %c0_136 = arith.constant 0 : index
    %121 = vector.load %arg8[%c2_134, %c2_135, %c0_136] : memref<18x18x128xf32, #tpu.memory_space<vmem>>, vector<16x16x128xf32>
    %122 = vector.shape_cast %121 : vector<16x16x128xf32> to vector<256x128xf32>
    %c8_137 = arith.constant 8 : index
    %c0_138 = arith.constant 0 : index
    %c0_139 = arith.constant 0 : index
    %123 = vector.load %arg3[%c8_137, %c0_138, %c0_139] : memref<9x128x128xf32, #tpu.memory_space<vmem>>, vector<1x128x128xf32>
    %124 = vector.shape_cast %123 : vector<1x128x128xf32> to vector<128x128xf32>
    %cst_140 = arith.constant dense<0.000000e+00> : vector<256x128xf32>
    %125 = tpu.matmul %122, %124, %cst_140 {dimension_numbers = #tpu.dot_dimension_numbers<[1], [0], [0], [1], [0, 0, 1, 1], [], []>} : vector<256x128xf32>, vector<128x128xf32>, vector<256x128xf32> -> vector<256x128xf32>
    %126 = arith.addf %120, %125 : vector<256x128xf32>
    %c0_141 = arith.constant 0 : index
    %c0_142 = arith.constant 0 : index
    %127 = vector.load %arg5[%c0_141, %c0_142] : memref<2x128xf32, #tpu.memory_space<vmem>>, vector<1x128xf32>
    %128 = vector.broadcast %127 : vector<1x128xf32> to vector<256x128xf32>
    %129 = arith.mulf %126, %128 : vector<256x128xf32>
    %c1_143 = arith.constant 1 : index
    %c0_144 = arith.constant 0 : index
    %130 = vector.load %arg5[%c1_143, %c0_144] : memref<2x128xf32, #tpu.memory_space<vmem>>, vector<1x128xf32>
    %131 = vector.broadcast %130 : vector<1x128xf32> to vector<256x128xf32>
    %132 = arith.addf %129, %131 : vector<256x128xf32>
    %133 = vector.shape_cast %5 : vector<16x16x128xf32> to vector<256x128xf32>
    %134 = arith.addf %132, %133 : vector<256x128xf32>
    %cst_145 = arith.constant 0.000000e+00 : f32
    %135 = vector.broadcast %cst_145 : f32 to vector<256x128xf32>
    %136 = arith.maximumf %134, %135 : vector<256x128xf32>
    %137 = vector.shape_cast %136 : vector<256x128xf32> to vector<16x16x128xf32>
    %c0_146 = arith.constant 0 : index
    %c0_147 = arith.constant 0 : index
    %c0_148 = arith.constant 0 : index
    %c0_149 = arith.constant 0 : index
    %138 = vector.load %arg6[%c0_146, %c0_147, %c0_148, %c0_149] : memref<1x16x16x128xf32, #tpu.memory_space<vmem>>, vector<1x16x16x128xf32>
    %139 = vector.shape_cast %138 : vector<1x16x16x128xf32> to vector<16x16x128xf32>
    %140 = vector.shape_cast %137 : vector<16x16x128xf32> to vector<1x16x16x128xf32>
    tpu.vector_store %arg6[%c0_146, %c0_147, %c0_148, %c0_149], %140 {strides = array<i32>} : memref<1x16x16x128xf32, #tpu.memory_space<vmem>>, vector<1x16x16x128xf32>,
    return
  }
  func.func @transform_0(%arg0: i32) -> (i32, i32, i32, i32) {
    %c0_i32 = arith.constant 0 : i32
    %c0_i32_0 = arith.constant 0 : i32
    %c0_i32_1 = arith.constant 0 : i32
    %c0_i32_2 = arith.constant 0 : i32
    return %arg0, %c0_i32, %c0_i32_0, %c0_i32_1 : i32, i32, i32, i32
  }
  func.func @transform_1(%arg0: i32) -> (i32, i32, i32) {
    %c0_i32 = arith.constant 0 : i32
    %c0_i32_0 = arith.constant 0 : i32
    %c0_i32_1 = arith.constant 0 : i32
    %c0_i32_2 = arith.constant 0 : i32
    return %c0_i32, %c0_i32_0, %c0_i32_1 : i32, i32, i32
  }
  func.func @transform_2(%arg0: i32) -> (i32, i32, i32) {
    %c0_i32 = arith.constant 0 : i32
    %c0_i32_0 = arith.constant 0 : i32
    %c0_i32_1 = arith.constant 0 : i32
    %c0_i32_2 = arith.constant 0 : i32
    return %c0_i32, %c0_i32_0, %c0_i32_1 : i32, i32, i32
  }
  func.func @transform_3(%arg0: i32) -> (i32, i32) {
    %c0_i32 = arith.constant 0 : i32
    %c0_i32_0 = arith.constant 0 : i32
    %c0_i32_1 = arith.constant 0 : i32
    return %c0_i32, %c0_i32_0 : i32, i32
  }
  func.func @transform_4(%arg0: i32) -> (i32, i32) {
    %c0_i32 = arith.constant 0 : i32
    %c0_i32_0 = arith.constant 0 : i32
    %c0_i32_1 = arith.constant 0 : i32
    return %c0_i32, %c0_i32_0 : i32, i32
  }
  func.func @transform_5(%arg0: i32) -> (i32, i32, i32, i32) {
    %c0_i32 = arith.constant 0 : i32
    %c0_i32_0 = arith.constant 0 : i32
    %c0_i32_1 = arith.constant 0 : i32
    %c0_i32_2 = arith.constant 0 : i32
    return %arg0, %c0_i32, %c0_i32_0, %c0_i32_1 : i32, i32, i32, i32
  }
}

</mosaic_0001>

<bundles_post_ra>
// kernel: basic_block_forward.1
= control target key start
LH: loop header
LB: loop body
LE: loop exit
PB: predicated region body
PF: predicated region fallthrough
CT: control target
= control target key end

     0   :  { %s8824_s18 = smov 0   ;;  %s12070_s0 = inlined_call_operand.vmem [shape: f32[2,16,16,128], index: 0, kind: input, shape index: {}]   ;;  %s12071_s1 = inlined_call_operand.vmem [shape: f32[9,128,128], index: 1, kind: input, shape index: {}]   ;;  %s12072_s2 = inlined_call_operand.vmem [shape: f32[9,128,128], index: 2, kind: input, shape index: {}]   ;;  %s12073_s3 = inlined_call_operand.vmem [shape: f32[2,128], index: 3, kind: input, shape index: {}]   ;;  %s12074_s4 = inlined_call_operand.vmem [shape: f32[2,128], index: 4, kind: input, shape index: {}]   ;;  %s12075_s5 = inlined_call_operand.vmem [shape: f32[2,16,16,128], index: 5, kind: output, shape index: {}]  }
   0x1 LB: > { %s6142_s19 = sadd.s32 4294967295, %s8791_s18   ;;  %p6146_p0 = scmp.ge.s32.totalorder %s8791_s18, 1  ;;  %s8791_s18 = sphi %s8824_s18, %s15_s18  }
   0x2   : > { %p187_p1 = scmp.lt.s32.totalorder %s8791_s18, 3 }
   0x4   : > { %p188_p2 = pnand %p6146_p0, %p187_p1 }
   0x6   : > { %191 = sbr.rel (%p188_p2) target bundleno = 1049 (0x419), region = 40 }
   0xb   : > { %v8835_v0 = vld [vmem:[%s12071_s1 + $0xf8] sm:$0xff]  ;;  %v8845_v2 = vld [vmem:[%s12071_s1 + $0xf0] sm:$0xff]  ;;  %p8849_p3 = scmp.lt.s32.totalorder %s6142_s19, 1  ;;  %v8793_v4 = vmov 0.0   ;;  %v6164_v5 = vld [vmem:[%s12071_s1 + $0xe8] sm:$0xff] }
   0xc   : > { %v8840_v1 = vld [vmem:[%s12071_s1 + $0x78] sm:$0xff]  ;;  %7279 = vmatprep.subr.mxu0 %v8835_v0  ;;  %v8858_v3 = vld [vmem:[%s12071_s1 + $0x70] sm:$0xff]  ;;  %225 = vst [vmem:[#allocation2] sm:$0xff] %v8793_v4  ;;  %226 = vst [vmem:[#allocation2 + $0x8] sm:$0xff] %v8793_v4  ;;  %7391 = vmatprep.mubr.f32.mxu1 %v8793_v4 }
   0xd   : > { %7359 = vmatprep.subr.mxu1 %v8840_v1  ;;  %227 = vst [vmem:[#allocation2 + $0x10] sm:$0x3] %v8793_v4  ;;  %228 = vst [vmem:[#allocation2 + $0x18] sm:$0xff] %v8793_v4  ;;  %7280 = vmatpush3.msra.mxu0 %v8835_v0  ;;  %v443_v6 = vld [vmem:[%s12071_s1 + $0x68] sm:$0xff]  ;;  %s12390_s19 = smov (!%p8849_p3, %s6142_s19), 1  ;;  %v6163_v7 = vld [vmem:[%s12071_s1 + $0xe0] sm:$0xff] }
   0xe   : > { %229 = vst [vmem:[#allocation2 + $0x20] sm:$0xff] %v8793_v4  ;;  %230 = vst [vmem:[#allocation2 + $0x28] sm:$0x3] %v8793_v4  ;;  %7360 = vmatpush3.msra.mxu1 %v8840_v1  ;;  %7281 = vmatprep.subr.mxu0 %v8845_v2  ;;  %v442_v8 = vld [vmem:[%s12071_s1 + $0x60] sm:$0xff]  ;;  %s6413_s12 = sshll.u32 %s12390_s19, 8  ;;  %v6162_v9 = vld [vmem:[%s12071_s1 + $0xd8] sm:$0xff] }
   0xf   : > { %231 = vst [vmem:[#allocation2 + $0x30] sm:$0xff] %v8793_v4  ;;  %232 = vst [vmem:[#allocation2 + $0x38] sm:$0xff] %v8793_v4  ;;  %7361 = vmatprep.subr.mxu1 %v8858_v3  ;;  %7282 = vmatpush3.msra.mxu0 %v8845_v2  ;;  %v441_v10 = vld [vmem:[%s12071_s1 + $0x58] sm:$0xff]  ;;  %v6161_v11 = vld [vmem:[%s12071_s1 + $0xd0] sm:$0xff]  ;;  %s9010_s25 = scalar_lea.vmem %s12070_s0, %s6413_s12  ;;  %s11861_s16 = scalar_lea.vmem %s12075_s5, %s6413_s12 }
  0x10   : > { %233 = vst [vmem:[#allocation2 + $0x40] sm:$0x3] %v8793_v4  ;;  %234 = vst [vmem:[#allocation2 + $0x48] sm:$0xff] %v8793_v4  ;;  %7362 = vmatpush3.msra.mxu1 %v8858_v3  ;;  %7283 = vmatprep.subr.mxu0 %v6164_v5  ;;  %v440_v12 = vld [vmem:[%s12071_s1 + $0x50] sm:$0xff]  ;;  %v6160_v13 = vld [vmem:[%s12071_s1 + $0xc8] sm:$0xff] }
  0x11   : > { %235 = vst [vmem:[#allocation2 + $0x50] sm:$0xff] %v8793_v4  ;;  %236 = vst [vmem:[#allocation2 + $0x58] sm:$0x3] %v8793_v4  ;;  %7363 = vmatprep.subr.mxu1 %v443_v6  ;;  %7284 = vmatpush3.msra.mxu0 %v6164_v5  ;;  %v439_v14 = vld [vmem:[%s12071_s1 + $0x48] sm:$0xff]  ;;  %v6159_v15 = vld [vmem:[%s12071_s1 + $0xc0] sm:$0xff] }
  0x12   : > { %237 = vst [vmem:[#allocation2 + $0x60] sm:$0xff] %v8793_v4  ;;  %238 = vst [vmem:[#allocation2 + $0x68] sm:$0xff] %v8793_v4  ;;  %7364 = vmatpush3.msra.mxu1 %v443_v6  ;;  %7285 = vmatprep.subr.mxu0 %v6163_v7  ;;  %v9022_v16 = vld [vmem:[%s9010_s25] sm:$0xff]  ;;  %v9029_v18 = vld [vmem:[%s9010_s25 + $0x8] sm:$0xff] }
  0x13   : > { %239 = vst [vmem:[#allocation2 + $0x70] sm:$0x3] %v8793_v4  ;;  %240 = vst [vmem:[#allocation2 + $0x78] sm:$0xff] %v8793_v4  ;;  %7365 = vmatprep.subr.mxu1 %v442_v8  ;;  %7286 = vmatpush3.msra.mxu0 %v6163_v7  ;;  %v438_v17 = vld [vmem:[%s12071_s1 + $0x40] sm:$0xff]  ;;  %v9032_v19 = vld [vmem:[%s9010_s25 + $0x10] sm:$0xff] }
  0x14   : > { %241 = vst [vmem:[#allocation2 + $0x80] sm:$0xff] %v8793_v4  ;;  %242 = vst [vmem:[#allocation2 + $0x88] sm:$0x3] %v8793_v4  ;;  %7366 = vmatpush3.msra.mxu1 %v442_v8  ;;  %7287 = vmatprep.subr.mxu0 %v6162_v9  ;;  %v6158_v20 = vld [vmem:[%s12071_s1 + $0xb8] sm:$0xff]  ;;  %v9043_v22 = vld [vmem:[%s9010_s25 + $0x20] sm:$0xff] }
  0x15   : > { %243 = vst [vmem:[#allocation2 + $0x90] sm:$0xff] %v8793_v4  ;;  %244 = vst [vmem:[#allocation2 + $0x98] sm:$0xff] %v8793_v4  ;;  %7367 = vmatprep.subr.mxu1 %v441_v10  ;;  %7288 = vmatpush3.msra.mxu0 %v6162_v9  ;;  %v9040_v21 = vld [vmem:[%s9010_s25 + $0x18] sm:$0xff]  ;;  %v9051_v24 = vld [vmem:[%s9010_s25 + $0x28] sm:$0xff] }
  0x16   : > { %245 = vst [vmem:[#allocation2 + $0xa0] sm:$0x3] %v8793_v4  ;;  %246 = vst [vmem:[#allocation2 + $0xa8] sm:$0xff] %v8793_v4  ;;  %7368 = vmatpush3.msra.mxu1 %v441_v10  ;;  %7289 = vmatprep.subr.mxu0 %v6161_v11  ;;  %v437_v23 = vld [vmem:[%s12071_s1 + $0x38] sm:$0xff]  ;;  %v9054_v25 = vld [vmem:[%s9010_s25 + $0x30] sm:$0xff] }
  0x17   : > { %247 = vst [vmem:[#allocation2 + $0xb0] sm:$0xff] %v8793_v4  ;;  %248 = vst [vmem:[#allocation2 + $0xb8] sm:$0x3] %v8793_v4  ;;  %7369 = vmatprep.subr.mxu1 %v440_v12  ;;  %7290 = vmatpush3.msra.mxu0 %v6161_v11  ;;  %v6157_v26 = vld [vmem:[%s12071_s1 + $0xb0] sm:$0xff]  ;;  %v9062_v27 = vld [vmem:[%s9010_s25 + $0x38] sm:$0xff] }
  0x18   : > { %249 = vst [vmem:[#allocation2 + $0xc0] sm:$0xff] %v8793_v4  ;;  %250 = vst [vmem:[#allocation2 + $0xc8] sm:$0xff] %v8793_v4  ;;  %7370 = vmatpush3.msra.mxu1 %v440_v12  ;;  %7291 = vmatprep.subr.mxu0 %v6160_v13  ;;  %v9065_v28 = vld [vmem:[%s9010_s25 + $0x40] sm:$0xff]  ;;  %v436_v29 = vld [vmem:[%s12071_s1 + $0x30] sm:$0xff] }
  0x19   : > { %251 = vst [vmem:[#allocation2 + $0xd0] sm:$0x3] %v8793_v4  ;;  %252 = vst [vmem:[#allocation2 + $0xd8] sm:$0xff] %v8793_v4  ;;  %7371 = vmatprep.subr.mxu1 %v439_v14  ;;  %7292 = vmatpush3.msra.mxu0 %v6160_v13  ;;  %v9073_v30 = vld [vmem:[%s9010_s25 + $0x48] sm:$0xff]  ;;  %v9076_v31 = vld [vmem:[%s9010_s25 + $0x50] sm:$0xff] }
  0x1a   : > { %253 = vst [vmem:[#allocation2 + $0xe0] sm:$0xff] %v8793_v4  ;;  %254 = vst [vmem:[#allocation2 + $0xe8] sm:$0x3] %v8793_v4  ;;  %7372 = vmatpush3.msra.mxu1 %v439_v14  ;;  %7293 = vmatprep.subr.mxu0 %v6159_v15  ;;  %v6156_v32 = vld [vmem:[%s12071_s1 + $0xa8] sm:$0xff]  ;;  %v9084_v33 = vld [vmem:[%s9010_s25 + $0x58] sm:$0xff] }
  0x1b   : > { %255 = vst [vmem:[#allocation2 + $0xf0] sm:$0xff] %v8793_v4  ;;  %256 = vst [vmem:[#allocation2 + $0xf8] sm:$0xff] %v8793_v4  ;;  %7373 = vmatprep.subr.mxu1 %v438_v17  ;;  %7294 = vmatpush3.msra.mxu0 %v6159_v15  ;;  %v9087_v34 = vld [vmem:[%s9010_s25 + $0x60] sm:$0xff]  ;;  %v435_v35 = vld [vmem:[%s12071_s1 + $0x28] sm:$0xff] }
  0x1c   : > { %257 = vst [vmem:[#allocation2 + $0x100] sm:$0x3] %v8793_v4  ;;  %258 = vst [vmem:[#allocation2 + $0x108] sm:$0xff] %v8793_v4  ;;  %7374 = vmatpush3.msra.mxu1 %v438_v17  ;;  %7295 = vmatprep.subr.mxu0 %v6158_v20  ;;  %v9095_v36 = vld [vmem:[%s9010_s25 + $0x68] sm:$0xff]  ;;  %v9098_v37 = vld [vmem:[%s9010_s25 + $0x70] sm:$0xff] }
  0x1d   : > { %259 = vst [vmem:[#allocation2 + $0x110] sm:$0xff] %v8793_v4  ;;  %260 = vst [vmem:[#allocation2 + $0x118] sm:$0x3] %v8793_v4  ;;  %7375 = vmatprep.subr.mxu1 %v437_v23  ;;  %7296 = vmatpush3.msra.mxu0 %v6158_v20  ;;  %v9103_v38 = vld [vmem:[%s9010_s25 + $0x78] sm:$0xff]  ;;  %v6155_v39 = vld [vmem:[%s12071_s1 + $0xa0] sm:$0xff] }
  0x1e   : > { %261 = vst [vmem:[#allocation2 + $0x120] sm:$0xff] %v8793_v4  ;;  %262 = vst [vmem:[#allocation2 + $0x128] sm:$0xff] %v8793_v4  ;;  %7376 = vmatpush3.msra.mxu1 %v437_v23  ;;  %7297 = vmatprep.subr.mxu0 %v6157_v26  ;;  %v434_v40 = vld [vmem:[%s12071_s1 + $0x20] sm:$0xff]  ;;  %v6154_v42 = vld [vmem:[%s12071_s1 + $0x98] sm:$0xff] }
  0x1f   : > { %263 = vst [vmem:[#allocation2 + $0x130] sm:$0x3] %v8793_v4  ;;  %264 = vst [vmem:[#allocation2 + $0x138] sm:$0xff] %v8793_v4  ;;  %7377 = vmatprep.subr.mxu1 %v436_v29  ;;  %7298 = vmatpush3.msra.mxu0 %v6157_v26  ;;  %v9113_v41 = vld [vmem:[%s9010_s25 + $0x80] sm:$0xff]  ;;  %v433_v43 = vld [vmem:[%s12071_s1 + $0x18] sm:$0xff] }
  0x20   : > { %265 = vst [vmem:[#allocation2 + $0x140] sm:$0xff] %v8793_v4  ;;  %266 = vst [vmem:[#allocation2 + $0x148] sm:$0x3] %v8793_v4  ;;  %7378 = vmatpush3.msra.mxu1 %v436_v29  ;;  %7299 = vmatprep.subr.mxu0 %v6156_v32  ;;  %v9123_v44 = vld [vmem:[%s9010_s25 + $0x88] sm:$0xff]  ;;  %v6153_v45 = vld [vmem:[%s12071_s1 + $0x90] sm:$0xff] }
  0x21   : > { %267 = vst [vmem:[#allocation2 + $0x150] sm:$0xff] %v8793_v4  ;;  %268 = vst [vmem:[#allocation2 + $0x158] sm:$0xff] %v8793_v4  ;;  %7379 = vmatprep.subr.mxu1 %v435_v35  ;;  %7300 = vmatpush3.msra.mxu0 %v6156_v32  ;;  %v432_v46 = vld [vmem:[%s12071_s1 + $0x10] sm:$0xff]  ;;  %v6152_v47 = vld [vmem:[%s12071_s1 + $0x88] sm:$0xff] }
  0x22   : > { %269 = vst [vmem:[#allocation2 + $0x160] sm:$0x3] %v8793_v4  ;;  %270 = vst [vmem:[#allocation2 + $0x168] sm:$0xff] %v8793_v4  ;;  %7380 = vmatpush3.msra.mxu1 %v435_v35  ;;  %7301 = vmatprep.subr.mxu0 %v6155_v39  ;;  %v431_v48 = vld [vmem:[%s12071_s1 + $0x8] sm:$0xff]  ;;  %v9139_v49 = vld [vmem:[%s9010_s25 + $0x90] sm:$0xff] }
  0x23   : > { %271 = vst [vmem:[#allocation2 + $0x170] sm:$0xff] %v8793_v4  ;;  %272 = vst [vmem:[#allocation2 + $0x178] sm:$0x3] %v8793_v4  ;;  %7381 = vmatprep.subr.mxu1 %v434_v40  ;;  %7302 = vmatpush3.msra.mxu0 %v6155_v39  ;;  %v9143_v50 = vld [vmem:[%s9010_s25 + $0x98] sm:$0xff]  ;;  %v6151_v51 = vld [vmem:[%s12071_s1 + $0x80] sm:$0xff] }
  0x24   : > { %273 = vst [vmem:[#allocation2 + $0x180] sm:$0xff] %v8793_v4  ;;  %274 = vst [vmem:[#allocation2 + $0x188] sm:$0xff] %v8793_v4  ;;  %7382 = vmatpush3.msra.mxu1 %v434_v40  ;;  %7303 = vmatprep.subr.mxu0 %v6154_v42  ;;  %v430_v52 = vld [vmem:[%s12071_s1] sm:$0xff]  ;;  %v9157_v55 = vld [vmem:[%s9010_s25 + $0xa8] sm:$0xff] }
  0x25   : > { %275 = vst [vmem:[#allocation2 + $0x190] sm:$0x3] %v8793_v4  ;;  %276 = vst [vmem:[#allocation2 + $0x198] sm:$0xff] %v8793_v4  ;;  %7383 = vmatprep.subr.mxu1 %v433_v43  ;;  %7304 = vmatpush3.msra.mxu0 %v6154_v42  ;;  %v9153_v53 = vld [vmem:[%s9010_s25 + $0xa0] sm:$0xff]  ;;  %v447_v56 = vld [vmem:[#allocation2 + $0x9] sm:$0xff] }
  0x26   : > { %277 = vst [vmem:[#allocation2 + $0x1a0] sm:$0xff] %v8793_v4  ;;  %278 = vst [vmem:[#allocation2 + $0x1a8] sm:$0x3] %v8793_v4  ;;  %7384 = vmatpush3.msra.mxu1 %v433_v43  ;;  %7305 = vmatprep.subr.mxu0 %v6153_v45  ;;  %v446_v54 = vld [vmem:[#allocation2 + $0x1] sm:$0xff]  ;;  %v9161_v57 = vld [vmem:[%s9010_s25 + $0xb0] sm:$0xff] }
  0x27   : > { %279 = vst [vmem:[#allocation3] sm:$0xff] %v8793_v4  ;;  %280 = vst [vmem:[#allocation3 + $0x8] sm:$0xff] %v8793_v4  ;;  %7385 = vmatprep.subr.mxu1 %v432_v46  ;;  %7306 = vmatpush3.msra.mxu0 %v6153_v45  ;;  %v9164_v58 = vld [vmem:[%s9010_s25 + $0xb8] sm:$0xff]  ;;  %v9172_v60 = vld [vmem:[%s9010_s25 + $0xc0] sm:$0xff] }
  0x28   : > { %281 = vst [vmem:[#allocation3 + $0x10] sm:$0x3] %v8793_v4  ;;  %282 = vst [vmem:[#allocation3 + $0x18] sm:$0xff] %v8793_v4  ;;  %7386 = vmatpush3.msra.mxu1 %v432_v46  ;;  %7307 = vmatprep.subr.mxu0 %v6152_v47  ;;  %v6182_v59 = vld [vmem:[%s12071_s1 + $0x178] sm:$0xff]  ;;  %v9179_v62 = vld [vmem:[%s9010_s25 + $0xc8] sm:$0xff] }
  0x29   : > { %283 = vst [vmem:[#allocation3 + $0x20] sm:$0xff] %v8793_v4  ;;  %284 = vst [vmem:[#allocation3 + $0x28] sm:$0x3] %v8793_v4  ;;  %7387 = vmatprep.subr.mxu1 %v431_v48  ;;  %7308 = vmatpush3.msra.mxu0 %v6152_v47  ;;  %v6181_v63 = vld [vmem:[%s12071_s1 + $0x170] sm:$0xff]  ;;  %v6198_v0 = vld [vmem:[%s12071_s1 + $0x1f8] sm:$0xff] }
  0x2a   : > { %285 = vst [vmem:[#allocation3 + $0x30] sm:$0xff] %v8793_v4  ;;  %286 = vst [vmem:[#allocation3 + $0x38] sm:$0xff] %v8793_v4  ;;  %7388 = vmatpush3.msra.mxu1 %v431_v48  ;;  %7309 = vmatprep.subr.mxu0 %v6151_v51  ;;  %v9190_v1 = vld [vmem:[%s9010_s25 + $0xd0] sm:$0xff]  ;;  %v9197_v3 = vld [vmem:[%s9010_s25 + $0xd8] sm:$0xff] }
  0x2b   : > { %287 = vst [vmem:[#allocation3 + $0x40] sm:$0x3] %v8793_v4  ;;  %288 = vst [vmem:[#allocation3 + $0x48] sm:$0xff] %v8793_v4  ;;  %7389 = vmatprep.subr.mxu1 %v430_v52  ;;  %7310 = vmatpush3.msra.mxu0 %v6151_v51  ;;  %v9207_v6 = vld [vmem:[%s9010_s25 + $0xe0] sm:$0xff]  ;;  %v9210_v7 = vld [vmem:[%s9010_s25 + $0xe8] sm:$0xff] }
  0x2c   : > { %289 = vst [vmem:[#allocation3 + $0x50] sm:$0xff] %v8793_v4  ;;  %290 = vst [vmem:[#allocation3 + $0x58] sm:$0x3] %v8793_v4  ;;  %7311 = vmatprep.mubr.f32.mxu0 %v446_v54  ;;  %7390 = vmatpush3.msra.mxu1 %v430_v52  ;;  %v6179_v10 = vld [vmem:[%s12071_s1 + $0x160] sm:$0xff]  ;;  %v6197_v11 = vld [vmem:[%s12071_s1 + $0x1f0] sm:$0xff] }
  0x2d   : > { %291 = vst [vmem:[#allocation3 + $0x60] sm:$0xff] %v8793_v4  ;;  %292 = vst [vmem:[#allocation3 + $0x68] sm:$0xff] %v8793_v4  ;;  %7312 = vmatmul.mubr.f32.vlgmr.msra.gmra.mxu0 %v447_v56  ;;  %7392 = vmatmul.mubr.f32.vlgmr.msra.gmra.mxu1 %v8793_v4  ;;  %v6178_v14 = vld [vmem:[%s12071_s1 + $0x158] sm:$0xff]  ;;  %v6196_v15 = vld [vmem:[%s12071_s1 + $0x1e8] sm:$0xff] }
  0x2e   : > { %293 = vst [vmem:[#allocation3 + $0x70] sm:$0x3] %v8793_v4  ;;  %294 = vst [vmem:[#allocation3 + $0x78] sm:$0xff] %v8793_v4  ;;  %7439 = vmatprep.subr.mxu0 %v6182_v59  ;;  %7314 = vmatprep.mubr.f32.mxu0 %v9022_v16  ;;  %v6177_v23 = vld [vmem:[%s12071_s1 + $0x150] sm:$0xff]  ;;  %v6195_v26 = vld [vmem:[%s12071_s1 + $0x1e0] sm:$0xff] }
  0x2f   : > { %295 = vst [vmem:[#allocation3 + $0x80] sm:$0xff] %v8793_v4  ;;  %296 = vst [vmem:[#allocation3 + $0x88] sm:$0x3] %v8793_v4  ;;  %7440 = vmatpush3.msra.mxu0 %v6182_v59  ;;  %7519 = vmatprep.subr.mxu1 %v6198_v0  ;;  %v6176_v32 = vld [vmem:[%s12071_s1 + $0x148] sm:$0xff]  ;;  %v6194_v35 = vld [vmem:[%s12071_s1 + $0x1d8] sm:$0xff] }
  0x30   : > { %297 = vst [vmem:[#allocation3 + $0x90] sm:$0xff] %v8793_v4  ;;  %298 = vst [vmem:[#allocation3 + $0x98] sm:$0xff] %v8793_v4  ;;  %7441 = vmatprep.subr.mxu0 %v6181_v63  ;;  %7520 = vmatpush3.msra.mxu1 %v6198_v0  ;;  %v6175_v40 = vld [vmem:[%s12071_s1 + $0x140] sm:$0xff]  ;;  %v6174_v43 = vld [vmem:[%s12071_s1 + $0x138] sm:$0xff] }
  0x31   : > { %299 = vst [vmem:[#allocation3 + $0xa0] sm:$0x3] %v8793_v4  ;;  %300 = vst [vmem:[#allocation3 + $0xa8] sm:$0xff] %v8793_v4  ;;  %7315 = vmatmul.mubr.f32.gmra.mxu0 %v9029_v18  ;;  %7521 = vmatprep.subr.mxu1 %v6197_v11  ;;  %v9309_v46 = vld [vmem:[%s9010_s25 + $0xf8] sm:$0xff]  ;;  %v6172_v52 = vld [vmem:[%s12071_s1 + $0x128] sm:$0xff] }
  0x32   : > { %301 = vst [vmem:[#allocation3 + $0xb0] sm:$0xff] %v8793_v4  ;;  %302 = vst [vmem:[#allocation3 + $0xb8] sm:$0x3] %v8793_v4  ;;  %7442 = vmatpush3.msra.mxu0 %v6181_v63  ;;  %7317 = vmatprep.mubr.f32.mxu0 %v9032_v19  ;;  %v6171_v56 = vld [vmem:[%s12071_s1 + $0x120] sm:$0xff]  ;;  %v6170_v63 = vld [vmem:[%s12071_s1 + $0x118] sm:$0xff] }
  0x33   : > { %303 = vst [vmem:[#allocation3 + $0xc0] sm:$0xff] %v8793_v4  ;;  %304 = vst [vmem:[#allocation3 + $0xc8] sm:$0xff] %v8793_v4  ;;  %7522 = vmatpush3.msra.mxu1 %v6197_v11 }
  0x34   : > { %305 = vst [vmem:[#allocation3 + $0xd0] sm:$0x3] %v8793_v4  ;;  %306 = vst [vmem:[#allocation3 + $0xd8] sm:$0xff] %v8793_v4  ;;  %7523 = vmatprep.subr.mxu1 %v6196_v15 }
  0x35   : > { %307 = vst [vmem:[#allocation3 + $0xe0] sm:$0xff] %v8793_v4  ;;  %308 = vst [vmem:[#allocation3 + $0xe8] sm:$0x3] %v8793_v4  ;;  %7318 = vmatmul.mubr.f32.gmra.mxu0 %v9040_v21  ;;  %7524 = vmatpush3.msra.mxu1 %v6196_v15 }
  0x36   : > { %309 = vst [vmem:[#allocation3 + $0xf0] sm:$0xff] %v8793_v4  ;;  %310 = vst [vmem:[#allocation3 + $0xf8] sm:$0xff] %v8793_v4  ;;  %7320 = vmatprep.mubr.f32.mxu0 %v9043_v22  ;;  %7525 = vmatprep.subr.mxu1 %v6195_v26 }
  0x37   : > { %311 = vst [vmem:[#allocation3 + $0x100] sm:$0x3] %v8793_v4  ;;  %312 = vst [vmem:[#allocation3 + $0x108] sm:$0xff] %v8793_v4  ;;  %7526 = vmatpush3.msra.mxu1 %v6195_v26  ;;  %v6184_v26 = vld [vmem:[%s12071_s1 + $0x188] sm:$0xff] }
  0x38   : > { %313 = vst [vmem:[#allocation3 + $0x110] sm:$0xff] %v8793_v4  ;;  %314 = vst [vmem:[#allocation3 + $0x118] sm:$0x3] %v8793_v4  ;;  %7527 = vmatprep.subr.mxu1 %v6194_v35 }
  0x39   : > { %315 = vst [vmem:[#allocation3 + $0x120] sm:$0xff] %v8793_v4  ;;  %316 = vst [vmem:[#allocation3 + $0x128] sm:$0xff] %v8793_v4  ;;  %7321 = vmatmul.mubr.f32.gmra.mxu0 %v9051_v24  ;;  %7528 = vmatpush3.msra.mxu1 %v6194_v35  ;;  %v6183_v35 = vld [vmem:[%s12071_s1 + $0x180] sm:$0xff] }
  0x3a   : > { %317 = vst [vmem:[#allocation3 + $0x130] sm:$0x3] %v8793_v4  ;;  %318 = vst [vmem:[#allocation3 + $0x138] sm:$0xff] %v8793_v4  ;;  %7323 = vmatprep.mubr.f32.mxu0 %v9054_v25 }
  0x3b   : > { %319 = vst [vmem:[#allocation3 + $0x140] sm:$0xff] %v8793_v4  ;;  %320 = vst [vmem:[#allocation3 + $0x148] sm:$0x3] %v8793_v4 }
  0x3c   : > { %321 = vst [vmem:[#allocation3 + $0x150] sm:$0xff] %v8793_v4  ;;  %322 = vst [vmem:[#allocation3 + $0x158] sm:$0xff] %v8793_v4 }
  0x3d   : > { %323 = vst [vmem:[#allocation3 + $0x160] sm:$0x3] %v8793_v4  ;;  %324 = vst [vmem:[#allocation3 + $0x168] sm:$0xff] %v8793_v4  ;;  %7324 = vmatmul.mubr.f32.gmra.mxu0 %v9062_v27 }
  0x3e   : > { %325 = vst [vmem:[#allocation3 + $0x170] sm:$0xff] %v8793_v4  ;;  %326 = vst [vmem:[#allocation3 + $0x178] sm:$0x3] %v8793_v4  ;;  %7326 = vmatprep.mubr.f32.mxu0 %v9065_v28 }
  0x3f   : > { %327 = vst [vmem:[#allocation3 + $0x180] sm:$0xff] %v8793_v4  ;;  %328 = vst [vmem:[#allocation3 + $0x188] sm:$0xff] %v8793_v4 }
  0x40   : > { %329 = vst [vmem:[#allocation3 + $0x190] sm:$0x3] %v8793_v4  ;;  %330 = vst [vmem:[#allocation3 + $0x198] sm:$0xff] %v8793_v4 }
  0x41   : > { %331 = vst [vmem:[#allocation3 + $0x1a0] sm:$0xff] %v8793_v4  ;;  %332 = vst [vmem:[#allocation3 + $0x1a8] sm:$0x3] %v8793_v4  ;;  %v6180_v4 = vld [vmem:[%s12071_s1 + $0x168] sm:$0xff]  ;;  %7327 = vmatmul.mubr.f32.gmra.mxu0 %v9073_v30 }
  0x42   : > { %366 = vst [vmem:[#allocation2 + $0x19] sm:$0xff] %v9022_v16  ;;  %367 = vst [vmem:[#allocation2 + $0x21] sm:$0xff] %v9029_v18  ;;  %7443 = vmatprep.subr.mxu0 %v6180_v4  ;;  %7329 = vmatprep.mubr.f32.mxu0 %v9076_v31 }
  0x43   : > { %368 = vst [vmem:[#allocation2 + $0x31] sm:$0xff] %v9032_v19  ;;  %369 = vst [vmem:[#allocation2 + $0x39] sm:$0xff] %v9040_v21  ;;  %7444 = vmatpush3.msra.mxu0 %v6180_v4  ;;  %v6169_v4 = vld [vmem:[%s12071_s1 + $0x110] sm:$0xff] }
  0x44   : > { %370 = vst [vmem:[#allocation2 + $0x49] sm:$0xff] %v9043_v22  ;;  %371 = vst [vmem:[#allocation2 + $0x51] sm:$0xff] %v9051_v24  ;;  %7445 = vmatprep.subr.mxu0 %v6179_v10 }
  0x45   : > { %372 = vst [vmem:[#allocation2 + $0x61] sm:$0xff] %v9054_v25  ;;  %373 = vst [vmem:[#allocation2 + $0x69] sm:$0xff] %v9062_v27  ;;  %7446 = vmatpush3.msra.mxu0 %v6179_v10 }
  0x46   : > { %374 = vst [vmem:[#allocation2 + $0x79] sm:$0xff] %v9065_v28  ;;  %375 = vst [vmem:[#allocation2 + $0x81] sm:$0xff] %v9073_v30  ;;  %7447 = vmatprep.subr.mxu0 %v6178_v14  ;;  %v6193_v30 = vld [vmem:[%s12071_s1 + $0x1d0] sm:$0xff]  ;;  %7330 = vmatmul.mubr.f32.gmra.mxu0 %v9084_v33 }
  0x47   : > { %376 = vst [vmem:[#allocation2 + $0x91] sm:$0xff] %v9076_v31  ;;  %377 = vst [vmem:[#allocation2 + $0x99] sm:$0xff] %v9084_v33  ;;  %7448 = vmatpush3.msra.mxu0 %v6178_v14  ;;  %7332 = vmatprep.mubr.f32.mxu0 %v9087_v34  ;;  %v6192_v33 = vld [vmem:[%s12071_s1 + $0x1c8] sm:$0xff] }
  0x48   : > { %378 = vst [vmem:[#allocation2 + $0xa9] sm:$0xff] %v9087_v34  ;;  %379 = vst [vmem:[#allocation2 + $0xb1] sm:$0xff] %v9095_v36  ;;  %7449 = vmatprep.subr.mxu0 %v6177_v23  ;;  %7529 = vmatprep.subr.mxu1 %v6193_v30  ;;  %v9301_v34 = vld [vmem:[%s9010_s25 + $0xf0] sm:$0xff]  ;;  %v6168_v14 = vld [vmem:[%s12071_s1 + $0x108] sm:$0xff] }
  0x49   : > { %380 = vst [vmem:[#allocation2 + $0xc1] sm:$0xff] %v9098_v37  ;;  %381 = vst [vmem:[#allocation2 + $0xc9] sm:$0xff] %v9103_v38  ;;  %v9175_v61 = vld [vmem:[#allocation2 + $0x18] sm:$0xff]  ;;  %v9193_v2 = vld [vmem:[#allocation2 + $0x20] sm:$0xff]  ;;  %7450 = vmatpush3.msra.mxu0 %v6177_v23  ;;  %7530 = vmatpush3.msra.mxu1 %v6193_v30 }
  0x4a   : > { %382 = vst [vmem:[#allocation2 + $0xd9] sm:$0xff] %v9113_v41  ;;  %383 = vst [vmem:[#allocation2 + $0xe1] sm:$0xff] %v9123_v44  ;;  %7394 = vmatprep.mubr.f32.mxu1 %v9175_v61  ;;  %v9204_v5 = vld [vmem:[#allocation2 + $0x30] sm:$0xff]  ;;  %v9217_v8 = vld [vmem:[#allocation2 + $0x38] sm:$0xff]  ;;  %7451 = vmatprep.subr.mxu0 %v6176_v32 }
  0x4b   : > { %384 = vst [vmem:[#allocation2 + $0xf1] sm:$0xff] %v9139_v49  ;;  %385 = vst [vmem:[#allocation2 + $0xf9] sm:$0xff] %v9143_v50  ;;  %7395 = vmatmul.mubr.f32.gmra.mxu1 %v9193_v2  ;;  %v9220_v9 = vld [vmem:[#allocation2 + $0x48] sm:$0xff]  ;;  %v9232_v12 = vld [vmem:[#allocation2 + $0x50] sm:$0xff]  ;;  %7452 = vmatpush3.msra.mxu0 %v6176_v32 }
  0x4c   : > { %386 = vst [vmem:[#allocation2 + $0x109] sm:$0xff] %v9153_v53  ;;  %387 = vst [vmem:[#allocation2 + $0x111] sm:$0xff] %v9157_v55  ;;  %7397 = vmatprep.mubr.f32.mxu1 %v9204_v5  ;;  %v9234_v13 = vld [vmem:[#allocation2 + $0x60] sm:$0xff]  ;;  %v9246_v17 = vld [vmem:[#allocation2 + $0x68] sm:$0xff]  ;;  %7453 = vmatprep.subr.mxu0 %v6175_v40 }
  0x4d   : > { %388 = vst [vmem:[#allocation2 + $0x121] sm:$0xff] %v9161_v57  ;;  %389 = vst [vmem:[#allocation2 + $0x129] sm:$0xff] %v9164_v58  ;;  %v9248_v20 = vld [vmem:[#allocation2 + $0x78] sm:$0xff]  ;;  %v9260_v25 = vld [vmem:[#allocation2 + $0x80] sm:$0xff]  ;;  %7454 = vmatpush3.msra.mxu0 %v6175_v40  ;;  %7531 = vmatprep.subr.mxu1 %v6192_v33 }
  0x4e   : > { %390 = vst [vmem:[#allocation2 + $0x139] sm:$0xff] %v9172_v60  ;;  %391 = vst [vmem:[#allocation2 + $0x141] sm:$0xff] %v9179_v62  ;;  %v9262_v29 = vld [vmem:[#allocation2 + $0x90] sm:$0xff]  ;;  %v9274_v28 = vld [vmem:[#allocation2 + $0x98] sm:$0xff]  ;;  %7333 = vmatmul.mubr.f32.gmra.mxu0 %v9095_v36  ;;  %7455 = vmatprep.subr.mxu0 %v6174_v43 }
  0x4f   : > { %392 = vst [vmem:[#allocation2 + $0x151] sm:$0xff] %v9190_v1  ;;  %393 = vst [vmem:[#allocation2 + $0x159] sm:$0xff] %v9197_v3  ;;  %7398 = vmatmul.mubr.f32.gmra.mxu1 %v9217_v8  ;;  %v9276_v39 = vld [vmem:[#allocation2 + $0xa8] sm:$0xff]  ;;  %v9288_v31 = vld [vmem:[#allocation2 + $0xb0] sm:$0xff]  ;;  %7335 = vmatprep.mubr.f32.mxu0 %v9098_v37 }
  0x50   : > { %394 = vst [vmem:[#allocation2 + $0x169] sm:$0xff] %v9207_v6  ;;  %395 = vst [vmem:[#allocation2 + $0x171] sm:$0xff] %v9210_v7  ;;  %7400 = vmatprep.mubr.f32.mxu1 %v9220_v9  ;;  %v9290_v42 = vld [vmem:[#allocation2 + $0xc0] sm:$0xff]  ;;  %v9305_v45 = vld [vmem:[#allocation2 + $0xc8] sm:$0xff]  ;;  %7456 = vmatpush3.msra.mxu0 %v6174_v43 }
  0x51   : > { %396 = vst [vmem:[#allocation2 + $0x181] sm:$0xff] %v9301_v34  ;;  %v9311_v47 = vld [vmem:[#allocation2 + $0xd8] sm:$0xff]  ;;  %397 = vst [vmem:[#allocation2 + $0x189] sm:$0xff] %v9309_v46  ;;  %v6173_v36 = vld [vmem:[%s12071_s1 + $0x130] sm:$0xff]  ;;  %7532 = vmatpush3.msra.mxu1 %v6192_v33 }
  0x52   : > { %v6191_v37 = vld [vmem:[%s12071_s1 + $0x1c0] sm:$0xff]  ;;  %7336 = vmatmul.mubr.f32.gmra.mxu0 %v9103_v38  ;;  %7457 = vmatprep.subr.mxu0 %v6173_v36  ;;  %v9326_v51 = vld [vmem:[#allocation2 + $0xf0] sm:$0xff]  ;;  %v6190_v38 = vld [vmem:[%s12071_s1 + $0x1b8] sm:$0xff] }
  0x53   : > { %7401 = vmatmul.mubr.f32.gmra.mxu1 %v9232_v12  ;;  %7338 = vmatprep.mubr.f32.mxu0 %v9113_v41  ;;  %v9324_v48 = vld [vmem:[#allocation2 + $0xe0] sm:$0xff]  ;;  %v9338_v41 = vld [vmem:[#allocation2 + $0xf8] sm:$0xff]  ;;  %v9340_v54 = vld [vmem:[#allocation2 + $0x108] sm:$0xff] }
  0x54   : > { %7403 = vmatprep.mubr.f32.mxu1 %v9234_v13  ;;  %7533 = vmatprep.subr.mxu1 %v6191_v37  ;;  %v9354_v59 = vld [vmem:[#allocation2 + $0x120] sm:$0xff]  ;;  %v946_v40 = vld [vmem:[#allocation2 + $0xa] sm:$0xff] }
  0x55   : > { %7458 = vmatpush3.msra.mxu0 %v6173_v36  ;;  %7534 = vmatpush3.msra.mxu1 %v6191_v37  ;;  %v9368_v0 = vld [vmem:[#allocation2 + $0x138] sm:$0xff]  ;;  %v9380_v10 = vld [vmem:[#allocation2 + $0x140] sm:$0xff]  ;;  %v6212_v33 = vld [vmem:[%s12071_s1 + $0x268] sm:$0xff] }
  0x56   : > { %7339 = vmatmul.mubr.f32.gmra.mxu0 %v9123_v44  ;;  %7459 = vmatprep.subr.mxu0 %v6172_v52  ;;  %v6189_v44 = vld [vmem:[%s12071_s1 + $0x1b0] sm:$0xff]  ;;  %v6167_v23 = vld [vmem:[%s12071_s1 + $0x100] sm:$0xff]  ;;  %v6230_v36 = vld [vmem:[%s12071_s1 + $0x2f8] sm:$0xff] }
  0x57   : > { %7404 = vmatmul.mubr.f32.gmra.mxu1 %v9246_v17  ;;  %7341 = vmatprep.mubr.f32.mxu0 %v9139_v49  ;;  %v9352_v49 = vld [vmem:[#allocation2 + $0x110] sm:$0xff]  ;;  %v9396_v15 = vld [vmem:[#allocation2 + $0x168] sm:$0xff]  ;;  %v9422_v30 = vld [vmem:[#allocation2 + $0x1a] sm:$0xff] }
  0x58   : > { %7406 = vmatprep.mubr.f32.mxu1 %v9248_v20  ;;  %7535 = vmatprep.subr.mxu1 %v6190_v38  ;;  %v9382_v11 = vld [vmem:[#allocation2 + $0x150] sm:$0xff]  ;;  %v945_v32 = vld [vmem:[#allocation2 + $0x2] sm:$0xff]  ;;  %v9446_v37 = vld [vmem:[#allocation2 + $0x3a] sm:$0xff] }
  0x59   : > { %7460 = vmatpush3.msra.mxu0 %v6172_v52  ;;  %7536 = vmatpush3.msra.mxu1 %v6190_v38  ;;  %v9428_v43 = vld [vmem:[#allocation2 + $0x22] sm:$0xff]  ;;  %v6210_v52 = vld [vmem:[%s12071_s1 + $0x258] sm:$0xff] }
  0x5a   : > { %7342 = vmatmul.mubr.f32.gmra.mxu0 %v9143_v50  ;;  %7461 = vmatprep.subr.mxu0 %v6171_v56  ;;  %v6188_v50 = vld [vmem:[%s12071_s1 + $0x1a8] sm:$0xff] }
  0x5b   : > { %7407 = vmatmul.mubr.f32.gmra.mxu1 %v9260_v25  ;;  %7344 = vmatprep.mubr.f32.mxu0 %v9153_v53  ;;  %v9366_v53 = vld [vmem:[#allocation2 + $0x128] sm:$0xff] }
  0x5c   : > { %7409 = vmatprep.mubr.f32.mxu1 %v9262_v29  ;;  %7537 = vmatprep.subr.mxu1 %v6189_v44  ;;  %v9463_v38 = vld [vmem:[#allocation2 + $0x62] sm:$0xff] }
  0x5d   : > { %7462 = vmatpush3.msra.mxu0 %v6171_v56  ;;  %7538 = vmatpush3.msra.mxu1 %v6189_v44  ;;  %v6209_v56 = vld [vmem:[%s12071_s1 + $0x250] sm:$0xff]  ;;  %v9477_v44 = vld [vmem:[#allocation2 + $0x7a] sm:$0xff] }
  0x5e   : > { %7345 = vmatmul.mubr.f32.gmra.mxu0 %v9157_v55  ;;  %7463 = vmatprep.subr.mxu0 %v6170_v63  ;;  %v6187_v55 = vld [vmem:[%s12071_s1 + $0x1a0] sm:$0xff] }
  0x5f   : > { %7410 = vmatmul.mubr.f32.gmra.mxu1 %v9274_v28  ;;  %7347 = vmatprep.mubr.f32.mxu0 %v9161_v57 }
  0x60   : > { %7412 = vmatprep.mubr.f32.mxu1 %v9276_v39  ;;  %7539 = vmatprep.subr.mxu1 %v6188_v50 }
  0x61   : > { %7464 = vmatpush3.msra.mxu0 %v6170_v63  ;;  %7540 = vmatpush3.msra.mxu1 %v6188_v50  ;;  %v6208_v63 = vld [vmem:[%s12071_s1 + $0x248] sm:$0xff]  ;;  %v9491_v50 = vld [vmem:[#allocation2 + $0x92] sm:$0xff] }
  0x62   : > { %7348 = vmatmul.mubr.f32.gmra.mxu0 %v9164_v58  ;;  %7465 = vmatprep.subr.mxu0 %v6169_v4  ;;  %v6186_v58 = vld [vmem:[%s12071_s1 + $0x198] sm:$0xff] }
  0x63   : > { %7413 = vmatmul.mubr.f32.gmra.mxu1 %v9288_v31  ;;  %7350 = vmatprep.mubr.f32.mxu0 %v9172_v60  ;;  %v9394_v60 = vld [vmem:[#allocation2 + $0x158] sm:$0xff] }
  0x64   : > { %7415 = vmatprep.mubr.f32.mxu1 %v9290_v42  ;;  %7541 = vmatprep.subr.mxu1 %v6187_v55 }
  0x65   : > { %7466 = vmatpush3.msra.mxu0 %v6169_v4  ;;  %7542 = vmatpush3.msra.mxu1 %v6187_v55  ;;  %v6207_v4 = vld [vmem:[%s12071_s1 + $0x240] sm:$0xff]  ;;  %v9505_v55 = vld [vmem:[#allocation2 + $0xaa] sm:$0xff] }
  0x66   : > { %7351 = vmatmul.mubr.f32.gmra.mxu0 %v9179_v62  ;;  %7467 = vmatprep.subr.mxu0 %v6168_v14  ;;  %v6185_v62 = vld [vmem:[%s12071_s1 + $0x190] sm:$0xff] }
  0x67   : > { %7416 = vmatmul.mubr.f32.gmra.mxu1 %v9305_v45  ;;  %7353 = vmatprep.mubr.f32.mxu0 %v9190_v1  ;;  %v9408_v1 = vld [vmem:[#allocation2 + $0x170] sm:$0xff] }
  0x68   : > { %7418 = vmatprep.mubr.f32.mxu1 %v9311_v47  ;;  %7543 = vmatprep.subr.mxu1 %v6186_v58 }
  0x69   : > { %7468 = vmatpush3.msra.mxu0 %v6168_v14  ;;  %7544 = vmatpush3.msra.mxu1 %v6186_v58  ;;  %v6206_v14 = vld [vmem:[%s12071_s1 + $0x238] sm:$0xff]  ;;  %v9519_v58 = vld [vmem:[#allocation2 + $0xc2] sm:$0xff] }
  0x6a   : > { %7354 = vmatmul.mubr.f32.gmra.mxu0 %v9197_v3  ;;  %7469 = vmatprep.subr.mxu0 %v6167_v23  ;;  %v6214_v3 = vld [vmem:[%s12071_s1 + $0x278] sm:$0xff] }
  0x6b   : > { %7419 = vmatmul.mubr.f32.gmra.mxu1 %v9324_v48  ;;  %7356 = vmatprep.mubr.f32.mxu0 %v9207_v6 }
  0x6c   : > { %7421 = vmatprep.mubr.f32.mxu1 %v9326_v51  ;;  %7545 = vmatprep.subr.mxu1 %v6185_v62 }
  0x6d   : > { %7470 = vmatpush3.msra.mxu0 %v6167_v23  ;;  %7546 = vmatpush3.msra.mxu1 %v6185_v62  ;;  %v6205_v23 = vld [vmem:[%s12071_s1 + $0x230] sm:$0xff]  ;;  %v9533_v62 = vld [vmem:[#allocation2 + $0xda] sm:$0xff] }
  0x6e   : > { %7357 = vmatmul.mubr.f32.gmra.mxu0 %v9210_v7  ;;  %7547 = vmatprep.subr.mxu1 %v6184_v26  ;;  %v6213_v7 = vld [vmem:[%s12071_s1 + $0x270] sm:$0xff] }
  0x6f   : > { %7422 = vmatmul.mubr.f32.gmra.mxu1 %v9338_v41  ;;  %7471 = vmatprep.mubr.f32.mxu0 %v945_v32  ;;  %v9547_v32 = vld [vmem:[#allocation2 + $0xf2] sm:$0xff] }
  0x70   : > { %7424 = vmatprep.mubr.f32.mxu1 %v9340_v54  ;;  %7548 = vmatpush3.msra.mxu1 %v6184_v26  ;;  %v6204_v26 = vld [vmem:[%s12071_s1 + $0x228] sm:$0xff] }
  0x71   : > { %7599 = vmatprep.subr.mxu0 %v6214_v3  ;;  %7549 = vmatprep.subr.mxu1 %v6183_v35 }
  0x72   : > { %7472 = vmatmul.mubr.f32.vlgmr.msra.gmra.mxu0 %v946_v40  ;;  %7550 = vmatpush3.msra.mxu1 %v6183_v35  ;;  %v9561_v35 = vld [vmem:[#allocation2 + $0x10a] sm:$0xff]  ;;  %v6202_v40 = vld [vmem:[%s12071_s1 + $0x218] sm:$0xff] }
  0x73   : > { %7425 = vmatmul.mubr.f32.gmra.mxu1 %v9352_v49  ;;  %7600 = vmatpush3.msra.mxu0 %v6214_v3  ;;  %v6203_v3 = vld [vmem:[%s12071_s1 + $0x220] sm:$0xff] }
  0x74   : > { %7427 = vmatprep.mubr.f32.mxu1 %v9354_v59  ;;  %7474 = vmatprep.mubr.f32.mxu0 %v9422_v30 }
  0x75   : > { %7601 = vmatprep.subr.mxu0 %v6213_v7  ;;  %7679 = vmatprep.subr.mxu1 %v6230_v36 }
  0x76   : > { %7602 = vmatpush3.msra.mxu0 %v6213_v7  ;;  %v9575_v7 = vld [vmem:[#allocation2 + $0x122] sm:$0xff] }
  0x77   : > { %7428 = vmatmul.mubr.f32.gmra.mxu1 %v9366_v53  ;;  %7475 = vmatmul.mubr.f32.gmra.mxu0 %v9428_v43 }
  0x78   : > { %7430 = vmatprep.mubr.f32.mxu1 %v9368_v0  ;;  %7603 = vmatprep.subr.mxu0 %v6212_v33 }
  0x79   : > { %7604 = vmatpush3.msra.mxu0 %v6212_v33  ;;  %v6201_v33 = vld [vmem:[%s12071_s1 + $0x210] sm:$0xff] }
  0x7b   : > { %7431 = vmatmul.mubr.f32.gmra.mxu1 %v9380_v10 }
  0x7c   : > { %7433 = vmatprep.mubr.f32.mxu1 %v9382_v11 }
  0x7f   : > { %7434 = vmatmul.mubr.f32.gmra.mxu1 %v9394_v60 }
  0x80   : > { %7436 = vmatprep.mubr.f32.mxu1 %v9396_v15 }
  0x83   : > { %7437 = vmatmul.mubr.f32.gmra.mxu1 %v9408_v1 }
  0x84   : > { %7551 = vmatprep.mubr.f32.mxu1 %v9175_v61  ;;  %v9434_v61 = vld [vmem:[#allocation2 + $0x32] sm:$0xff] }
  0x85   : > { %7477 = vmatprep.mubr.f32.mxu0 %v9434_v61 }
  0x86   : > { %7478 = vmatmul.mubr.f32.gmra.mxu0 %v9446_v37 }
  0x87   : > { %7552 = vmatmul.mubr.f32.vlgmr.msra.gmra.mxu1 %v9193_v2  ;;  %v6211_v2 = vld [vmem:[%s12071_s1 + $0x260] sm:$0xff] }
  0x88   : > { %7554 = vmatprep.mubr.f32.mxu1 %v9204_v5  ;;  %v9449_v5 = vld [vmem:[#allocation2 + $0x4a] sm:$0xff]  ;;  %7605 = vmatprep.subr.mxu0 %v6211_v2 }
  0x89   : > { %7680 = vmatpush3.msra.mxu1 %v6230_v36  ;;  %7480 = vmatprep.mubr.f32.mxu0 %v9449_v5  ;;  %v6200_v36 = vld [vmem:[%s12071_s1 + $0x208] sm:$0xff] }
  0x8a   : > { %7606 = vmatpush3.msra.mxu0 %v6211_v2  ;;  %v9589_v2 = vld [vmem:[#allocation2 + $0x13a] sm:$0xff] }
  0x8b   : > { %7555 = vmatmul.mubr.f32.gmra.mxu1 %v9217_v8  ;;  %v6229_v8 = vld [vmem:[%s12071_s1 + $0x2f0] sm:$0xff]  ;;  %7607 = vmatprep.subr.mxu0 %v6210_v52 }
  0x8c   : > { %7557 = vmatprep.mubr.f32.mxu1 %v9220_v9  ;;  %v9460_v9 = vld [vmem:[#allocation2 + $0x52] sm:$0xff]  ;;  %7681 = vmatprep.subr.mxu1 %v6229_v8 }
  0x8d   : > { %7481 = vmatmul.mubr.f32.gmra.mxu0 %v9460_v9  ;;  %7682 = vmatpush3.msra.mxu1 %v6229_v8  ;;  %v6218_v8 = vld [vmem:[%s12071_s1 + $0x298] sm:$0xff] }
  0x8e   : > { %7483 = vmatprep.mubr.f32.mxu0 %v9463_v38  ;;  %7608 = vmatpush3.msra.mxu0 %v6210_v52  ;;  %v9603_v52 = vld [vmem:[#allocation2 + $0x152] sm:$0xff] }
  0x8f   : > { %7558 = vmatmul.mubr.f32.gmra.mxu1 %v9232_v12  ;;  %v6228_v12 = vld [vmem:[%s12071_s1 + $0x2e8] sm:$0xff]  ;;  %7609 = vmatprep.subr.mxu0 %v6209_v56 }
  0x90   : > { %7560 = vmatprep.mubr.f32.mxu1 %v9234_v13  ;;  %v9474_v13 = vld [vmem:[#allocation2 + $0x6a] sm:$0xff]  ;;  %7683 = vmatprep.subr.mxu1 %v6228_v12 }
  0x91   : > { %7484 = vmatmul.mubr.f32.gmra.mxu0 %v9474_v13  ;;  %7684 = vmatpush3.msra.mxu1 %v6228_v12  ;;  %v6217_v12 = vld [vmem:[%s12071_s1 + $0x290] sm:$0xff] }
  0x92   : > { %7486 = vmatprep.mubr.f32.mxu0 %v9477_v44  ;;  %7610 = vmatpush3.msra.mxu0 %v6209_v56  ;;  %v9617_v56 = vld [vmem:[#allocation2 + $0x16a] sm:$0xff] }
  0x93   : > { %7561 = vmatmul.mubr.f32.gmra.mxu1 %v9246_v17  ;;  %v6227_v17 = vld [vmem:[%s12071_s1 + $0x2e0] sm:$0xff]  ;;  %7611 = vmatprep.subr.mxu0 %v6208_v63 }
  0x94   : > { %7563 = vmatprep.mubr.f32.mxu1 %v9248_v20  ;;  %v9488_v20 = vld [vmem:[#allocation2 + $0x82] sm:$0xff]  ;;  %7685 = vmatprep.subr.mxu1 %v6227_v17 }
  0x95   : > { %7487 = vmatmul.mubr.f32.gmra.mxu0 %v9488_v20  ;;  %7686 = vmatpush3.msra.mxu1 %v6227_v17  ;;  %v9633_v17 = vld [vmem:[#allocation2 + $0x188] sm:$0xff] }
  0x96   : > { %7489 = vmatprep.mubr.f32.mxu0 %v9491_v50  ;;  %7612 = vmatpush3.msra.mxu0 %v6208_v63  ;;  %v9622_v63 = vld [vmem:[#allocation2 + $0x180] sm:$0xff] }
  0x97   : > { %7564 = vmatmul.mubr.f32.gmra.mxu1 %v9260_v25  ;;  %v6226_v25 = vld [vmem:[%s12071_s1 + $0x2d8] sm:$0xff]  ;;  %7613 = vmatprep.subr.mxu0 %v6207_v4 }
  0x98   : > { %7566 = vmatprep.mubr.f32.mxu1 %v9262_v29  ;;  %v9502_v29 = vld [vmem:[#allocation2 + $0x9a] sm:$0xff]  ;;  %7687 = vmatprep.subr.mxu1 %v6226_v25 }
  0x99   : > { %7490 = vmatmul.mubr.f32.gmra.mxu0 %v9502_v29  ;;  %7688 = vmatpush3.msra.mxu1 %v6226_v25  ;;  %v6245_v25 = vld [vmem:[%s12071_s1 + $0x370] sm:$0xff] }
  0x9a   : > { %7492 = vmatprep.mubr.f32.mxu0 %v9505_v55  ;;  %7614 = vmatpush3.msra.mxu0 %v6207_v4  ;;  %v6246_v4 = vld [vmem:[%s12071_s1 + $0x378] sm:$0xff] }
  0x9b   : > { %7567 = vmatmul.mubr.f32.gmra.mxu1 %v9274_v28  ;;  %v6225_v28 = vld [vmem:[%s12071_s1 + $0x2d0] sm:$0xff]  ;;  %7615 = vmatprep.subr.mxu0 %v6206_v14 }
  0x9c   : > { %7569 = vmatprep.mubr.f32.mxu1 %v9276_v39  ;;  %v9516_v39 = vld [vmem:[#allocation2 + $0xb2] sm:$0xff]  ;;  %7689 = vmatprep.subr.mxu1 %v6225_v28 }
  0x9d   : > { %7493 = vmatmul.mubr.f32.gmra.mxu0 %v9516_v39  ;;  %7690 = vmatpush3.msra.mxu1 %v6225_v28  ;;  %v6257_v28 = vld [vmem:[%s12071_s1 + $0x3d0] sm:$0xff] }
  0x9e   : > { %7495 = vmatprep.mubr.f32.mxu0 %v9519_v58  ;;  %7616 = vmatpush3.msra.mxu0 %v6206_v14  ;;  %v6244_v14 = vld [vmem:[%s12071_s1 + $0x368] sm:$0xff] }
  0x9f   : > { %7570 = vmatmul.mubr.f32.gmra.mxu1 %v9288_v31  ;;  %v6224_v31 = vld [vmem:[%s12071_s1 + $0x2c8] sm:$0xff]  ;;  %7617 = vmatprep.subr.mxu0 %v6205_v23 }
  0xa0   : > { %7572 = vmatprep.mubr.f32.mxu1 %v9290_v42  ;;  %v9530_v42 = vld [vmem:[#allocation2 + $0xca] sm:$0xff]  ;;  %7691 = vmatprep.subr.mxu1 %v6224_v31 }
  0xa1   : > { %7496 = vmatmul.mubr.f32.gmra.mxu0 %v9530_v42  ;;  %7692 = vmatpush3.msra.mxu1 %v6224_v31  ;;  %v6256_v31 = vld [vmem:[%s12071_s1 + $0x3c8] sm:$0xff] }
  0xa2   : > { %7498 = vmatprep.mubr.f32.mxu0 %v9533_v62  ;;  %7618 = vmatpush3.msra.mxu0 %v6205_v23  ;;  %v6237_v23 = vld [vmem:[%s12071_s1 + $0x330] sm:$0xff] }
  0xa3   : > { %7573 = vmatmul.mubr.f32.gmra.mxu1 %v9305_v45  ;;  %v6223_v45 = vld [vmem:[%s12071_s1 + $0x2c0] sm:$0xff]  ;;  %7619 = vmatprep.subr.mxu0 %v6204_v26 }
  0xa4   : > { %7575 = vmatprep.mubr.f32.mxu1 %v9311_v47  ;;  %v9544_v47 = vld [vmem:[#allocation2 + $0xe2] sm:$0xff]  ;;  %7693 = vmatprep.subr.mxu1 %v6223_v45 }
  0xa5   : > { %7499 = vmatmul.mubr.f32.gmra.mxu0 %v9544_v47  ;;  %7694 = vmatpush3.msra.mxu1 %v6223_v45  ;;  %v6255_v45 = vld [vmem:[%s12071_s1 + $0x3c0] sm:$0xff] }
  0xa6   : > { %7501 = vmatprep.mubr.f32.mxu0 %v9547_v32  ;;  %7620 = vmatpush3.msra.mxu0 %v6204_v26  ;;  %v6236_v26 = vld [vmem:[%s12071_s1 + $0x328] sm:$0xff] }
  0xa7   : > { %7576 = vmatmul.mubr.f32.gmra.mxu1 %v9324_v48  ;;  %v6222_v48 = vld [vmem:[%s12071_s1 + $0x2b8] sm:$0xff]  ;;  %7621 = vmatprep.subr.mxu0 %v6203_v3 }
  0xa8   : > { %7578 = vmatprep.mubr.f32.mxu1 %v9326_v51  ;;  %v9558_v51 = vld [vmem:[#allocation2 + $0xfa] sm:$0xff]  ;;  %7695 = vmatprep.subr.mxu1 %v6222_v48 }
  0xa9   : > { %7502 = vmatmul.mubr.f32.gmra.mxu0 %v9558_v51  ;;  %7696 = vmatpush3.msra.mxu1 %v6222_v48  ;;  %v6254_v48 = vld [vmem:[%s12071_s1 + $0x3b8] sm:$0xff] }
  0xaa   : > { %7504 = vmatprep.mubr.f32.mxu0 %v9561_v35  ;;  %7622 = vmatpush3.msra.mxu0 %v6203_v3  ;;  %v6235_v3 = vld [vmem:[%s12071_s1 + $0x320] sm:$0xff] }
  0xab   : > { %7579 = vmatmul.mubr.f32.gmra.mxu1 %v9338_v41  ;;  %v6221_v41 = vld [vmem:[%s12071_s1 + $0x2b0] sm:$0xff]  ;;  %7623 = vmatprep.subr.mxu0 %v6202_v40 }
  0xac   : > { %7581 = vmatprep.mubr.f32.mxu1 %v9340_v54  ;;  %v9572_v54 = vld [vmem:[#allocation2 + $0x112] sm:$0xff]  ;;  %7697 = vmatprep.subr.mxu1 %v6221_v41 }
  0xad   : > { %7505 = vmatmul.mubr.f32.gmra.mxu0 %v9572_v54  ;;  %7698 = vmatpush3.msra.mxu1 %v6221_v41  ;;  %v6253_v41 = vld [vmem:[%s12071_s1 + $0x3b0] sm:$0xff] }
  0xae   : > { %7507 = vmatprep.mubr.f32.mxu0 %v9575_v7  ;;  %7624 = vmatpush3.msra.mxu0 %v6202_v40  ;;  %v6234_v40 = vld [vmem:[%s12071_s1 + $0x318] sm:$0xff] }
  0xaf   : > { %7582 = vmatmul.mubr.f32.gmra.mxu1 %v9352_v49  ;;  %v6220_v49 = vld [vmem:[%s12071_s1 + $0x2a8] sm:$0xff]  ;;  %7625 = vmatprep.subr.mxu0 %v6201_v33 }
  0xb0   : > { %7584 = vmatprep.mubr.f32.mxu1 %v9354_v59  ;;  %v9586_v59 = vld [vmem:[#allocation2 + $0x12a] sm:$0xff]  ;;  %7699 = vmatprep.subr.mxu1 %v6220_v49 }
  0xb1   : > { %7508 = vmatmul.mubr.f32.gmra.mxu0 %v9586_v59  ;;  %7700 = vmatpush3.msra.mxu1 %v6220_v49  ;;  %v6251_v49 = vld [vmem:[%s12071_s1 + $0x3a0] sm:$0xff] }
  0xb2   : > { %7510 = vmatprep.mubr.f32.mxu0 %v9589_v2  ;;  %7626 = vmatpush3.msra.mxu0 %v6201_v33  ;;  %v6252_v33 = vld [vmem:[%s12071_s1 + $0x3a8] sm:$0xff] }
  0xb3   : > { %7585 = vmatmul.mubr.f32.gmra.mxu1 %v9366_v53  ;;  %v6219_v53 = vld [vmem:[%s12071_s1 + $0x2a0] sm:$0xff]  ;;  %7627 = vmatprep.subr.mxu0 %v6200_v36 }
  0xb4   : > { %7587 = vmatprep.mubr.f32.mxu1 %v9368_v0  ;;  %v9600_v0 = vld [vmem:[#allocation2 + $0x142] sm:$0xff]  ;;  %7701 = vmatprep.subr.mxu1 %v6219_v53 }
  0xb5   : > { %7511 = vmatmul.mubr.f32.gmra.mxu0 %v9600_v0  ;;  %7702 = vmatpush3.msra.mxu1 %v6219_v53  ;;  %v6231_v53 = vld [vmem:[%s12071_s1 + $0x300] sm:$0xff] }
  0xb6   : > { %7513 = vmatprep.mubr.f32.mxu0 %v9603_v52  ;;  %7628 = vmatpush3.msra.mxu0 %v6200_v36  ;;  %v6250_v36 = vld [vmem:[%s12071_s1 + $0x398] sm:$0xff] }
  0xb7   : > { %7588 = vmatmul.mubr.f32.gmra.mxu1 %v9380_v10  ;;  %v6199_v10 = vld [vmem:[%s12071_s1 + $0x200] sm:$0xff]  ;;  %7703 = vmatprep.subr.mxu1 %v6218_v8 }
  0xb8   : > { %7590 = vmatprep.mubr.f32.mxu1 %v9382_v11  ;;  %v9614_v11 = vld [vmem:[#allocation2 + $0x15a] sm:$0xff]  ;;  %7629 = vmatprep.subr.mxu0 %v6199_v10 }
  0xb9   : > { %7514 = vmatmul.mubr.f32.gmra.mxu0 %v9614_v11  ;;  %7704 = vmatpush3.msra.mxu1 %v6218_v8  ;;  %v8748_v8 = vld [vmem:[#allocation2 + $0x171] sm:$0xff] }
  0xba   : > { %7516 = vmatprep.mubr.f32.mxu0 %v9617_v56  ;;  %7705 = vmatprep.subr.mxu1 %v6217_v12 }
  0xbb   : > { %7591 = vmatmul.mubr.f32.gmra.mxu1 %v9394_v60  ;;  %v9627_v60 = vld [vmem:[#allocation2 + $0x172] sm:$0xff]  ;;  %7630 = vmatpush3.msra.mxu0 %v6199_v10  ;;  %v9776_v10 = vld [vmem:[#allocation2 + $0x18a] sm:$0xff] }
  0xbc   : > { %7593 = vmatprep.mubr.f32.mxu1 %v9396_v15  ;;  %v6216_v15 = vld [vmem:[%s12071_s1 + $0x288] sm:$0xff]  ;;  %7706 = vmatpush3.msra.mxu1 %v6217_v12  ;;  %v2476_v12 = vld [vmem:[#allocation2 + $0x31] sm:$0xff] }
  0xbd   : > { %7517 = vmatmul.mubr.f32.gmra.mxu0 %v9627_v60  ;;  %7707 = vmatprep.subr.mxu1 %v6216_v15 }
  0xbe   : > { %7631 = vmatprep.mubr.f32.mxu0 %v9022_v16  ;;  %7708 = vmatpush3.msra.mxu1 %v6216_v15  ;;  %v6243_v16 = vld [vmem:[%s12071_s1 + $0x360] sm:$0xff] }
  0xbf   : > { %7594 = vmatmul.mubr.f32.gmra.mxu1 %v9408_v1  ;;  %v6215_v1 = vld [vmem:[%s12071_s1 + $0x280] sm:$0xff]  ;;  %7759 = vmatprep.subr.mxu0 %v6246_v4 }
  0xc0   : > { %7596 = vmatprep.mubr.f32.mxu1 %v9622_v63  ;;  %7709 = vmatprep.subr.mxu1 %v6215_v1  ;;  %v2477_v15 = vld [vmem:[#allocation2 + $0x39] sm:$0xff] }
  0xc1   : > { %7632 = vmatmul.mubr.f32.vlgmr.msra.gmra.mxu0 %v9029_v18  ;;  %7710 = vmatpush3.msra.mxu1 %v6215_v1  ;;  %v6262_v18 = vld [vmem:[%s12071_s1 + $0x3f8] sm:$0xff] }
  0xc2   : > { %7760 = vmatpush3.msra.mxu0 %v6246_v4  ;;  %7634 = vmatprep.mubr.f32.mxu0 %v9032_v19  ;;  %v6242_v19 = vld [vmem:[%s12071_s1 + $0x358] sm:$0xff]  ;;  %v2172_v4 = vld [vmem:[#allocation2 + $0x48] sm:$0xff] }
  0xc3   : > { %7597 = vmatmul.mubr.f32.gmra.mxu1 %v9633_v17  ;;  %7761 = vmatprep.subr.mxu0 %v6245_v25 }
  0xc4   : > { %7711 = vmatprep.mubr.f32.mxu1 %v9422_v30  ;;  %7762 = vmatpush3.msra.mxu0 %v6245_v25  ;;  %v8728_v30 = vld [vmem:[#allocation2 + $0x61] sm:$0xff] }
  0xc5   : > { %7635 = vmatmul.mubr.f32.gmra.mxu0 %v9040_v21  ;;  %7763 = vmatprep.subr.mxu0 %v6244_v14  ;;  %v6261_v21 = vld [vmem:[%s12071_s1 + $0x3f0] sm:$0xff] }
  0xc6   : > { %7637 = vmatprep.mubr.f32.mxu0 %v9043_v22  ;;  %7764 = vmatpush3.msra.mxu0 %v6244_v14  ;;  %v6241_v22 = vld [vmem:[%s12071_s1 + $0x350] sm:$0xff] }
  0xc7   : > { %7712 = vmatmul.mubr.f32.vlgmr.msra.gmra.mxu1 %v9428_v43  ;;  %7765 = vmatprep.subr.mxu0 %v6243_v16  ;;  %v8729_v43 = vld [vmem:[#allocation2 + $0x79] sm:$0xff]  ;;  %v2478_v14 = vld [vmem:[#allocation2 + $0x49] sm:$0xff] }
  0xc8   : > { %7714 = vmatprep.mubr.f32.mxu1 %v9434_v61  ;;  %7839 = vmatprep.subr.mxu1 %v6262_v18  ;;  %v8730_v61 = vld [vmem:[#allocation2 + $0x81] sm:$0xff] }
  0xc9   : > { %7638 = vmatmul.mubr.f32.gmra.mxu0 %v9051_v24  ;;  %7840 = vmatpush3.msra.mxu1 %v6262_v18  ;;  %v6260_v24 = vld [vmem:[%s12071_s1 + $0x3e8] sm:$0xff]  ;;  %v2173_v18 = vld [vmem:[#allocation2 + $0x50] sm:$0xff] }
  0xca   : > { %7640 = vmatprep.mubr.f32.mxu0 %v8728_v30  ;;  %7766 = vmatpush3.msra.mxu0 %v6243_v16 }
  0xcb   : > { %7715 = vmatmul.mubr.f32.gmra.mxu1 %v9446_v37  ;;  %7767 = vmatprep.subr.mxu0 %v6242_v19  ;;  %v6259_v37 = vld [vmem:[%s12071_s1 + $0x3e0] sm:$0xff] }
  0xcc   : > { %7717 = vmatprep.mubr.f32.mxu1 %v9449_v5  ;;  %7841 = vmatprep.subr.mxu1 %v6261_v21  ;;  %v8731_v5 = vld [vmem:[#allocation2 + $0x91] sm:$0xff] }
  0xcd   : > { %7641 = vmatmul.mubr.f32.gmra.mxu0 %v9062_v27  ;;  %7842 = vmatpush3.msra.mxu1 %v6261_v21  ;;  %v6240_v27 = vld [vmem:[%s12071_s1 + $0x348] sm:$0xff] }
  0xce   : > { %7643 = vmatprep.mubr.f32.mxu0 %v8729_v43  ;;  %7768 = vmatpush3.msra.mxu0 %v6242_v19  ;;  %v6276_v19 = vld [vmem:[%s12071_s1 + $0x468] sm:$0xff] }
  0xcf   : > { %7718 = vmatmul.mubr.f32.gmra.mxu1 %v9460_v9  ;;  %7769 = vmatprep.subr.mxu0 %v6241_v22  ;;  %v8732_v9 = vld [vmem:[#allocation2 + $0x99] sm:$0xff] }
  0xd0   : > { %7720 = vmatprep.mubr.f32.mxu1 %v9463_v38  ;;  %7843 = vmatprep.subr.mxu1 %v6260_v24  ;;  %v6239_v38 = vld [vmem:[%s12071_s1 + $0x340] sm:$0xff] }
  0xd1   : > { %7644 = vmatmul.mubr.f32.gmra.mxu0 %v8730_v61  ;;  %7844 = vmatpush3.msra.mxu1 %v6260_v24  ;;  %v2174_v24 = vld [vmem:[#allocation2 + $0x60] sm:$0xff] }
  0xd2   : > { %7646 = vmatprep.mubr.f32.mxu0 %v8731_v5  ;;  %7770 = vmatpush3.msra.mxu0 %v6241_v22  ;;  %v2479_v22 = vld [vmem:[#allocation2 + $0x51] sm:$0xff]  ;;  %v2480_v61 = vld [vmem:[#allocation2 + $0x61] sm:$0xff] }
  0xd3   : > { %7721 = vmatmul.mubr.f32.gmra.mxu1 %v9474_v13  ;;  %7771 = vmatprep.subr.mxu0 %v6240_v27  ;;  %v6258_v13 = vld [vmem:[%s12071_s1 + $0x3d8] sm:$0xff]  ;;  %v6275_v5 = vld [vmem:[%s12071_s1 + $0x460] sm:$0xff] }
  0xd4   : > { %7723 = vmatprep.mubr.f32.mxu1 %v9477_v44  ;;  %7845 = vmatprep.subr.mxu1 %v6259_v37  ;;  %v8733_v44 = vld [vmem:[#allocation2 + $0xa9] sm:$0xff] }
  0xd5   : > { %7647 = vmatmul.mubr.f32.gmra.mxu0 %v8732_v9  ;;  %7846 = vmatpush3.msra.mxu1 %v6259_v37 }
  0xd6   : > { %7649 = vmatprep.mubr.f32.mxu0 %v8733_v44  ;;  %7772 = vmatpush3.msra.mxu0 %v6240_v27 }
  0xd7   : > { %7724 = vmatmul.mubr.f32.gmra.mxu1 %v9488_v20  ;;  %7773 = vmatprep.subr.mxu0 %v6239_v38  ;;  %v8734_v20 = vld [vmem:[#allocation2 + $0xb1] sm:$0xff] }
  0xd8   : > { %7726 = vmatprep.mubr.f32.mxu1 %v9491_v50  ;;  %7847 = vmatprep.subr.mxu1 %v6258_v13  ;;  %v6238_v50 = vld [vmem:[%s12071_s1 + $0x338] sm:$0xff] }
  0xd9   : > { %7650 = vmatmul.mubr.f32.gmra.mxu0 %v8734_v20  ;;  %7848 = vmatpush3.msra.mxu1 %v6258_v13  ;;  %v2481_v20 = vld [vmem:[#allocation2 + $0x69] sm:$0xff] }
  0xda   : > { %7774 = vmatpush3.msra.mxu0 %v6239_v38  ;;  %7849 = vmatprep.subr.mxu1 %v6257_v28  ;;  %v2175_v38 = vld [vmem:[#allocation2 + $0x68] sm:$0xff] }
  0xdb   : > { %7727 = vmatmul.mubr.f32.gmra.mxu1 %v9502_v29  ;;  %v8735_v29 = vld [vmem:[#allocation2 + $0xc1] sm:$0xff]  ;;  %7775 = vmatprep.subr.mxu0 %v6238_v50 }
  0xdc   : > { %7729 = vmatprep.mubr.f32.mxu1 %v9505_v55  ;;  %7652 = vmatprep.mubr.f32.mxu0 %v8735_v29  ;;  %v8736_v55 = vld [vmem:[#allocation2 + $0xc9] sm:$0xff]  ;;  %v2482_v29 = vld [vmem:[#allocation2 + $0x79] sm:$0xff] }
  0xdd   : > { %7653 = vmatmul.mubr.f32.gmra.mxu0 %v8736_v55  ;;  %7850 = vmatpush3.msra.mxu1 %v6257_v28 }
  0xde   : > { %7776 = vmatpush3.msra.mxu0 %v6238_v50  ;;  %7851 = vmatprep.subr.mxu1 %v6256_v31  ;;  %v2176_v50 = vld [vmem:[#allocation2 + $0x78] sm:$0xff] }
  0xdf   : > { %7730 = vmatmul.mubr.f32.gmra.mxu1 %v9516_v39  ;;  %v8737_v39 = vld [vmem:[#allocation2 + $0xd9] sm:$0xff]  ;;  %7777 = vmatprep.subr.mxu0 %v6237_v23 }
  0xe0   : > { %7732 = vmatprep.mubr.f32.mxu1 %v9519_v58  ;;  %7655 = vmatprep.mubr.f32.mxu0 %v8737_v39  ;;  %v8738_v58 = vld [vmem:[#allocation2 + $0xe1] sm:$0xff] }
  0xe1   : > { %7656 = vmatmul.mubr.f32.gmra.mxu0 %v8738_v58  ;;  %7852 = vmatpush3.msra.mxu1 %v6256_v31  ;;  %v6274_v31 = vld [vmem:[%s12071_s1 + $0x458] sm:$0xff]  ;;  %v2177_v58 = vld [vmem:[#allocation2 + $0x80] sm:$0xff] }
  0xe2   : > { %7778 = vmatpush3.msra.mxu0 %v6237_v23  ;;  %7853 = vmatprep.subr.mxu1 %v6255_v45 }
  0xe3   : > { %7733 = vmatmul.mubr.f32.gmra.mxu1 %v9530_v42  ;;  %v8739_v42 = vld [vmem:[#allocation2 + $0xf1] sm:$0xff]  ;;  %7779 = vmatprep.subr.mxu0 %v6236_v26 }
  0xe4   : > { %7735 = vmatprep.mubr.f32.mxu1 %v9533_v62  ;;  %7658 = vmatprep.mubr.f32.mxu0 %v8739_v42  ;;  %v8740_v62 = vld [vmem:[#allocation2 + $0xf9] sm:$0xff]  ;;  %v2483_v42 = vld [vmem:[#allocation2 + $0x81] sm:$0xff] }
  0xe5   : > { %7659 = vmatmul.mubr.f32.gmra.mxu0 %v8740_v62  ;;  %7854 = vmatpush3.msra.mxu1 %v6255_v45  ;;  %v2178_v62 = vld [vmem:[#allocation2 + $0x90] sm:$0xff] }
  0xe6   : > { %7780 = vmatpush3.msra.mxu0 %v6236_v26  ;;  %7855 = vmatprep.subr.mxu1 %v6254_v48 }
  0xe7   : > { %7736 = vmatmul.mubr.f32.gmra.mxu1 %v9544_v47  ;;  %v8741_v47 = vld [vmem:[#allocation2 + $0x109] sm:$0xff]  ;;  %7781 = vmatprep.subr.mxu0 %v6235_v3 }
  0xe8   : > { %7738 = vmatprep.mubr.f32.mxu1 %v9547_v32  ;;  %7661 = vmatprep.mubr.f32.mxu0 %v8741_v47  ;;  %v8742_v32 = vld [vmem:[#allocation2 + $0x111] sm:$0xff] }
  0xe9   : > { %7662 = vmatmul.mubr.f32.gmra.mxu0 %v8742_v32  ;;  %7856 = vmatpush3.msra.mxu1 %v6254_v48  ;;  %v2484_v48 = vld [vmem:[#allocation2 + $0x91] sm:$0xff] }
  0xea   : > { %7664 = vmatprep.mubr.f32.mxu0 %v9161_v57  ;;  %7782 = vmatpush3.msra.mxu0 %v6235_v3  ;;  %v8745_v57 = vld [vmem:[#allocation2 + $0x141] sm:$0xff] }
  0xeb   : > { %7739 = vmatmul.mubr.f32.gmra.mxu1 %v9558_v51  ;;  %7783 = vmatprep.subr.mxu0 %v6234_v40  ;;  %v8743_v51 = vld [vmem:[#allocation2 + $0x129] sm:$0xff] }
  0xec   : > { %7741 = vmatprep.mubr.f32.mxu1 %v9561_v35  ;;  %7857 = vmatprep.subr.mxu1 %v6253_v41  ;;  %v6233_v35 = vld [vmem:[%s12071_s1 + $0x310] sm:$0xff] }
  0xed   : > { %7665 = vmatmul.mubr.f32.gmra.mxu0 %v8743_v51  ;;  %7858 = vmatpush3.msra.mxu1 %v6253_v41  ;;  %v7313_v1 = vpop.f32.mrf.mxu0  ;;  %v7393_v25 = vpop.f32.mrf.mxu1  ;;  %v2179_v51 = vld [vmem:[#allocation2 + $0x98] sm:$0xff] }
  0xee   : > { %7784 = vmatpush3.msra.mxu0 %v6234_v40  ;;  %7859 = vmatprep.subr.mxu1 %v6252_v33  ;;  %v9789_v16 = vadd.f32 %v7393_v25, %v7313_v1  ;;  %v6273_v40 = vld [vmem:[%s12071_s1 + $0x450] sm:$0xff]  ;;  %v2183_v1 = vld [vmem:[#allocation2 + $0xc8] sm:$0xff] }
  0xef   : > { %7742 = vmatmul.mubr.f32.gmra.mxu1 %v9572_v54  ;;  %v8744_v54 = vld [vmem:[#allocation2 + $0x139] sm:$0xff]  ;;  %7785 = vmatprep.subr.mxu0 %v6233_v35  ;;  %v561_v21 = vpop.f32.mrf.mxu0  ;;  %v786_v30 = vpop.f32.mrf.mxu1 }
  0xf0   : > { %7744 = vmatprep.mubr.f32.mxu1 %v9575_v7  ;;  %7667 = vmatprep.mubr.f32.mxu0 %v8744_v54  ;;  %v6232_v7 = vld [vmem:[%s12071_s1 + $0x308] sm:$0xff]  ;;  %v9794_v43 = vadd.f32 %v786_v30, %v561_v21  ;;  %v2485_v54 = vld [vmem:[#allocation2 + $0x99] sm:$0xff] }
  0xf1   : > { %7668 = vmatmul.mubr.f32.gmra.mxu0 %v8745_v57  ;;  %7860 = vmatpush3.msra.mxu1 %v6252_v33  ;;  %v7316_v27 = vpop.f32.mrf.mxu0  ;;  %v2180_v57 = vld [vmem:[#allocation2 + $0xa8] sm:$0xff]  ;;  %v2490_v30 = vld [vmem:[#allocation2 + $0xd9] sm:$0xff] }
  0xf2   : > { %7786 = vmatpush3.msra.mxu0 %v6233_v35  ;;  %7861 = vmatprep.subr.mxu1 %v6251_v49 }
  0xf3   : > { %7745 = vmatmul.mubr.f32.gmra.mxu1 %v9586_v59  ;;  %v8746_v59 = vld [vmem:[#allocation2 + $0x151] sm:$0xff]  ;;  %7787 = vmatprep.subr.mxu0 %v6232_v7  ;;  %v571_v13 = vpop.f32.mrf.mxu0 }
  0xf4   : > { %7747 = vmatprep.mubr.f32.mxu1 %v9589_v2  ;;  %7670 = vmatprep.mubr.f32.mxu0 %v8746_v59  ;;  %v8747_v2 = vld [vmem:[#allocation2 + $0x159] sm:$0xff] }
  0xf5   : > { %7671 = vmatmul.mubr.f32.gmra.mxu0 %v8747_v2  ;;  %7862 = vmatpush3.msra.mxu1 %v6251_v49  ;;  %v7319_v55 = vpop.f32.mrf.mxu0  ;;  %v2486_v49 = vld [vmem:[#allocation2 + $0xa9] sm:$0xff] }
  0xf6   : > { %7673 = vmatprep.mubr.f32.mxu0 %v9207_v6  ;;  %7788 = vmatpush3.msra.mxu0 %v6232_v7  ;;  %v6248_v6 = vld [vmem:[%s12071_s1 + $0x388] sm:$0xff] }
  0xf7   : > { %7748 = vmatmul.mubr.f32.gmra.mxu1 %v9600_v0  ;;  %7863 = vmatprep.subr.mxu1 %v6250_v36  ;;  %v6249_v0 = vld [vmem:[%s12071_s1 + $0x390] sm:$0xff]  ;;  %v581_v26 = vpop.f32.mrf.mxu0 }
  0xf8   : > { %7750 = vmatprep.mubr.f32.mxu1 %v9603_v52  ;;  %7789 = vmatprep.subr.mxu0 %v6231_v53  ;;  %v9768_v52 = vld [vmem:[#allocation2 + $0x182] sm:$0xff] }
  0xf9   : > { %7674 = vmatmul.mubr.f32.gmra.mxu0 %v8748_v8  ;;  %7864 = vmatpush3.msra.mxu1 %v6250_v36  ;;  %v7322_v47 = vpop.f32.mrf.mxu0  ;;  %v6272_v36 = vld [vmem:[%s12071_s1 + $0x448] sm:$0xff] }
  0xfa   : > { %7676 = vmatprep.mubr.f32.mxu0 %v9301_v34  ;;  %7865 = vmatprep.subr.mxu1 %v6249_v0  ;;  %v6247_v34 = vld [vmem:[%s12071_s1 + $0x380] sm:$0xff] }
  0xfb   : > { %7751 = vmatmul.mubr.f32.gmra.mxu1 %v9614_v11  ;;  %v2170_v11 = vld [vmem:[#allocation2 + $0x30] sm:$0xff]  ;;  %7790 = vmatpush3.msra.mxu0 %v6231_v53  ;;  %v591_v35 = vpop.f32.mrf.mxu0 }
  0xfc   : > { %7753 = vmatprep.mubr.f32.mxu1 %v9617_v56  ;;  %7866 = vmatpush3.msra.mxu1 %v6249_v0  ;;  %v6278_v56 = vld [vmem:[%s12071_s1 + $0x478] sm:$0xff]  ;;  %v2181_v0 = vld [vmem:[#allocation2 + $0xb0] sm:$0xff] }
  0xfd   : > { %7677 = vmatmul.mubr.f32.gmra.mxu0 %v9309_v46  ;;  %7867 = vmatprep.subr.mxu1 %v6248_v6  ;;  %v6277_v46 = vld [vmem:[%s12071_s1 + $0x470] sm:$0xff]  ;;  %v7325_v59 = vpop.f32.mrf.mxu0 }
  0xfe   : > { %7791 = vmatprep.mubr.f32.mxu0 %v2170_v11  ;;  %7868 = vmatpush3.msra.mxu1 %v6248_v6  ;;  %v2487_v11 = vld [vmem:[#allocation2 + $0xb1] sm:$0xff] }
  0xff   : > { %7754 = vmatmul.mubr.f32.gmra.mxu1 %v9627_v60  ;;  %v2171_v60 = vld [vmem:[#allocation2 + $0x38] sm:$0xff]  ;;  %7919 = vmatprep.subr.mxu0 %v6278_v56  ;;  %v601_v8 = vpop.f32.mrf.mxu0 }
 0x100   : > { %7756 = vmatprep.mubr.f32.mxu1 %v9768_v52  ;;  %7869 = vmatprep.subr.mxu1 %v6247_v34 }
 0x101   : > { %7792 = vmatmul.mubr.f32.vlgmr.msra.gmra.mxu0 %v2171_v60  ;;  %7870 = vmatpush3.msra.mxu1 %v6247_v34  ;;  %v7328_v60 = vpop.f32.mrf.mxu0 }
 0x102   : > { %7920 = vmatpush3.msra.mxu0 %v6278_v56  ;;  %7794 = vmatprep.mubr.f32.mxu0 %v2172_v4  ;;  %v2182_v56 = vld [vmem:[#allocation2 + $0xc0] sm:$0xff] }
 0x103   : > { %7757 = vmatmul.mubr.f32.gmra.mxu1 %v9776_v10  ;;  %7921 = vmatprep.subr.mxu0 %v6277_v46  ;;  %v6271_v4 = vld [vmem:[%s12071_s1 + $0x440] sm:$0xff]  ;;  %v611_v25 = vpop.f32.mrf.mxu0 }
 0x104   : > { %7871 = vmatprep.mubr.f32.mxu1 %v2476_v12  ;;  %7922 = vmatpush3.msra.mxu0 %v6277_v46  ;;  %v2488_v12 = vld [vmem:[#allocation2 + $0xc1] sm:$0xff] }
 0x105   : > { %7795 = vmatmul.mubr.f32.gmra.mxu0 %v2173_v18  ;;  %7923 = vmatprep.subr.mxu0 %v6276_v19  ;;  %v2489_v18 = vld [vmem:[#allocation2 + $0xc9] sm:$0xff] }
 0x106   : > { %7797 = vmatprep.mubr.f32.mxu0 %v2174_v24  ;;  %7924 = vmatpush3.msra.mxu0 %v6276_v19  ;;  %v2184_v19 = vld [vmem:[#allocation2 + $0xd8] sm:$0xff] }
 0x107   : > { %7872 = vmatmul.mubr.f32.vlgmr.msra.gmra.mxu1 %v2477_v15  ;;  %7925 = vmatprep.subr.mxu0 %v6275_v5 }
 0x108   : > { %7874 = vmatprep.mubr.f32.mxu1 %v2478_v14  ;;  %7926 = vmatpush3.msra.mxu0 %v6275_v5 }
 0x109   : > { %7798 = vmatmul.mubr.f32.gmra.mxu0 %v2175_v38  ;;  %7927 = vmatprep.subr.mxu0 %v6274_v31 }
 0x10a   : > { %7800 = vmatprep.mubr.f32.mxu0 %v2176_v50  ;;  %7928 = vmatpush3.msra.mxu0 %v6274_v31  ;;  %v2492_v50 = vld [vmem:[#allocation2 + $0xf1] sm:$0xff] }
 0x10b   : > { %v7396_v37 = vpop.f32.mrf.mxu1  ;;  %7875 = vmatmul.mubr.f32.gmra.mxu1 %v2479_v22  ;;  %7929 = vmatprep.subr.mxu0 %v6273_v40  ;;  %v7331_v22 = vpop.f32.mrf.mxu0 }
 0x10c   : > { %v9799_v9 = vadd.f32 %v7396_v37, %v7316_v27  ;;  %7877 = vmatprep.mubr.f32.mxu1 %v2480_v61  ;;  %7930 = vmatpush3.msra.mxu0 %v6273_v40  ;;  %v6270_v61 = vld [vmem:[%s12071_s1 + $0x438] sm:$0xff]  ;;  %v2185_v37 = vld [vmem:[#allocation2 + $0xe0] sm:$0xff] }
 0x10d   : > { %v796_v44 = vpop.f32.mrf.mxu1  ;;  %7801 = vmatmul.mubr.f32.gmra.mxu0 %v2177_v58  ;;  %7931 = vmatprep.subr.mxu0 %v6272_v36  ;;  %v621_v5 = vpop.f32.mrf.mxu0  ;;  %v2187_v58 = vld [vmem:[#allocation2 + $0xf8] sm:$0xff] }
 0x10e   : > { %v9801_v28 = vadd.f32 %v796_v44, %v571_v13  ;;  %7803 = vmatprep.mubr.f32.mxu0 %v2178_v62  ;;  %7932 = vmatpush3.msra.mxu0 %v6272_v36  ;;  %v2491_v13 = vld [vmem:[#allocation2 + $0xe1] sm:$0xff]  ;;  %v2186_v44 = vld [vmem:[#allocation2 + $0xf0] sm:$0xff] }
 0x10f   : > { %v7399_v23 = vpop.f32.mrf.mxu1  ;;  %7878 = vmatmul.mubr.f32.gmra.mxu1 %v2481_v20  ;;  %7933 = vmatprep.subr.mxu0 %v6271_v4  ;;  %v2188_v62 = vld [vmem:[#allocation2 + $0x108] sm:$0xff] }
 0x110   : > { %v9806_v39 = vadd.f32 %v7399_v23, %v7319_v55  ;;  %7880 = vmatprep.mubr.f32.mxu1 %v2482_v29  ;;  %7934 = vmatpush3.msra.mxu0 %v6271_v4  ;;  %v7334_v29 = vpop.f32.mrf.mxu0  ;;  %v6269_v23 = vld [vmem:[%s12071_s1 + $0x430] sm:$0xff]  ;;  %v2498_v4 = vld [vmem:[#allocation2 + $0x139] sm:$0xff] }
 0x111   : > { %v806_v45 = vpop.f32.mrf.mxu1  ;;  %7804 = vmatmul.mubr.f32.gmra.mxu0 %v2179_v51  ;;  %7935 = vmatprep.subr.mxu0 %v6270_v61  ;;  %v6268_v51 = vld [vmem:[%s12071_s1 + $0x428] sm:$0xff] }
 0x112   : > { %v9808_v3 = vadd.f32 %v806_v45, %v581_v26  ;;  %7806 = vmatprep.mubr.f32.mxu0 %v2180_v57  ;;  %v631_v26 = vpop.f32.mrf.mxu0  ;;  %7936 = vmatpush3.msra.mxu0 %v6270_v61  ;;  %v2194_v61 = vld [vmem:[#allocation2 + $0x150] sm:$0xff] }
 0x113   : > { %v7402_v32 = vpop.f32.mrf.mxu1  ;;  %7881 = vmatmul.mubr.f32.gmra.mxu1 %v2483_v42  ;;  %v2493_v42 = vld [vmem:[#allocation2 + $0xf9] sm:$0xff]  ;;  %7937 = vmatprep.subr.mxu0 %v6269_v23 }
 0x114   : > { %v9813_v41 = vadd.f32 %v7402_v32, %v7322_v47  ;;  %7883 = vmatprep.mubr.f32.mxu1 %v2484_v48  ;;  %v2494_v47 = vld [vmem:[#allocation2 + $0x109] sm:$0xff]  ;;  %v7337_v32 = vpop.f32.mrf.mxu0  ;;  %7938 = vmatpush3.msra.mxu0 %v6269_v23  ;;  %v2501_v23 = vld [vmem:[#allocation2 + $0x159] sm:$0xff] }
 0x115   : > { %v816_v33 = vpop.f32.mrf.mxu1  ;;  %7807 = vmatmul.mubr.f32.gmra.mxu0 %v2181_v0  ;;  %7939 = vmatprep.subr.mxu0 %v6268_v51 }
 0x116   : > { %v9815_v7 = vadd.f32 %v816_v33, %v591_v35  ;;  %7809 = vmatprep.mubr.f32.mxu0 %v2182_v56  ;;  %v2189_v33 = vld [vmem:[#allocation2 + $0x110] sm:$0xff]  ;;  %7940 = vmatpush3.msra.mxu0 %v6268_v51 }
 0x117   : > { %v7405_v2 = vpop.f32.mrf.mxu1  ;;  %7884 = vmatmul.mubr.f32.gmra.mxu1 %v2485_v54  ;;  %v9850_v54 = vpop.f32.mrf.mxu0 }
 0x118   : > { %v9820_v53 = vadd.f32 %v7405_v2, %v7325_v59  ;;  %7886 = vmatprep.mubr.f32.mxu1 %v2486_v49  ;;  %v2495_v49 = vld [vmem:[#allocation2 + $0x111] sm:$0xff]  ;;  %v2190_v59 = vld [vmem:[#allocation2 + $0x120] sm:$0xff] }
 0x119   : > { %v826_v6 = vpop.f32.mrf.mxu1  ;;  %7810 = vmatmul.mubr.f32.gmra.mxu0 %v2183_v1  ;;  %v2496_v2 = vld [vmem:[#allocation2 + $0x121] sm:$0xff]  ;;  %v7340_v36 = vpop.f32.mrf.mxu0 }
 0x11a   : > { %v9822_v34 = vadd.f32 %v826_v6, %v601_v8  ;;  %7812 = vmatprep.mubr.f32.mxu0 %v2184_v19  ;;  %v6267_v8 = vld [vmem:[%s12071_s1 + $0x420] sm:$0xff] }
 0x11b   : > { %v7408_v15 = vpop.f32.mrf.mxu1  ;;  %7887 = vmatmul.mubr.f32.gmra.mxu1 %v2487_v11  ;;  %v2191_v11 = vld [vmem:[#allocation2 + $0x128] sm:$0xff]  ;;  %v9859_v56 = vpop.f32.mrf.mxu0  ;;  %7941 = vmatprep.subr.mxu0 %v6267_v8  ;;  %v2193_v19 = vld [vmem:[#allocation2 + $0x140] sm:$0xff] }
 0x11c   : > { %v9827_v46 = vadd.f32 %v7408_v15, %v7328_v60  ;;  %7889 = vmatprep.mubr.f32.mxu1 %v2488_v12  ;;  %v2497_v60 = vld [vmem:[#allocation2 + $0x129] sm:$0xff]  ;;  %v2192_v15 = vld [vmem:[#allocation2 + $0x138] sm:$0xff]  ;;  %7942 = vmatpush3.msra.mxu0 %v6267_v8 }
 0x11d   : > { %v836_v14 = vpop.f32.mrf.mxu1  ;;  %7813 = vmatmul.mubr.f32.gmra.mxu0 %v2185_v37  ;;  %v7343_v1 = vpop.f32.mrf.mxu0  ;;  %v2500_v37 = vld [vmem:[#allocation2 + $0x151] sm:$0xff] }
 0x11e   : > { %v9829_v21 = vadd.f32 %v836_v14, %v611_v25  ;;  %7815 = vmatprep.mubr.f32.mxu0 %v2186_v44  ;;  %v6266_v14 = vld [vmem:[%s12071_s1 + $0x418] sm:$0xff] }
 0x11f   : > { %v7411_v24 = vpop.f32.mrf.mxu1  ;;  %7890 = vmatmul.mubr.f32.gmra.mxu1 %v2489_v18  ;;  %7943 = vmatprep.subr.mxu0 %v6266_v14 }
 0x120   : > { %v9834_v27 = vadd.f32 %v7411_v24, %v7331_v22  ;;  %7892 = vmatprep.mubr.f32.mxu1 %v2490_v30  ;;  %v9868_v30 = vpop.f32.mrf.mxu0  ;;  %v2499_v24 = vld [vmem:[#allocation2 + $0x141] sm:$0xff]  ;;  %7944 = vmatpush3.msra.mxu0 %v6266_v14 }
 0x121   : > { %v846_v38 = vpop.f32.mrf.mxu1  ;;  %7816 = vmatmul.mubr.f32.gmra.mxu0 %v2187_v58  ;;  %v2196_v58 = vld [vmem:[#allocation2 + $0x168] sm:$0xff]  ;;  %v9903_v14 = vld [vmem:[#allocation2] sm:$0xff] }
 0x122   : > { %v9836_v20 = vadd.f32 %v846_v38, %v621_v5  ;;  %7818 = vmatprep.mubr.f32.mxu0 %v2188_v62  ;;  %v7346_v5 = vpop.f32.mrf.mxu0  ;;  %v6264_v62 = vld [vmem:[%s12071_s1 + $0x408] sm:$0xff] }
 0x123   : > { %v7414_v55 = vpop.f32.mrf.mxu1  ;;  %7893 = vmatmul.mubr.f32.gmra.mxu1 %v2491_v13  ;;  %v6265_v13 = vld [vmem:[%s12071_s1 + $0x410] sm:$0xff] }
 0x124   : > { %v9841_v31 = vadd.f32 %v7414_v55, %v7334_v29  ;;  %7895 = vmatprep.mubr.f32.mxu1 %v2492_v50  ;;  %v2195_v50 = vld [vmem:[#allocation2 + $0x158] sm:$0xff]  ;;  %v9877_v29 = vpop.f32.mrf.mxu0  ;;  %7945 = vmatprep.subr.mxu0 %v6265_v13 }
 0x125   : > { %v856_v45 = vpop.f32.mrf.mxu1  ;;  %7819 = vmatmul.mubr.f32.gmra.mxu0 %v2189_v33  ;;  %v2503_v33 = vld [vmem:[#allocation2 + $0x171] sm:$0xff] }
 0x126   : > { %v9843_v48 = vadd.f32 %v856_v45, %v631_v26  ;;  %7821 = vmatprep.mubr.f32.mxu0 %v2190_v59  ;;  %v2502_v26 = vld [vmem:[#allocation2 + $0x169] sm:$0xff]  ;;  %v7349_v45 = vpop.f32.mrf.mxu0  ;;  %7946 = vmatpush3.msra.mxu0 %v6265_v13 }
 0x127   : > { %v7417_v40 = vpop.f32.mrf.mxu1  ;;  %7896 = vmatmul.mubr.f32.gmra.mxu1 %v2493_v42  ;;  %7947 = vmatprep.subr.mxu0 %v6264_v62 }
 0x128   : > { %v9848_v35 = vadd.f32 %v7417_v40, %v7337_v32  ;;  %7898 = vmatprep.mubr.f32.mxu1 %v2494_v47  ;;  %v2197_v32 = vld [vmem:[#allocation2 + $0x170] sm:$0xff]  ;;  %v9886_v40 = vpop.f32.mrf.mxu0  ;;  %7948 = vmatpush3.msra.mxu0 %v6264_v62 }
 0x129   : > { %v9852_v57 = vpop.f32.mrf.mxu1  ;;  %7822 = vmatmul.mubr.f32.gmra.mxu0 %v2191_v11  ;;  %v8749_v11 = vld [vmem:[#allocation2 + $0x181] sm:$0xff] }
 0x12a   : > { %7824 = vmatprep.mubr.f32.mxu0 %v2192_v15 }
 0x12b   : > { %v7420_v0 = vpop.f32.mrf.mxu1  ;;  %7899 = vmatmul.mubr.f32.gmra.mxu1 %v2495_v49  ;;  %v7352_v49 = vpop.f32.mrf.mxu0 }
 0x12c   : > { %v9857_v6 = vadd.f32 %v7420_v0, %v7340_v36  ;;  %7901 = vmatprep.mubr.f32.mxu1 %v2496_v2  ;;  %v6263_v2 = vld [vmem:[%s12071_s1 + $0x400] sm:$0xff] }
 0x12d   : > { %v9861_v12 = vpop.f32.mrf.mxu1  ;;  %7825 = vmatmul.mubr.f32.gmra.mxu0 %v2193_v19  ;;  %v9896_v0 = vpop.f32.mrf.mxu0  ;;  %7949 = vmatprep.subr.mxu0 %v6263_v2 }
 0x12e   : > { %7827 = vmatprep.mubr.f32.mxu0 %v2194_v61  ;;  %7950 = vmatpush3.msra.mxu0 %v6263_v2  ;;  %v2782_v61 = vld [vmem:[#allocation2 + $0x32] sm:$0xff] }
 0x12f   : > { %v7423_v25 = vpop.f32.mrf.mxu1  ;;  %7902 = vmatmul.mubr.f32.gmra.mxu1 %v2497_v60  ;;  %v2506_v60 = vld [vmem:[#allocation2 + $0x199] sm:$0xff]  ;;  %v7355_v15 = vpop.f32.mrf.mxu0 }
 0x130   : > { %v9866_v18 = vadd.f32 %v7423_v25, %v7343_v1  ;;  %7904 = vmatprep.mubr.f32.mxu1 %v2498_v4  ;;  %v8750_v25 = vld [vmem:[#allocation2 + $0x189] sm:$0xff] }
 0x131   : > { %v9870_v22 = vpop.f32.mrf.mxu1  ;;  %7828 = vmatmul.mubr.f32.gmra.mxu0 %v2195_v50  ;;  %v2784_v50 = vld [vmem:[#allocation2 + $0x4a] sm:$0xff] }
 0x132   : > { %7830 = vmatprep.mubr.f32.mxu0 %v2196_v58 }
 0x133   : > { %v7426_v38 = vpop.f32.mrf.mxu1  ;;  %7905 = vmatmul.mubr.f32.gmra.mxu1 %v2499_v24  ;;  %v2507_v24 = vld [vmem:[#allocation2 + $0x1a1] sm:$0xff] }
 0x134   : > { %v9875_v44 = vadd.f32 %v7426_v38, %v7346_v5  ;;  %7907 = vmatprep.mubr.f32.mxu1 %v2500_v37  ;;  %v2783_v38 = vld [vmem:[#allocation2 + $0x3a] sm:$0xff] }
 0x135   : > { %v9879_v55 = vpop.f32.mrf.mxu1  ;;  %7831 = vmatmul.mubr.f32.gmra.mxu0 %v2197_v32  ;;  %v2786_v32 = vld [vmem:[#allocation2 + $0x62] sm:$0xff] }
 0x136   : > { %7833 = vmatprep.mubr.f32.mxu0 %v9622_v63  ;;  %v9906_v63 = vpop.f32.mrf.mxu0 }
 0x137   : > { %v7429_v42 = vpop.f32.mrf.mxu1  ;;  %7908 = vmatmul.mubr.f32.gmra.mxu1 %v2501_v23 }
 0x138   : > { %v9884_v47 = vadd.f32 %v7429_v42, %v7349_v45  ;;  %7910 = vmatprep.mubr.f32.mxu1 %v2502_v26  ;;  %v7358_v37 = vpop.f32.mrf.mxu0  ;;  %v2785_v42 = vld [vmem:[#allocation2 + $0x52] sm:$0xff] }
 0x139   : > { %v9888_v51 = vpop.f32.mrf.mxu1  ;;  %7834 = vmatmul.mubr.f32.gmra.mxu0 %v9633_v17 }
 0x13a   : > { %7836 = vmatprep.mubr.f32.mxu0 %v9903_v14  ;;  %v9913_v13 = vpop.f32.mrf.mxu0 }
 0x13b   : > { %v7432_v59 = vpop.f32.mrf.mxu1  ;;  %7911 = vmatmul.mubr.f32.gmra.mxu1 %v2503_v33 }
 0x13c   : > { %v9893_v36 = vadd.f32 %v7432_v59, %v7352_v49  ;;  %7913 = vmatprep.mubr.f32.mxu1 %v8749_v11  ;;  %v7473_v58 = vpop.f32.mrf.mxu0 }
 0x13d   : > { %v9898_v8 = vpop.f32.mrf.mxu1  ;;  %7837 = vmatmul.mubr.f32.gmra.mxu0 %v9903_v14  ;;  %v1220_v26 = vadd.f32 %v7473_v58, %v9789_v16 }
 0x13e   : > { %7951 = vmatprep.mubr.f32.mxu0 %v2782_v61  ;;  %v1060_v62 = vpop.f32.mrf.mxu0 }
 0x13f   : > { %v7435_v4 = vpop.f32.mrf.mxu1  ;;  %7914 = vmatmul.mubr.f32.gmra.mxu1 %v8750_v25  ;;  %v9919_v33 = vadd.f32 %v1060_v62, %v9794_v43 }
 0x140   : > { %v9901_v1 = vadd.f32 %v7435_v4, %v7355_v15  ;;  %7916 = vmatprep.mubr.f32.mxu1 %v2506_v60  ;;  %v7476_v2 = vpop.f32.mrf.mxu0  ;;  %v2787_v15 = vld [vmem:[#allocation2 + $0x6a] sm:$0xff]  ;;  %v2788_v4 = vld [vmem:[#allocation2 + $0x7a] sm:$0xff] }
 0x141   : > { %v9908_v19 = vpop.f32.mrf.mxu1  ;;  %7952 = vmatmul.mubr.f32.vlgmr.msra.gmra.mxu0 %v2783_v38  ;;  %v1222_v11 = vadd.f32 %v7476_v2, %v9799_v9  ;;  %v2789_v38 = vld [vmem:[#allocation2 + $0x82] sm:$0xff]  ;;  %v2792_v2 = vld [vmem:[#allocation2 + $0xaa] sm:$0xff] }
 0x142   : > { %7954 = vmatprep.mubr.f32.mxu0 %v2784_v50  ;;  %v1070_v16 = vpop.f32.mrf.mxu0  ;;  %v2790_v50 = vld [vmem:[#allocation2 + $0x92] sm:$0xff] }
 0x143   : > { %v7438_v5 = vpop.f32.mrf.mxu1  ;;  %7917 = vmatmul.mubr.f32.gmra.mxu1 %v2507_v24  ;;  %v9927_v25 = vadd.f32 %v1070_v16, %v9801_v28 }
 0x144   : > { %v9911_v17 = vadd.f32 %v7438_v5, %v7358_v37 }
 0x145   : > { %v9915_v23 = vpop.f32.mrf.mxu1  ;;  %7955 = vmatmul.mubr.f32.gmra.mxu0 %v2785_v42 }
 0x146   : > { %7957 = vmatprep.mubr.f32.mxu0 %v2786_v32  ;;  %v7479_v61 = vpop.f32.mrf.mxu0  ;;  %v2791_v32 = vld [vmem:[#allocation2 + $0x9a] sm:$0xff] }
 0x147   : > { %v7553_v45 = vpop.f32.mrf.mxu1  ;;  %v1224_v37 = vadd.f32 %v7479_v61, %v9806_v39  ;;  %v2793_v61 = vld [vmem:[#allocation2 + $0xb2] sm:$0xff] }
 0x148   : > { %v9921_v49 = vadd.f32 %v7553_v45, %v1220_v26  ;;  %v1080_v9 = vpop.f32.mrf.mxu0 }
 0x149   : > { %v9923_v59 = vpop.f32.mrf.mxu1  ;;  %7958 = vmatmul.mubr.f32.gmra.mxu0 %v2787_v15  ;;  %v9935_v58 = vadd.f32 %v1080_v9, %v9808_v3 }
 0x14a   : > { %7960 = vmatprep.mubr.f32.mxu0 %v2788_v4 }
 0x14b   : > { %v7556_v60 = vpop.f32.mrf.mxu1 }
 0x14c   : > { %v9929_v24 = vadd.f32 %v7556_v60, %v1222_v11 }
 0x14d   : > { %v9931_v43 = vpop.f32.mrf.mxu1  ;;  %v7482_v45 = vpop.f32.mrf.mxu0  ;;  %7961 = vmatmul.mubr.f32.gmra.mxu0 %v2789_v38 }
 0x14e   : > { %v1226_v42 = vadd.f32 %v7482_v45, %v9813_v41  ;;  %7963 = vmatprep.mubr.f32.mxu0 %v2790_v50  ;;  %v6296_v41 = vld [vmem:[%s12072_s2 + $0xf8] sm:$0xff] }
 0x14f   : > { %v7559_v5 = vpop.f32.mrf.mxu1  ;;  %v1090_v39 = vpop.f32.mrf.mxu0  ;;  %7999 = vmatprep.subr.mxu1 %v6296_v41 }
 0x150   : > { %v9937_v26 = vadd.f32 %v7559_v5, %v1224_v37  ;;  %v9943_v11 = vadd.f32 %v1090_v39, %v9815_v7  ;;  %v2794_v5 = vld [vmem:[#allocation2 + $0xc2] sm:$0xff]  ;;  %8000 = vmatpush3.msra.mxu1 %v6296_v41  ;;  %v2796_v39 = vld [vmem:[#allocation2 + $0xda] sm:$0xff] }
 0x151   : > { %v9939_v28 = vpop.f32.mrf.mxu1  ;;  %v7485_v15 = vpop.f32.mrf.mxu0  ;;  %7964 = vmatmul.mubr.f32.gmra.mxu0 %v2791_v32  ;;  %v6294_v41 = vld [vmem:[%s12072_s2 + $0xe8] sm:$0xff] }
 0x152   : > { %v1228_v16 = vadd.f32 %v7485_v15, %v9820_v53  ;;  %7966 = vmatprep.mubr.f32.mxu0 %v2792_v2 }
 0x153   : > { %v7562_v62 = vpop.f32.mrf.mxu1  ;;  %v1100_v37 = vpop.f32.mrf.mxu0 }
 0x154   : > { %v9945_v60 = vadd.f32 %v7562_v62, %v1226_v42  ;;  %v9954_v7 = vadd.f32 %v1100_v37, %v9822_v34  ;;  %v2795_v42 = vld [vmem:[#allocation2 + $0xca] sm:$0xff] }
 0x155   : > { %v9947_v3 = vpop.f32.mrf.mxu1  ;;  %v7488_v50 = vpop.f32.mrf.mxu0  ;;  %7967 = vmatmul.mubr.f32.gmra.mxu0 %v2793_v61  ;;  %v6295_v62 = vld [vmem:[%s12072_s2 + $0xf0] sm:$0xff]  ;;  %v2797_v61 = vld [vmem:[#allocation2 + $0xe2] sm:$0xff] }
 0x156   : > { %v1230_v53 = vadd.f32 %v7488_v50, %v9827_v46  ;;  %7969 = vmatprep.mubr.f32.mxu0 %v2794_v5  ;;  %8001 = vmatprep.subr.mxu1 %v6295_v62  ;;  %v2798_v5 = vld [vmem:[#allocation2 + $0xf2] sm:$0xff] }
 0x157   : > { %v7565_v4 = vpop.f32.mrf.mxu1  ;;  %v1110_v32 = vpop.f32.mrf.mxu0  ;;  %8002 = vmatpush3.msra.mxu1 %v6295_v62  ;;  %v2799_v62 = vld [vmem:[#allocation2 + $0xfa] sm:$0xff] }
 0x158   : > { %v9956_v38 = vadd.f32 %v7565_v4, %v1228_v16  ;;  %v9965_v34 = vadd.f32 %v1110_v32, %v9829_v21  ;;  %8003 = vmatprep.subr.mxu1 %v6294_v41  ;;  %v6293_v32 = vld [vmem:[%s12072_s2 + $0xe0] sm:$0xff] }
 0x159   : > { %v9958_v9 = vpop.f32.mrf.mxu1  ;;  %v7491_v16 = vpop.f32.mrf.mxu0  ;;  %7970 = vmatmul.mubr.f32.gmra.mxu0 %v2795_v42  ;;  %8004 = vmatpush3.msra.mxu1 %v6294_v41 }
 0x15a   : > { %v1232_v46 = vadd.f32 %v7491_v16, %v9834_v27  ;;  %7972 = vmatprep.mubr.f32.mxu0 %v2796_v39  ;;  %v2800_v16 = vld [vmem:[#allocation2 + $0x10a] sm:$0xff]  ;;  %8005 = vmatprep.subr.mxu1 %v6293_v32 }
 0x15b   : > { %v7568_v45 = vpop.f32.mrf.mxu1  ;;  %v1120_v37 = vpop.f32.mrf.mxu0  ;;  %8006 = vmatpush3.msra.mxu1 %v6293_v32 }
 0x15c   : > { %v9967_v2 = vadd.f32 %v7568_v45, %v1230_v53  ;;  %v9976_v21 = vadd.f32 %v1120_v37, %v9836_v20 }
 0x15d   : > { %v9969_v15 = vpop.f32.mrf.mxu1  ;;  %v7494_v45 = vpop.f32.mrf.mxu0  ;;  %7973 = vmatmul.mubr.f32.gmra.mxu0 %v2797_v61 }
 0x15e   : > { %v1234_v27 = vadd.f32 %v7494_v45, %v9841_v31  ;;  %7975 = vmatprep.mubr.f32.mxu0 %v2798_v5  ;;  %v867_v31 = vadd.f32 %v9852_v57, %v9850_v54  ;;  %v2801_v5 = vld [vmem:[#allocation2 + $0x112] sm:$0xff] }
 0x15f   : > { %v7571_v4 = vpop.f32.mrf.mxu1  ;;  %v1130_v39 = vpop.f32.mrf.mxu0 }
 0x160   : > { %v9978_v50 = vadd.f32 %v7571_v4, %v1232_v46  ;;  %v9987_v20 = vadd.f32 %v1130_v39, %v9843_v48  ;;  %v6292_v48 = vld [vmem:[%s12072_s2 + $0xd8] sm:$0xff]  ;;  %v2803_v39 = vld [vmem:[#allocation2 + $0x12a] sm:$0xff] }
 0x161   : > { %v9980_v53 = vpop.f32.mrf.mxu1  ;;  %v7497_v61 = vpop.f32.mrf.mxu0  ;;  %7976 = vmatmul.mubr.f32.gmra.mxu0 %v2799_v62  ;;  %8007 = vmatprep.subr.mxu1 %v6292_v48 }
 0x162   : > { %v1236_v41 = vadd.f32 %v7497_v61, %v9848_v35  ;;  %7978 = vmatprep.mubr.f32.mxu0 %v2800_v16  ;;  %8008 = vmatpush3.msra.mxu1 %v6292_v48  ;;  %v6291_v16 = vld [vmem:[%s12072_s2 + $0xd0] sm:$0xff]  ;;  %v3274_v61 = vld [vmem:[%s12072_s2 + $0x78] sm:$0xff] }
 0x163   : > { %v7574_v42 = vpop.f32.mrf.mxu1  ;;  %v1140_v45 = vpop.f32.mrf.mxu0  ;;  %8009 = vmatprep.subr.mxu1 %v6291_v16  ;;  %8079 = vmatprep.subr.mxu0 %v3274_v61 }
 0x164   : > { %v9989_v46 = vadd.f32 %v7574_v42, %v1234_v27  ;;  %v2802_v27 = vld [vmem:[#allocation2 + $0x122] sm:$0xff]  ;;  %v9999_v42 = vadd.f32 %v1140_v45, %v867_v31  ;;  %8010 = vmatpush3.msra.mxu1 %v6291_v16  ;;  %8080 = vmatpush3.msra.mxu0 %v3274_v61  ;;  %v2806_v61 = vld [vmem:[#allocation2 + $0x152] sm:$0xff] }
 0x165   : > { %v9991_v4 = vpop.f32.mrf.mxu1  ;;  %v7500_v54 = vpop.f32.mrf.mxu0  ;;  %7979 = vmatmul.mubr.f32.gmra.mxu0 %v2801_v5 }
 0x166   : > { %12079 = vst [vmem:[#allocation4_spill] sm:$0xff] %v9999_v42  ;;  %v1238_v35 = vadd.f32 %v7500_v54, %v9857_v6  ;;  %7981 = vmatprep.mubr.f32.mxu0 %v2802_v27  ;;  %v3273_v6 = vld [vmem:[%s12072_s2 + $0x70] sm:$0xff]  ;;  %v2805_v54 = vld [vmem:[#allocation2 + $0x142] sm:$0xff] }
 0x167   : > { %v7577_v37 = vpop.f32.mrf.mxu1  ;;  %v10012_v31 = vpop.f32.mrf.mxu0  ;;  %8081 = vmatprep.subr.mxu0 %v3273_v6  ;;  %v2809_v42 = vld [vmem:[#allocation2 + $0x172] sm:$0xff] }
 0x168   : > { %v10001_v32 = vadd.f32 %v7577_v37, %v1236_v41  ;;  %v2804_v41 = vld [vmem:[#allocation2 + $0x13a] sm:$0xff]  ;;  %8082 = vmatpush3.msra.mxu0 %v3273_v6 }
 0x169   : > { %v10003_v62 = vpop.f32.mrf.mxu1  ;;  %v7503_v48 = vpop.f32.mrf.mxu0  ;;  %7982 = vmatmul.mubr.f32.gmra.mxu0 %v2803_v39 }
 0x16a   : > { %12080 = vst [vmem:[#allocation5_spill] sm:$0xff] %v10003_v62  ;;  %v1240_v45 = vadd.f32 %v7503_v48, %v9866_v18  ;;  %7984 = vmatprep.mubr.f32.mxu0 %v2804_v41  ;;  %v3271_v41 = vld [vmem:[%s12072_s2 + $0x60] sm:$0xff] }
 0x16b   : > { %v7580_v57 = vpop.f32.mrf.mxu1  ;;  %v10028_v16 = vpop.f32.mrf.mxu0  ;;  %v2807_v62 = vld [vmem:[#allocation2 + $0x15a] sm:$0xff] }
 0x16c   : > { %v10014_v37 = vadd.f32 %v7580_v57, %v1238_v35  ;;  %v6290_v35 = vld [vmem:[%s12072_s2 + $0xc8] sm:$0xff] }
 0x16d   : > { %v10016_v5 = vpop.f32.mrf.mxu1  ;;  %v3272_v57 = vld [vmem:[%s12072_s2 + $0x68] sm:$0xff]  ;;  %8011 = vmatprep.subr.mxu1 %v6290_v35  ;;  %v7506_v6 = vpop.f32.mrf.mxu0  ;;  %7985 = vmatmul.mubr.f32.gmra.mxu0 %v2805_v54 }
 0x16e   : > { %12081 = vst [vmem:[#allocation6_spill] sm:$0xff] %v10016_v5  ;;  %8083 = vmatprep.subr.mxu0 %v3272_v57  ;;  %8012 = vmatpush3.msra.mxu1 %v6290_v35  ;;  %v1242_v48 = vadd.f32 %v7506_v6, %v9875_v44 }
 0x16f   : > { %v7583_v27 = vpop.f32.mrf.mxu1  ;;  %8084 = vmatpush3.msra.mxu0 %v3272_v57  ;;  %7987 = vmatprep.mubr.f32.mxu0 %v2806_v61  ;;  %v10044_v35 = vpop.f32.mrf.mxu0  ;;  %v2808_v57 = vld [vmem:[#allocation2 + $0x16a] sm:$0xff] }
 0x170   : > { %v10030_v39 = vadd.f32 %v7583_v27, %v1240_v45  ;;  %8085 = vmatprep.subr.mxu0 %v3271_v41  ;;  %v6289_v45 = vld [vmem:[%s12072_s2 + $0xc0] sm:$0xff]  ;;  %v3270_v27 = vld [vmem:[%s12072_s2 + $0x58] sm:$0xff]  ;;  %12083 = vst [vmem:[#allocation8_spill] sm:$0xff] %v10044_v35  ;;  %v3269_v61 = vld [vmem:[%s12072_s2 + $0x50] sm:$0xff] }
 0x171   : > { %v10032_v18 = vpop.f32.mrf.mxu1  ;;  %8086 = vmatpush3.msra.mxu0 %v3271_v41  ;;  %8013 = vmatprep.subr.mxu1 %v6289_v45  ;;  %v7509_v41 = vpop.f32.mrf.mxu0 }
 0x172   : > { %12082 = vst [vmem:[#allocation7_spill] sm:$0xff] %v10032_v18  ;;  %8087 = vmatprep.subr.mxu0 %v3270_v27  ;;  %8014 = vmatpush3.msra.mxu1 %v6289_v45  ;;  %v1244_v6 = vadd.f32 %v7509_v41, %v9884_v47  ;;  %v3267_v47 = vld [vmem:[%s12072_s2 + $0x40] sm:$0xff] }
 0x173   : > { %v7586_v5 = vpop.f32.mrf.mxu1  ;;  %8088 = vmatpush3.msra.mxu0 %v3270_v27  ;;  %v10060_v45 = vpop.f32.mrf.mxu0 }
 0x174   : > { %v10046_v54 = vadd.f32 %v7586_v5, %v1242_v48  ;;  %7988 = vmatmul.mubr.f32.gmra.mxu0 %v2807_v62  ;;  %8089 = vmatprep.subr.mxu0 %v3269_v61  ;;  %v6288_v5 = vld [vmem:[%s12072_s2 + $0xb8] sm:$0xff]  ;;  %v3268_v48 = vld [vmem:[%s12072_s2 + $0x48] sm:$0xff]  ;;  %12085 = vst [vmem:[#allocation10_spill] sm:$0xff] %v10060_v45 }
 0x175   : > { %v10048_v44 = vpop.f32.mrf.mxu1  ;;  %7990 = vmatprep.mubr.f32.mxu0 %v2808_v57  ;;  %8090 = vmatpush3.msra.mxu0 %v3269_v61  ;;  %v7512_v57 = vpop.f32.mrf.mxu0 }
 0x176   : > { %12084 = vst [vmem:[#allocation9_spill] sm:$0xff] %v10048_v44  ;;  %8015 = vmatprep.subr.mxu1 %v6288_v5  ;;  %8091 = vmatprep.subr.mxu0 %v3268_v48  ;;  %v1246_v61 = vadd.f32 %v7512_v57, %v9893_v36  ;;  %v2813_v44 = vld [vmem:[#allocation2 + $0x1a2] sm:$0xff] }
 0x177   : > { %v7589_v18 = vpop.f32.mrf.mxu1  ;;  %8016 = vmatpush3.msra.mxu1 %v6288_v5  ;;  %8092 = vmatpush3.msra.mxu0 %v3268_v48  ;;  %v10077_v5 = vpop.f32.mrf.mxu0  ;;  %v2812_v48 = vld [vmem:[#allocation2 + $0x19a] sm:$0xff] }
 0x178   : > { %v10062_v62 = vadd.f32 %v7589_v18, %v1244_v6  ;;  %7991 = vmatmul.mubr.f32.gmra.mxu0 %v2809_v42  ;;  %8093 = vmatprep.subr.mxu0 %v3267_v47  ;;  %v6287_v18 = vld [vmem:[%s12072_s2 + $0xb0] sm:$0xff]  ;;  %v3266_v6 = vld [vmem:[%s12072_s2 + $0x38] sm:$0xff]  ;;  %12087 = vst [vmem:[#allocation12_spill] sm:$0xff] %v10077_v5 }
 0x179   : > { %v10064_v27 = vpop.f32.mrf.mxu1  ;;  %7993 = vmatprep.mubr.f32.mxu0 %v9768_v52  ;;  %8094 = vmatpush3.msra.mxu0 %v3267_v47  ;;  %v3265_v52 = vld [vmem:[%s12072_s2 + $0x30] sm:$0xff]  ;;  %v7515_v47 = vpop.f32.mrf.mxu0 }
 0x17a   : > { %12086 = vst [vmem:[#allocation11_spill] sm:$0xff] %v10064_v27  ;;  %8017 = vmatprep.subr.mxu1 %v6287_v18  ;;  %8095 = vmatprep.subr.mxu0 %v3266_v6  ;;  %v1248_v57 = vadd.f32 %v7515_v47, %v9901_v1  ;;  %v6285_v1 = vld [vmem:[%s12072_s2 + $0xa0] sm:$0xff] }
 0x17b   : > { %v7592_v41 = vpop.f32.mrf.mxu1  ;;  %8018 = vmatpush3.msra.mxu1 %v6287_v18  ;;  %8096 = vmatpush3.msra.mxu0 %v3266_v6  ;;  %v10094_v18 = vpop.f32.mrf.mxu0 }
 0x17c   : > { %v10079_v42 = vadd.f32 %v7592_v41, %v1246_v61  ;;  %7994 = vmatmul.mubr.f32.gmra.mxu0 %v9776_v10  ;;  %8097 = vmatprep.subr.mxu0 %v3265_v52  ;;  %v6286_v61 = vld [vmem:[%s12072_s2 + $0xa8] sm:$0xff]  ;;  %12089 = vst [vmem:[#allocation14_spill] sm:$0xff] %v10094_v18 }
 0x17d   : > { %v10081_v36 = vpop.f32.mrf.mxu1  ;;  %7996 = vmatprep.mubr.f32.mxu0 %v2812_v48  ;;  %8098 = vmatpush3.msra.mxu0 %v3265_v52  ;;  %v3264_v41 = vld [vmem:[%s12072_s2 + $0x28] sm:$0xff]  ;;  %v3263_v48 = vld [vmem:[%s12072_s2 + $0x20] sm:$0xff]  ;;  %v7518_v52 = vpop.f32.mrf.mxu0 }
 0x17e   : > { %12088 = vst [vmem:[#allocation13_spill] sm:$0xff] %v10081_v36  ;;  %8019 = vmatprep.subr.mxu1 %v6286_v61  ;;  %8099 = vmatprep.subr.mxu0 %v3264_v41  ;;  %v1250_v47 = vadd.f32 %v7518_v52, %v9911_v17  ;;  %v6283_v17 = vld [vmem:[%s12072_s2 + $0x90] sm:$0xff] }
 0x17f   : > { %v7595_v27 = vpop.f32.mrf.mxu1  ;;  %8020 = vmatpush3.msra.mxu1 %v6286_v61  ;;  %8100 = vmatpush3.msra.mxu0 %v3264_v41  ;;  %v10113_v61 = vpop.f32.mrf.mxu0 }
 0x180   : > { %v10096_v10 = vadd.f32 %v7595_v27, %v1248_v57  ;;  %7997 = vmatmul.mubr.f32.gmra.mxu0 %v2813_v44  ;;  %8021 = vmatprep.subr.mxu1 %v6285_v1  ;;  %v6284_v27 = vld [vmem:[%s12072_s2 + $0x98] sm:$0xff]  ;;  %12091 = vst [vmem:[#allocation16_spill] sm:$0xff] %v10113_v61 }
 0x181   : > { %v10098_v6 = vpop.f32.mrf.mxu1  ;;  %8022 = vmatpush3.msra.mxu1 %v6285_v1  ;;  %8101 = vmatprep.subr.mxu0 %v3263_v48  ;;  %v3262_v57 = vld [vmem:[%s12072_s2 + $0x18] sm:$0xff]  ;;  %v3261_v1 = vld [vmem:[%s12072_s2 + $0x10] sm:$0xff]  ;;  %v7633_v52 = vpop.f32.mrf.mxu0 }
 0x182   : > { %12090 = vst [vmem:[#allocation15_spill] sm:$0xff] %v10098_v6  ;;  %8023 = vmatprep.subr.mxu1 %v6284_v27  ;;  %8102 = vmatpush3.msra.mxu0 %v3263_v48  ;;  %v10126_v61 = vadd.f32 %v7633_v52, %v9921_v49  ;;  %v6282_v48 = vld [vmem:[%s12072_s2 + $0x88] sm:$0xff]  ;;  %v6281_v49 = vld [vmem:[%s12072_s2 + $0x80] sm:$0xff] }
 0x183   : > { %v7598_v18 = vpop.f32.mrf.mxu1  ;;  %8024 = vmatpush3.msra.mxu1 %v6284_v27  ;;  %8103 = vmatprep.subr.mxu0 %v3262_v57  ;;  %v10136_v27 = vpop.f32.mrf.mxu0 }
 0x184   : > { %v10115_v41 = vadd.f32 %v7598_v18, %v1250_v47  ;;  %8025 = vmatprep.subr.mxu1 %v6283_v17  ;;  %8104 = vmatpush3.msra.mxu0 %v3262_v57  ;;  %v3260_v47 = vld [vmem:[%s12072_s2 + $0x8] sm:$0xff] }
 0x185   : > { %v10117_v44 = vpop.f32.mrf.mxu1  ;;  %8026 = vmatpush3.msra.mxu1 %v6283_v17  ;;  %8105 = vmatprep.subr.mxu0 %v3261_v1  ;;  %v3259_v17 = vld [vmem:[%s12072_s2] sm:$0xff]  ;;  %v7636_v52 = vpop.f32.mrf.mxu0 }
 0x186   : > { %12092 = vst [vmem:[#allocation17_spill] sm:$0xff] %v10117_v44  ;;  %8027 = vmatprep.subr.mxu1 %v6282_v48  ;;  %8106 = vmatpush3.msra.mxu0 %v3261_v1  ;;  %v3275_v44 = vld [vmem:[#allocation3 + $0x1] sm:$0xff]  ;;  %v10147_v6 = vadd.f32 %v7636_v52, %v9929_v24 }
 0x187   : > { %v10128_v18 = vpop.f32.mrf.mxu1  ;;  %8028 = vmatpush3.msra.mxu1 %v6282_v48  ;;  %8107 = vmatprep.subr.mxu0 %v3260_v47  ;;  %v3276_v48 = vld [vmem:[#allocation3 + $0x9] sm:$0xff]  ;;  %v10151_v36 = vpop.f32.mrf.mxu0 }
 0x188   : > { %8029 = vmatprep.subr.mxu1 %v6281_v49  ;;  %8108 = vmatpush3.msra.mxu0 %v3260_v47 }
 0x189   : > { %v10138_v57 = vpop.f32.mrf.mxu1  ;;  %8030 = vmatpush3.msra.mxu1 %v6281_v49  ;;  %8109 = vmatprep.subr.mxu0 %v3259_v17  ;;  %v7639_v45 = vpop.f32.mrf.mxu0 }
 0x18a   : > { %8031 = vmatprep.mubr.f32.mxu1 %v3275_v44  ;;  %8110 = vmatpush3.msra.mxu0 %v3259_v17  ;;  %v10158_v24 = vadd.f32 %v7639_v45, %v9937_v26 }
 0x18b   : > { %v10149_v1 = vpop.f32.mrf.mxu1  ;;  %8111 = vmatprep.mubr.f32.mxu0 %v9903_v14  ;;  %8032 = vmatmul.mubr.f32.vlgmr.msra.gmra.mxu1 %v3276_v48  ;;  %v10162_v49 = vpop.f32.mrf.mxu0 }
 0x18c   : > { %8112 = vmatmul.mubr.f32.vlgmr.msra.gmra.mxu0 %v9903_v14  ;;  %12094 = vst [vmem:[#allocation19_spill] sm:$0xff] %v10158_v24 }
 0x18d   : > { %v10153_v5 = vpop.f32.mrf.mxu1  ;;  %v7642_v35 = vpop.f32.mrf.mxu0 }
 0x18e   : > { %12093 = vst [vmem:[#allocation18_spill] sm:$0xff] %v10153_v5  ;;  %v10167_v44 = vadd.f32 %v7642_v35, %v9945_v60 }
 0x18f   : > { %v10160_v47 = vpop.f32.mrf.mxu1  ;;  %v10171_v5 = vpop.f32.mrf.mxu0 }
 0x190   : > { %12095 = vst [vmem:[#allocation20_spill] sm:$0xff] %v10160_v47  ;;  %12097 = vst [vmem:[#allocation22_spill] sm:$0xff] %v10167_v44 }
 0x191   : > { %v10164_v52 = vpop.f32.mrf.mxu1  ;;  %v7645_v14 = vpop.f32.mrf.mxu0 }
 0x192   : > { %12096 = vst [vmem:[#allocation21_spill] sm:$0xff] %v10164_v52  ;;  %v10176_v26 = vadd.f32 %v7645_v14, %v9956_v38 }
 0x193   : > { %v10169_v17 = vpop.f32.mrf.mxu1  ;;  %v10180_v47 = vpop.f32.mrf.mxu0 }
 0x194   : > { %12098 = vst [vmem:[#allocation23_spill] sm:$0xff] %v10169_v17  ;;  %12100 = vst [vmem:[#allocation25_spill] sm:$0xff] %v10176_v26 }
 0x195   : > { %v10173_v48 = vpop.f32.mrf.mxu1  ;;  %v7648_v52 = vpop.f32.mrf.mxu0 }
 0x196   : > { %12099 = vst [vmem:[#allocation24_spill] sm:$0xff] %v10173_v48  ;;  %v10185_v60 = vadd.f32 %v7648_v52, %v9967_v2 }
 0x197   : > { %v10178_v45 = vpop.f32.mrf.mxu1  ;;  %v10189_v17 = vpop.f32.mrf.mxu0 }
 0x198   : > { %12101 = vst [vmem:[#allocation26_spill] sm:$0xff] %v10178_v45  ;;  %12103 = vst [vmem:[#allocation28_spill] sm:$0xff] %v10185_v60 }
 0x199   : > { %v10182_v24 = vpop.f32.mrf.mxu1  ;;  %12105 = vst [vmem:[#allocation30_spill] sm:$0xff] %v10189_v17  ;;  %v7651_v48 = vpop.f32.mrf.mxu0 }
 0x19a   : > { %12102 = vst [vmem:[#allocation27_spill] sm:$0xff] %v10182_v24  ;;  %v10194_v38 = vadd.f32 %v7651_v48, %v9978_v50  ;;  %v6312_v24 = vld [vmem:[%s12072_s2 + $0x178] sm:$0xff]  ;;  %v6311_v50 = vld [vmem:[%s12072_s2 + $0x170] sm:$0xff] }
 0x19b   : > { %v10187_v35 = vpop.f32.mrf.mxu1  ;;  %v10201_v45 = vpop.f32.mrf.mxu0  ;;  %8159 = vmatprep.subr.mxu1 %v6312_v24 }
 0x19c   : > { %12104 = vst [vmem:[#allocation29_spill] sm:$0xff] %v10187_v35  ;;  %12107 = vst [vmem:[#allocation32_spill] sm:$0xff] %v10194_v38  ;;  %8160 = vmatpush3.msra.mxu1 %v6312_v24 }
 0x19d   : > { %v10191_v44 = vpop.f32.mrf.mxu1  ;;  %12109 = vst [vmem:[#allocation34_spill] sm:$0xff] %v10201_v45  ;;  %v7654_v52 = vpop.f32.mrf.mxu0  ;;  %8161 = vmatprep.subr.mxu1 %v6311_v50 }
 0x19e   : > { %12106 = vst [vmem:[#allocation31_spill] sm:$0xff] %v10191_v44  ;;  %v10206_v35 = vadd.f32 %v7654_v52, %v9989_v46  ;;  %8162 = vmatpush3.msra.mxu1 %v6311_v50  ;;  %v6310_v46 = vld [vmem:[%s12072_s2 + $0x168] sm:$0xff] }
 0x19f   : > { %v10196_v14 = vpop.f32.mrf.mxu1  ;;  %v10213_v48 = vpop.f32.mrf.mxu0  ;;  %8163 = vmatprep.subr.mxu1 %v6310_v46 }
 0x1a0   : > { %12108 = vst [vmem:[#allocation33_spill] sm:$0xff] %v10196_v14  ;;  %12111 = vst [vmem:[#allocation36_spill] sm:$0xff] %v10206_v35  ;;  %8164 = vmatpush3.msra.mxu1 %v6310_v46 }
 0x1a1   : > { %v10203_v2 = vpop.f32.mrf.mxu1  ;;  %12113 = vst [vmem:[#allocation38_spill] sm:$0xff] %v10213_v48  ;;  %v7657_v38 = vpop.f32.mrf.mxu0 }
 0x1a2   : > { %12110 = vst [vmem:[#allocation35_spill] sm:$0xff] %v10203_v2  ;;  %v10218_v2 = vadd.f32 %v7657_v38, %v10001_v32  ;;  %v6309_v32 = vld [vmem:[%s12072_s2 + $0x160] sm:$0xff] }
 0x1a3   : > { %v10208_v44 = vpop.f32.mrf.mxu1  ;;  %v10225_v52 = vpop.f32.mrf.mxu0  ;;  %8165 = vmatprep.subr.mxu1 %v6309_v32 }
 0x1a4   : > { %12112 = vst [vmem:[#allocation37_spill] sm:$0xff] %v10208_v44  ;;  %12115 = vst [vmem:[#allocation40_spill] sm:$0xff] %v10218_v2  ;;  %8166 = vmatpush3.msra.mxu1 %v6309_v32 }
 0x1a5   : > { %v10215_v14 = vpop.f32.mrf.mxu1  ;;  %12117 = vst [vmem:[#allocation42_spill] sm:$0xff] %v10225_v52  ;;  %v7660_v35 = vpop.f32.mrf.mxu0 }
 0x1a6   : > { %12114 = vst [vmem:[#allocation39_spill] sm:$0xff] %v10215_v14  ;;  %v10230_v14 = vadd.f32 %v7660_v35, %v10014_v37  ;;  %v6308_v37 = vld [vmem:[%s12072_s2 + $0x158] sm:$0xff] }
 0x1a7   : > { %v10220_v24 = vpop.f32.mrf.mxu1  ;;  %v10237_v38 = vpop.f32.mrf.mxu0  ;;  %8167 = vmatprep.subr.mxu1 %v6308_v37 }
 0x1a8   : > { %12116 = vst [vmem:[#allocation41_spill] sm:$0xff] %v10220_v24  ;;  %12119 = vst [vmem:[#allocation44_spill] sm:$0xff] %v10230_v14  ;;  %8168 = vmatpush3.msra.mxu1 %v6308_v37  ;;  %v6328_v37 = vld [vmem:[%s12072_s2 + $0x1f8] sm:$0xff] }
 0x1a9   : > { %v10227_v44 = vpop.f32.mrf.mxu1  ;;  %12121 = vst [vmem:[#allocation46_spill] sm:$0xff] %v10237_v38  ;;  %v7663_v2 = vpop.f32.mrf.mxu0  ;;  %8239 = vmatprep.subr.mxu0 %v6328_v37  ;;  %v6313_v38 = vld [vmem:[%s12072_s2 + $0x180] sm:$0xff] }
 0x1aa   : > { %12118 = vst [vmem:[#allocation43_spill] sm:$0xff] %v10227_v44  ;;  %v10242_v44 = vadd.f32 %v7663_v2, %v10030_v39  ;;  %v6307_v39 = vld [vmem:[%s12072_s2 + $0x150] sm:$0xff]  ;;  %8240 = vmatpush3.msra.mxu0 %v6328_v37 }
 0x1ab   : > { %v10232_v50 = vpop.f32.mrf.mxu1  ;;  %v10249_v35 = vpop.f32.mrf.mxu0  ;;  %8169 = vmatprep.subr.mxu1 %v6307_v39 }
 0x1ac   : > { %12120 = vst [vmem:[#allocation45_spill] sm:$0xff] %v10232_v50  ;;  %12123 = vst [vmem:[#allocation48_spill] sm:$0xff] %v10242_v44  ;;  %8170 = vmatpush3.msra.mxu1 %v6307_v39  ;;  %v6327_v39 = vld [vmem:[%s12072_s2 + $0x1f0] sm:$0xff] }
 0x1ad   : > { %v10239_v24 = vpop.f32.mrf.mxu1  ;;  %12125 = vst [vmem:[#allocation50_spill] sm:$0xff] %v10249_v35  ;;  %v7666_v14 = vpop.f32.mrf.mxu0  ;;  %8241 = vmatprep.subr.mxu0 %v6327_v39 }
 0x1ae   : > { %12122 = vst [vmem:[#allocation47_spill] sm:$0xff] %v10239_v24  ;;  %v10254_v24 = vadd.f32 %v7666_v14, %v10046_v54  ;;  %8242 = vmatpush3.msra.mxu0 %v6327_v39 }
 0x1af   : > { %v10244_v46 = vpop.f32.mrf.mxu1  ;;  %v10261_v2 = vpop.f32.mrf.mxu0 }
 0x1b0   : > { %12124 = vst [vmem:[#allocation49_spill] sm:$0xff] %v10244_v46  ;;  %12127 = vst [vmem:[#allocation52_spill] sm:$0xff] %v10254_v24 }
 0x1b1   : > { %v10251_v50 = vpop.f32.mrf.mxu1  ;;  %12129 = vst [vmem:[#allocation54_spill] sm:$0xff] %v10261_v2 }
 0x1b2   : > { %12126 = vst [vmem:[#allocation51_spill] sm:$0xff] %v10251_v50  ;;  %v7669_v50 = vpop.f32.mrf.mxu0 }
 0x1b3   : > { %v10256_v32 = vpop.f32.mrf.mxu1  ;;  %v10269_v54 = vadd.f32 %v7669_v50, %v10062_v62  ;;  %v6326_v62 = vld [vmem:[%s12072_s2 + $0x1e8] sm:$0xff] }
 0x1b4   : > { %12128 = vst [vmem:[#allocation53_spill] sm:$0xff] %v10256_v32  ;;  %v6306_v32 = vld [vmem:[%s12072_s2 + $0x148] sm:$0xff]  ;;  %8243 = vmatprep.subr.mxu0 %v6326_v62 }
 0x1b5   : > { %v10263_v46 = vpop.f32.mrf.mxu1  ;;  %12131 = vst [vmem:[#allocation56_spill] sm:$0xff] %v10269_v54  ;;  %8171 = vmatprep.subr.mxu1 %v6306_v32  ;;  %v6305_v54 = vld [vmem:[%s12072_s2 + $0x140] sm:$0xff]  ;;  %8244 = vmatpush3.msra.mxu0 %v6326_v62  ;;  %v6324_v62 = vld [vmem:[%s12072_s2 + $0x1d8] sm:$0xff] }
 0x1b6   : > { %12130 = vst [vmem:[#allocation55_spill] sm:$0xff] %v10263_v46  ;;  %v10279_v46 = vpop.f32.mrf.mxu0  ;;  %8172 = vmatpush3.msra.mxu1 %v6306_v32  ;;  %v6325_v32 = vld [vmem:[%s12072_s2 + $0x1e0] sm:$0xff] }
 0x1b7   : > { %v10271_v14 = vpop.f32.mrf.mxu1  ;;  %12133 = vst [vmem:[#allocation58_spill] sm:$0xff] %v10279_v46  ;;  %8173 = vmatprep.subr.mxu1 %v6305_v54  ;;  %8245 = vmatprep.subr.mxu0 %v6325_v32  ;;  %v6316_v46 = vld [vmem:[%s12072_s2 + $0x198] sm:$0xff] }
 0x1b8   : > { %12132 = vst [vmem:[#allocation57_spill] sm:$0xff] %v10271_v14  ;;  %v7672_v50 = vpop.f32.mrf.mxu0  ;;  %8174 = vmatpush3.msra.mxu1 %v6305_v54  ;;  %8246 = vmatpush3.msra.mxu0 %v6325_v32  ;;  %v6303_v54 = vld [vmem:[%s12072_s2 + $0x130] sm:$0xff] }
 0x1b9   : > { %v10281_v24 = vpop.f32.mrf.mxu1  ;;  %v10287_v37 = vadd.f32 %v7672_v50, %v10079_v42  ;;  %v6304_v42 = vld [vmem:[%s12072_s2 + $0x138] sm:$0xff]  ;;  %8247 = vmatprep.subr.mxu0 %v6324_v62  ;;  %v6323_v32 = vld [vmem:[%s12072_s2 + $0x1d0] sm:$0xff] }
 0x1ba   : > { %12134 = vst [vmem:[#allocation59_spill] sm:$0xff] %v10281_v24  ;;  %v10297_v39 = vpop.f32.mrf.mxu0  ;;  %8175 = vmatprep.subr.mxu1 %v6304_v42  ;;  %8248 = vmatpush3.msra.mxu0 %v6324_v62 }
 0x1bb   : > { %12135 = vst [vmem:[#allocation60_spill] sm:$0xff] %v10287_v37  ;;  %v10289_v14 = vpop.f32.mrf.mxu1  ;;  %12137 = vst [vmem:[#allocation62_spill] sm:$0xff] %v10297_v39  ;;  %8176 = vmatpush3.msra.mxu1 %v6304_v42  ;;  %8249 = vmatprep.subr.mxu0 %v6323_v32  ;;  %v6322_v42 = vld [vmem:[%s12072_s2 + $0x1c8] sm:$0xff] }
 0x1bc   : > { %12136 = vst [vmem:[#allocation61_spill] sm:$0xff] %v10289_v14  ;;  %v7675_v50 = vpop.f32.mrf.mxu0  ;;  %8177 = vmatprep.subr.mxu1 %v6303_v54  ;;  %8250 = vmatpush3.msra.mxu0 %v6323_v32  ;;  %v6321_v32 = vld [vmem:[%s12072_s2 + $0x1c0] sm:$0xff] }
 0x1bd   : > { %v10299_v24 = vpop.f32.mrf.mxu1  ;;  %v10308_v14 = vadd.f32 %v7675_v50, %v10096_v10  ;;  %8178 = vmatpush3.msra.mxu1 %v6303_v54  ;;  %v6302_v10 = vld [vmem:[%s12072_s2 + $0x128] sm:$0xff]  ;;  %8251 = vmatprep.subr.mxu0 %v6322_v42  ;;  %v6301_v54 = vld [vmem:[%s12072_s2 + $0x120] sm:$0xff] }
 0x1be   : > { %12138 = vst [vmem:[#allocation63_spill] sm:$0xff] %v10299_v24  ;;  %v10318_v24 = vpop.f32.mrf.mxu0  ;;  %8179 = vmatprep.subr.mxu1 %v6302_v10  ;;  %8252 = vmatpush3.msra.mxu0 %v6322_v42 }
 0x1bf   : > { %12139 = vst [vmem:[#allocation64_spill] sm:$0xff] %v10308_v14  ;;  %v10310_v37 = vpop.f32.mrf.mxu1  ;;  %12141 = vst [vmem:[#allocation66_spill] sm:$0xff] %v10318_v24  ;;  %8180 = vmatpush3.msra.mxu1 %v6302_v10  ;;  %8253 = vmatprep.subr.mxu0 %v6321_v32  ;;  %v6320_v10 = vld [vmem:[%s12072_s2 + $0x1b8] sm:$0xff] }
 0x1c0   : > { %12140 = vst [vmem:[#allocation65_spill] sm:$0xff] %v10310_v37  ;;  %v7678_v62 = vpop.f32.mrf.mxu0  ;;  %8181 = vmatprep.subr.mxu1 %v6301_v54  ;;  %8254 = vmatpush3.msra.mxu0 %v6321_v32  ;;  %v6299_v32 = vld [vmem:[%s12072_s2 + $0x110] sm:$0xff] }
 0x1c1   : > { %v10320_v39 = vpop.f32.mrf.mxu1  ;;  %v10329_v50 = vadd.f32 %v7678_v62, %v10115_v41  ;;  %8182 = vmatpush3.msra.mxu1 %v6301_v54  ;;  %v6300_v41 = vld [vmem:[%s12072_s2 + $0x118] sm:$0xff]  ;;  %8255 = vmatprep.subr.mxu0 %v6320_v10  ;;  %v6319_v54 = vld [vmem:[%s12072_s2 + $0x1b0] sm:$0xff] }
 0x1c2   : > { %12142 = vst [vmem:[#allocation67_spill] sm:$0xff] %v10320_v39  ;;  %v10339_v39 = vpop.f32.mrf.mxu0  ;;  %8183 = vmatprep.subr.mxu1 %v6300_v41  ;;  %8256 = vmatpush3.msra.mxu0 %v6320_v10  ;;  %v6298_v10 = vld [vmem:[%s12072_s2 + $0x108] sm:$0xff] }
 0x1c3   : > { %12143 = vst [vmem:[#allocation68_spill] sm:$0xff] %v10329_v50  ;;  %v10331_v37 = vpop.f32.mrf.mxu1  ;;  %12145 = vst [vmem:[#allocation70_spill] sm:$0xff] %v10339_v39  ;;  %8184 = vmatpush3.msra.mxu1 %v6300_v41  ;;  %8257 = vmatprep.subr.mxu0 %v6319_v54  ;;  %v6318_v41 = vld [vmem:[%s12072_s2 + $0x1a8] sm:$0xff] }
 0x1c4   : > { %12144 = vst [vmem:[#allocation69_spill] sm:$0xff] %v10331_v37  ;;  %v10349_v42 = vpop.f32.mrf.mxu0  ;;  %8185 = vmatprep.subr.mxu1 %v6299_v32  ;;  %8258 = vmatpush3.msra.mxu0 %v6319_v54  ;;  %v6317_v54 = vld [vmem:[%s12072_s2 + $0x1a0] sm:$0xff] }
 0x1c5   : > { %v10341_v14 = vpop.f32.mrf.mxu1  ;;  %8186 = vmatpush3.msra.mxu1 %v6299_v32  ;;  %8259 = vmatprep.subr.mxu0 %v6318_v41  ;;  %v6297_v32 = vld [vmem:[%s12072_s2 + $0x100] sm:$0xff] }
 0x1c6   : > { %12146 = vst [vmem:[#allocation71_spill] sm:$0xff] %v10341_v14  ;;  %v10359_v14 = vpop.f32.mrf.mxu0  ;;  %8187 = vmatprep.subr.mxu1 %v6298_v10  ;;  %8260 = vmatpush3.msra.mxu0 %v6318_v41 }
 0x1c7   : > { %v10351_v62 = vpop.f32.mrf.mxu1  ;;  %8188 = vmatpush3.msra.mxu1 %v6298_v10  ;;  %8261 = vmatprep.subr.mxu0 %v6317_v54  ;;  %v6315_v10 = vld [vmem:[%s12072_s2 + $0x190] sm:$0xff] }
 0x1c8   : > { %v10369_v50 = vpop.f32.mrf.mxu0  ;;  %8189 = vmatprep.subr.mxu1 %v6297_v32  ;;  %8262 = vmatpush3.msra.mxu0 %v6317_v54  ;;  %v6314_v54 = vld [vmem:[%s12072_s2 + $0x188] sm:$0xff] }
 0x1c9   : > { %v10361_v37 = vpop.f32.mrf.mxu1  ;;  %8190 = vmatpush3.msra.mxu1 %v6297_v32  ;;  %8263 = vmatprep.subr.mxu0 %v6316_v46 }
 0x1ca   : > { %v10379_v24 = vpop.f32.mrf.mxu0  ;;  %8264 = vmatpush3.msra.mxu0 %v6316_v46 }
 0x1cb   : > { %v10371_v39 = vpop.f32.mrf.mxu1  ;;  %8265 = vmatprep.subr.mxu0 %v6315_v10 }
 0x1cc   : > { %v10384_v41 = vpop.f32.mrf.mxu0  ;;  %8266 = vmatpush3.msra.mxu0 %v6315_v10  ;;  %v10410_v10 = vld [vmem:[%s12072_s2 + $0x278] sm:$0xff] }
 0x1cd   : > { %v10389_v2 = vpop.f32.mrf.mxu1  ;;  %8267 = vmatprep.subr.mxu0 %v6314_v54  ;;  %12150 = vst [vmem:[#allocation75_spill] sm:$0xff] %v10410_v10  ;;  %8319 = vmatprep.subr.mxu1 %v10410_v10 }
 0x1ce   : > { %v10391_v44 = vpop.f32.mrf.mxu0  ;;  %8268 = vmatpush3.msra.mxu0 %v6314_v54 }
 0x1cf   : > { %v10398_v32 = vpop.f32.mrf.mxu1  ;;  %8269 = vmatprep.subr.mxu0 %v6313_v38 }
 0x1d0   : > { %v10396_v35 = vpop.f32.mrf.mxu0  ;;  %8270 = vmatpush3.msra.mxu0 %v6313_v38 }
 0x1d1   : > { %12147 = vst [vmem:[#allocation72_spill] sm:$0xff] %v10396_v35  ;;  %v10412_v48 = vpop.f32.mrf.mxu1 }
 0x1d2   : > { %v10403_v52 = vpop.f32.mrf.mxu0  ;;  %12151 = vst [vmem:[#allocation76_spill] sm:$0xff] %v10412_v48 }
 0x1d3   : > { %12148 = vst [vmem:[#allocation73_spill] sm:$0xff] %v10403_v52  ;;  %v10419_v60 = vpop.f32.mrf.mxu1 }
 0x1d4   : > { %v10405_v46 = vpop.f32.mrf.mxu0  ;;  %12154 = vst [vmem:[#allocation79_spill] sm:$0xff] %v10419_v60 }
 0x1d5   : > { %12149 = vst [vmem:[#allocation74_spill] sm:$0xff] %v10405_v46  ;;  %v10425_v46 = vpop.f32.mrf.mxu1 }
 0x1d6   : > { %v10415_v54 = vpop.f32.mrf.mxu0  ;;  %12157 = vst [vmem:[#allocation82_spill] sm:$0xff] %v10425_v46 }
 0x1d7   : > { %12152 = vst [vmem:[#allocation77_spill] sm:$0xff] %v10415_v54  ;;  %v10431_v35 = vpop.f32.mrf.mxu1 }
 0x1d8   : > { %v10417_v45 = vpop.f32.mrf.mxu0  ;;  %12160 = vst [vmem:[#allocation85_spill] sm:$0xff] %v10431_v35 }
 0x1d9   : > { %12153 = vst [vmem:[#allocation78_spill] sm:$0xff] %v10417_v45  ;;  %v10437_v54 = vpop.f32.mrf.mxu1 }
 0x1da   : > { %v10421_v17 = vpop.f32.mrf.mxu0 }
 0x1db   : > { %12155 = vst [vmem:[#allocation80_spill] sm:$0xff] %v10421_v17  ;;  %v10443_v17 = vpop.f32.mrf.mxu1 }
 0x1dc   : > { %v10423_v38 = vpop.f32.mrf.mxu0  ;;  %12165 = vst [vmem:[#allocation90_spill] sm:$0xff] %v10443_v17 }
 0x1dd   : > { %12156 = vst [vmem:[#allocation81_spill] sm:$0xff] %v10423_v38 }
 0x1de   : > { %v10427_v52 = vpop.f32.mrf.mxu0 }
 0x1df   : > { %12158 = vst [vmem:[#allocation83_spill] sm:$0xff] %v10427_v52  ;;  %v10449_v52 = vpop.f32.mrf.mxu1 }
 0x1e0   : > { %v10429_v26 = vpop.f32.mrf.mxu0  ;;  %12168 = vst [vmem:[#allocation93_spill] sm:$0xff] %v10449_v52 }
 0x1e1   : > { %12159 = vst [vmem:[#allocation84_spill] sm:$0xff] %v10429_v26 }
 0x1e2   : > { %v10433_v48 = vpop.f32.mrf.mxu0 }
 0x1e3   : > { %12161 = vst [vmem:[#allocation86_spill] sm:$0xff] %v10433_v48  ;;  %v10455_v48 = vpop.f32.mrf.mxu1 }
 0x1e4   : > { %v10435_v10 = vpop.f32.mrf.mxu0  ;;  %12171 = vst [vmem:[#allocation96_spill] sm:$0xff] %v10455_v48 }
 0x1e5   : > { %12162 = vst [vmem:[#allocation87_spill] sm:$0xff] %v10435_v10 }
 0x1e6   : > { %v10439_v45 = vpop.f32.mrf.mxu0 }
 0x1e7   : > { %12163 = vst [vmem:[#allocation88_spill] sm:$0xff] %v10439_v45 }
 0x1e8   : > { %v10441_v60 = vpop.f32.mrf.mxu0 }
 0x1e9   : > { %12164 = vst [vmem:[#allocation89_spill] sm:$0xff] %v10441_v60  ;;  %v10462_v60 = vld [vmem:[%s12072_s2 + $0x2f8] sm:$0xff] }
 0x1ea   : > { %v10445_v38 = vpop.f32.mrf.mxu0  ;;  %12173 = vst [vmem:[#allocation98_spill] sm:$0xff] %v10462_v60  ;;  %8399 = vmatprep.subr.mxu0 %v10462_v60  ;;  %v877_v60 = vadd.f32 %v9861_v12, %v9859_v56  ;;  %v917_v56 = vadd.f32 %v9898_v8, %v9896_v0  ;;  %v927_v12 = vadd.f32 %v9908_v19, %v9906_v63 }
 0x1eb   : > { %12166 = vst [vmem:[#allocation91_spill] sm:$0xff] %v10445_v38  ;;  %v10520_v63 = vadd.f32 %v9969_v15, %v9965_v34  ;;  %v12178_v15 = vld [vmem:[#allocation10_spill] sm:$0xff] }
 0x1ec   : > { %v10447_v46 = vpop.f32.mrf.mxu0  ;;  %v1237_v0 = vadd.f32 %v10012_v31, %v877_v60 }
 0x1ed   : > { %12167 = vst [vmem:[#allocation92_spill] sm:$0xff] %v10447_v46  ;;  %v10467_v46 = vpop.f32.mrf.mxu1 }
 0x1ee   : > { %v10451_v26 = vpop.f32.mrf.mxu0 }
 0x1ef   : > { %12169 = vst [vmem:[#allocation94_spill] sm:$0xff] %v10451_v26  ;;  %v10475_v48 = vpop.f32.mrf.mxu1 }
 0x1f0   : > { %v10453_v35 = vpop.f32.mrf.mxu0 }
 0x1f1   : > { %12170 = vst [vmem:[#allocation95_spill] sm:$0xff] %v10453_v35  ;;  %v1525_v35 = vadd.f32 %v9923_v59, %v9919_v33  ;;  %v2138_v33 = vadd.f32 %v10128_v18, %v10126_v61  ;;  %v10490_v59 = vpop.f32.mrf.mxu1 }
 0x1f2   : > { %v10457_v10 = vpop.f32.mrf.mxu0 }
 0x1f3   : > { %12172 = vst [vmem:[#allocation97_spill] sm:$0xff] %v10457_v10  ;;  %v1831_v52 = vadd.f32 %v10136_v27, %v1525_v35  ;;  %v907_v27 = vadd.f32 %v9888_v51, %v9886_v40  ;;  %v1531_v40 = vadd.f32 %v9947_v3, %v9943_v11  ;;  %v1533_v51 = vadd.f32 %v9958_v9, %v9954_v7  ;;  %v12177_v3 = vld [vmem:[#allocation8_spill] sm:$0xff]  ;;  %v12186_v35 = vld [vmem:[#allocation7_spill] sm:$0xff] }
 0x1f4   : > { %v10464_v45 = vpop.f32.mrf.mxu0  ;;  %v10534_v11 = vadd.f32 %v9991_v4, %v9987_v20  ;;  %v12182_v20 = vld [vmem:[#allocation6_spill] sm:$0xff] }
 0x1f5   : > { %12174 = vst [vmem:[#allocation99_spill] sm:$0xff] %v10464_v45  ;;  %v887_v45 = vadd.f32 %v9870_v22, %v9868_v30  ;;  %v10504_v22 = vadd.f32 %v9915_v23, %v9913_v13  ;;  %v2140_v13 = vadd.f32 %v10149_v1, %v10147_v6  ;;  %v1243_v31 = vadd.f32 %v12178_v15, %v907_v27 }
 0x1f6   : > { %v10469_v38 = vpop.f32.mrf.mxu0  ;;  %v10549_v4 = vadd.f32 %v12182_v20, %v1237_v0  ;;  %v12189_v0 = vld [vmem:[#allocation11_spill] sm:$0xff] }
 0x1f7   : > { %v1239_v19 = vadd.f32 %v10028_v16, %v887_v45  ;;  %v12179_v16 = vld [vmem:[#allocation18_spill] sm:$0xff]  ;;  %v2447_v61 = vadd.f32 %v10369_v50, %v2140_v13 }
 0x1f8   : > { %v10471_v26 = vpop.f32.mrf.mxu0 }
 0x1f9   : > { %12175 = vst [vmem:[#allocation100_spill] sm:$0xff] %v10471_v26  ;;  %v1527_v26 = vadd.f32 %v9931_v43, %v9927_v25  ;;  %v2137_v25 = vadd.f32 %v10138_v57, %v1831_v52  ;;  %v12183_v57 = vld [vmem:[#allocation12_spill] sm:$0xff] }
 0x1fa   : > { %v10477_v10 = vpop.f32.mrf.mxu0  ;;  %v1245_v1 = vadd.f32 %v12183_v57, %v917_v56  ;;  %v10557_v52 = vld [vmem:[%s12073_s3] ss:$0 sm:$0xff]  ;;  %v12188_v56 = vld [vmem:[#allocation21_spill] sm:$0xff]  ;;  %v1839_v57 = vadd.f32 %v10180_v47, %v1533_v51 }
 0x1fb   : > { %12176 = vst [vmem:[#allocation101_spill] sm:$0xff] %v10477_v10  ;;  %v897_v10 = vadd.f32 %v9879_v55, %v9877_v29  ;;  %v1833_v43 = vadd.f32 %v10151_v36, %v1527_v26  ;;  %v2445_v29 = vadd.f32 %v10349_v42, %v2138_v33  ;;  %v1529_v55 = vadd.f32 %v9939_v28, %v9935_v58  ;;  %v10526_v58 = vpop.f32.mrf.mxu1  ;;  %v12185_v26 = vld [vmem:[#allocation20_spill] sm:$0xff]  ;;  %v12187_v33 = vld [vmem:[#allocation9_spill] sm:$0xff] }
 0x1fc   : > { %v10480_v17 = vpop.f32.mrf.mxu0  ;;  %v2444_v23 = vadd.f32 %v10359_v14, %v2137_v25  ;;  %v10530_v28 = vadd.f32 %v9980_v53, %v9976_v21  ;;  %v12180_v21 = vld [vmem:[#allocation4_spill] sm:$0xff]  ;;  %v12181_v53 = vld [vmem:[#allocation5_spill] sm:$0xff]  ;;  %v10560_v14 = vadd.f32 %v12186_v35, %v1239_v19  ;;  %v2753_v19 = vadd.f32 %v10371_v39, %v2447_v61  ;;  %v12196_v35 = vld [vmem:[#allocation15_spill] sm:$0xff] }
 0x1fd   : > { %v1241_v7 = vadd.f32 %v12177_v3, %v897_v10  ;;  %v1835_v9 = vadd.f32 %v10162_v49, %v1529_v55  ;;  %v2139_v36 = vadd.f32 %v12179_v16, %v1833_v43  ;;  %v2751_v6 = vadd.f32 %v10351_v62, %v2445_v29  ;;  %v12184_v49 = vld [vmem:[#allocation19_spill] sm:$0xff]  ;;  %v10564_v62 = vpop.f32.mrf.mxu1  ;;  %v10575_v55 = vld [vmem:[%s12073_s3 + $0x1] ss:$0 sm:$0xff]  ;;  %v12190_v3 = vld [vmem:[#allocation13_spill] sm:$0xff] }
 0x1fe   : > { %v10500_v30 = vpop.f32.mrf.mxu0  ;;  %v10546_v18 = vadd.f32 %v12181_v53, %v12180_v21  ;;  %v2142_v45 = vadd.f32 %v12185_v26, %v12184_v49  ;;  %v2750_v50 = vadd.f32 %v10361_v37, %v2444_v23  ;;  %v1837_v43 = vadd.f32 %v10171_v5, %v1531_v40  ;;  %v12191_v5 = vld [vmem:[#allocation14_spill] sm:$0xff]  ;;  %v12194_v53 = vld [vmem:[#allocation24_spill] sm:$0xff]  ;;  %v12200_v47 = vld [vmem:[#allocation73_spill] sm:$0xff] }
 0x1ff   : > { %v2446_v42 = vadd.f32 %v10379_v24, %v2139_v36  ;;  %v10567_v27 = vadd.f32 %v12187_v33, %v1241_v7  ;;  %v2141_v25 = vadd.f32 %v12188_v56, %v1835_v9  ;;  %v10578_v24 = vadd.f32 %v12189_v0, %v1243_v31  ;;  %v12193_v9 = vld [vmem:[#allocation23_spill] sm:$0xff]  ;;  %v10590_v31 = vpop.f32.mrf.mxu1  ;;  %v12199_v56 = vld [vmem:[#allocation76_spill] sm:$0xff] }
 0x200   : > { %v10516_v8 = vpop.f32.mrf.mxu0  ;;  %v2449_v29 = vadd.f32 %v10384_v41, %v2142_v45  ;;  %v10583_v7 = vadd.f32 %v12190_v3, %v1245_v1  ;;  %v1247_v40 = vadd.f32 %v12191_v5, %v927_v12  ;;  %v12192_v41 = vld [vmem:[#allocation22_spill] sm:$0xff]  ;;  %v2143_v20 = vadd.f32 %v12194_v53, %v1837_v43  ;;  %v12195_v1 = vld [vmem:[#allocation72_spill] sm:$0xff] }
 0x201   : > { %v2144_v15 = vadd.f32 %v12193_v9, %v12192_v41  ;;  %v2448_v16 = vadd.f32 %v10391_v44, %v2141_v25  ;;  %v10607_v43 = vpop.f32.mrf.mxu1  ;;  %v12202_v3 = vld [vmem:[#allocation30_spill] sm:$0xff] }
 0x202   : > { %v10538_v34 = vpop.f32.mrf.mxu0  ;;  %v2755_v12 = vadd.f32 %v10398_v32, %v2449_v29  ;;  %v2450_v51 = vadd.f32 %v12200_v47, %v2143_v20  ;;  %v1841_v5 = vadd.f32 %v12202_v3, %v10520_v63  ;;  %v12204_v9 = vld [vmem:[#allocation74_spill] sm:$0xff]  ;;  %v12206_v20 = vld [vmem:[#allocation28_spill] sm:$0xff]  ;;  %v12212_v47 = vld [vmem:[#allocation85_spill] sm:$0xff] }
 0x203   : > { %v2451_v49 = vadd.f32 %v12195_v1, %v2144_v15  ;;  %v2754_v25 = vadd.f32 %v12199_v56, %v2448_v16  ;;  %v12208_v63 = vld [vmem:[#allocation82_spill] sm:$0xff] }
 0x204   : > { %v7953_v60 = vpop.f32.mrf.mxu0  ;;  %v2756_v1 = vadd.f32 %v12208_v63, %v2450_v51  ;;  %v12211_v56 = vld [vmem:[#allocation34_spill] sm:$0xff] }
 0x205   : > { %v3057_v10 = vadd.f32 %v7953_v60, %v2751_v6  ;;  %v2752_v6 = vadd.f32 %v10389_v2, %v2446_v42  ;;  %v12197_v42 = vld [vmem:[#allocation25_spill] sm:$0xff] }
 0x206   : > { %v2897_v37 = vpop.f32.mrf.mxu0 }
 0x207   : > { %v3094_v13 = vmul.f32 %v10557_v52, %v3057_v10  ;;  %v3056_v23 = vadd.f32 %v2897_v37, %v2750_v50  ;;  %v10601_v50 = vadd.f32 %v12196_v35, %v1247_v40  ;;  %v12198_v10 = vld [vmem:[#allocation26_spill] sm:$0xff]  ;;  %v12203_v40 = vld [vmem:[#allocation79_spill] sm:$0xff] }
 0x208   : > { %v7956_v36 = vpop.f32.mrf.mxu0  ;;  %v2146_v33 = vadd.f32 %v12198_v10, %v12197_v42  ;;  %v2757_v41 = vadd.f32 %v12203_v40, %v2451_v49  ;;  %v12209_v49 = vld [vmem:[#allocation77_spill] sm:$0xff] }
 0x209   : > { %v3131_v39 = vadd.f32 %v10575_v55, %v3094_v13  ;;  %v3093_v61 = vmul.f32 %v10557_v52, %v3056_v23  ;;  %v3059_v21 = vadd.f32 %v7956_v36, %v2753_v19  ;;  %v12201_v13 = vld [vmem:[#allocation27_spill] sm:$0xff]  ;;  %v12216_v40 = vld [vmem:[#allocation33_spill] sm:$0xff] }
 0x20a   : > { %v2907_v26 = vpop.f32.mrf.mxu0  ;;  %v2145_v23 = vadd.f32 %v12201_v13, %v1839_v57  ;;  %v2453_v15 = vadd.f32 %v12204_v9, %v2146_v33  ;;  %v12207_v57 = vld [vmem:[#allocation29_spill] sm:$0xff]  ;;  %v12210_v33 = vld [vmem:[#allocation31_spill] sm:$0xff]  ;;  %v12217_v9 = vld [vmem:[#allocation80_spill] sm:$0xff] }
 0x20b   : > { %v3163_v44 = vmax.f32 %v3131_v39, 0.0  ;;  %v3130_v45 = vadd.f32 %v10575_v55, %v3093_v61  ;;  %v3096_v2 = vmul.f32 %v10557_v52, %v3059_v21  ;;  %v3058_v60 = vadd.f32 %v2907_v26, %v2752_v6  ;;  %v12205_v21 = vld [vmem:[#allocation16_spill] sm:$0xff] }
 0x20c   : > { %v7959_v32 = vpop.f32.mrf.mxu0  ;;  %v1249_v53 = vadd.f32 %v12205_v21, %v10504_v22  ;;  %v2452_v26 = vadd.f32 %v12209_v49, %v2145_v23  ;;  %v2147_v22 = vadd.f32 %v12210_v33, %v1841_v5  ;;  %v2759_v51 = vadd.f32 %v12212_v47, %v2453_v15  ;;  %v12214_v23 = vld [vmem:[#allocation17_spill] sm:$0xff]  ;;  %v12215_v5 = vld [vmem:[#allocation32_spill] sm:$0xff] }
 0x20d   : > { %3196 = vst [vmem:[#allocation3 + $0x21] sm:$0xff] %v3163_v44  ;;  %v3162_v29 = vmax.f32 %v3130_v45, 0.0  ;;  %v3133_v37 = vadd.f32 %v10575_v55, %v3096_v2  ;;  %v3095_v0 = vmul.f32 %v10557_v52, %v3058_v60  ;;  %v3061_v19 = vadd.f32 %v7959_v32, %v2755_v12  ;;  %v10624_v2 = vpop.f32.mrf.mxu1  ;;  %v12213_v32 = vld [vmem:[#allocation78_spill] sm:$0xff]  ;;  %v12221_v49 = vld [vmem:[#allocation81_spill] sm:$0xff] }
 0x20e   : > { %v2917_v16 = vpop.f32.mrf.mxu0  ;;  %v2148_v12 = vadd.f32 %v12207_v57, %v12206_v20  ;;  %v10636_v3 = vadd.f32 %v12214_v23, %v1249_v53  ;;  %v2454_v15 = vadd.f32 %v12217_v9, %v2147_v22  ;;  %v12218_v53 = vld [vmem:[#allocation35_spill] sm:$0xff]  ;;  %v12223_v22 = vld [vmem:[#allocation37_spill] sm:$0xff]  ;;  %v12228_v9 = vld [vmem:[#allocation96_spill] sm:$0xff] }
 0x20f   : > { %3195 = vst [vmem:[#allocation3 + $0x19] sm:$0xff] %v3162_v29  ;;  %v3165_v36 = vmax.f32 %v3133_v37, 0.0  ;;  %v3132_v6 = vadd.f32 %v10575_v55, %v3095_v0  ;;  %v3098_v39 = vmul.f32 %v10557_v52, %v3061_v19  ;;  %v3060_v61 = vadd.f32 %v2917_v16, %v2754_v25  ;;  %8034 = vmatprep.mubr.f32.mxu1 %v3162_v29 }
 0x210   : > { %v7962_v45 = vpop.f32.mrf.mxu0  ;;  %8035 = vmatmul.mubr.f32.gmra.mxu1 %v3163_v44  ;;  %v1843_v25 = vadd.f32 %v12211_v56, %v10530_v28  ;;  %v2455_v29 = vadd.f32 %v12213_v32, %v2148_v12  ;;  %v2758_v28 = vadd.f32 %v10437_v54, %v2452_v26  ;;  %v12219_v12 = vld [vmem:[#allocation38_spill] sm:$0xff] }
 0x211   : > { %3198 = vst [vmem:[#allocation3 + $0x39] sm:$0xff] %v3165_v36  ;;  %v3164_v60 = vmax.f32 %v3132_v6, 0.0  ;;  %v3135_v35 = vadd.f32 %v10575_v55, %v3098_v39  ;;  %v3097_v42 = vmul.f32 %v10557_v52, %v3060_v61  ;;  %v3063_v10 = vadd.f32 %v7962_v45, %v2757_v41  ;;  %v10642_v6 = vpop.f32.mrf.mxu1 }
 0x212   : > { %v2927_v37 = vpop.f32.mrf.mxu0  ;;  %v2150_v41 = vadd.f32 %v12216_v40, %v12215_v5  ;;  %v2149_v57 = vadd.f32 %v12218_v53, %v1843_v25  ;;  %v1845_v63 = vadd.f32 %v12219_v12, %v10534_v11  ;;  %v12222_v11 = vld [vmem:[#allocation36_spill] sm:$0xff]  ;;  %v12224_v25 = vld [vmem:[#allocation93_spill] sm:$0xff]  ;;  %v12226_v5 = vld [vmem:[#allocation39_spill] sm:$0xff] }
 0x213   : > { %3197 = vst [vmem:[#allocation3 + $0x31] sm:$0xff] %v3164_v60  ;;  %v3167_v44 = vmax.f32 %v3135_v35, 0.0  ;;  %v3134_v0 = vadd.f32 %v10575_v55, %v3097_v42  ;;  %v3100_v19 = vmul.f32 %v10557_v52, %v3063_v10  ;;  %v3062_v13 = vadd.f32 %v2927_v37, %v2756_v1  ;;  %8037 = vmatprep.mubr.f32.mxu1 %v3164_v60  ;;  %v12220_v1 = vld [vmem:[#allocation90_spill] sm:$0xff]  ;;  %v10663_v37 = vpop.f32.mrf.mxu1 }
 0x214   : > { %v7965_v16 = vpop.f32.mrf.mxu0  ;;  %8038 = vmatmul.mubr.f32.gmra.mxu1 %v3165_v36  ;;  %v2761_v54 = vadd.f32 %v12220_v1, %v2455_v29  ;;  %v2457_v26 = vadd.f32 %v12221_v49, %v2150_v41  ;;  %v2152_v56 = vadd.f32 %v12223_v22, %v12222_v11  ;;  %v2760_v47 = vadd.f32 %v12224_v25, %v2454_v15  ;;  %v12227_v41 = vld [vmem:[#allocation42_spill] sm:$0xff] }
 0x215   : > { %3200 = vst [vmem:[#allocation3 + $0x51] sm:$0xff] %v3167_v44  ;;  %v3166_v39 = vmax.f32 %v3134_v0, 0.0  ;;  %v3137_v61 = vadd.f32 %v10575_v55, %v3100_v19  ;;  %v3099_v21 = vmul.f32 %v10557_v52, %v3062_v13  ;;  %v3065_v20 = vadd.f32 %v7965_v16, %v2759_v51  ;;  %v12225_v51 = vld [vmem:[#allocation83_spill] sm:$0xff]  ;;  %v12229_v16 = vld [vmem:[#allocation84_spill] sm:$0xff]  ;;  %v12232_v49 = vld [vmem:[#allocation86_spill] sm:$0xff] }
 0x216   : > { %v2937_v45 = vpop.f32.mrf.mxu0  ;;  %v10651_v36 = vld [vmem:[#allocation3 + $0x18] sm:$0xff]  ;;  %v10653_v60 = vld [vmem:[#allocation3 + $0x20] sm:$0xff]  ;;  %v2456_v32 = vadd.f32 %v12225_v51, %v2149_v57  ;;  %v2151_v40 = vadd.f32 %v12226_v5, %v1845_v63  ;;  %v2763_v15 = vadd.f32 %v12228_v9, %v2457_v26  ;;  %v12238_v9 = vld [vmem:[#allocation88_spill] sm:$0xff] }
 0x217   : > { %3199 = vst [vmem:[#allocation3 + $0x49] sm:$0xff] %v3166_v39  ;;  %v3169_v35 = vmax.f32 %v3137_v61, 0.0  ;;  %v3136_v42 = vadd.f32 %v10575_v55, %v3099_v21  ;;  %v3102_v10 = vmul.f32 %v10557_v52, %v3065_v20  ;;  %v3064_v33 = vadd.f32 %v2937_v45, %v2758_v28  ;;  %8114 = vmatprep.mubr.f32.mxu0 %v10651_v36  ;;  %v12231_v63 = vld [vmem:[#allocation41_spill] sm:$0xff] }
 0x218   : > { %8040 = vmatprep.mubr.f32.mxu1 %v3166_v39  ;;  %v7968_v29 = vpop.f32.mrf.mxu0  ;;  %8115 = vmatmul.mubr.f32.gmra.mxu0 %v10653_v60  ;;  %v1847_v28 = vadd.f32 %v12227_v41, %v10546_v18  ;;  %v2459_v39 = vadd.f32 %v12229_v16, %v2152_v56  ;;  %v12230_v18 = vld [vmem:[#allocation40_spill] sm:$0xff]  ;;  %v2458_v26 = vadd.f32 %v12232_v49, %v2151_v40  ;;  %v12233_v56 = vld [vmem:[#allocation43_spill] sm:$0xff]  ;;  %v12237_v41 = vld [vmem:[#allocation45_spill] sm:$0xff] }
 0x219   : > { %8041 = vmatmul.mubr.f32.gmra.mxu1 %v3167_v44  ;;  %3202 = vst [vmem:[#allocation3 + $0x69] sm:$0xff] %v3169_v35  ;;  %v3168_v0 = vmax.f32 %v3136_v42, 0.0  ;;  %v3139_v19 = vadd.f32 %v10575_v55, %v3102_v10  ;;  %v3101_v13 = vmul.f32 %v10557_v52, %v3064_v33  ;;  %v3067_v23 = vadd.f32 %v7968_v29, %v2761_v54  ;;  %v10684_v42 = vpop.f32.mrf.mxu1  ;;  %v12241_v49 = vld [vmem:[#allocation89_spill] sm:$0xff] }
 0x21a   : > { %v2947_v61 = vpop.f32.mrf.mxu0  ;;  %v10672_v44 = vld [vmem:[#allocation3 + $0x30] sm:$0xff]  ;;  %v10674_v21 = vld [vmem:[#allocation3 + $0x38] sm:$0xff]  ;;  %v2154_v1 = vadd.f32 %v12231_v63, %v12230_v18  ;;  %v2762_v54 = vadd.f32 %v10467_v46, %v2456_v32  ;;  %v2153_v25 = vadd.f32 %v12233_v56, %v1847_v28  ;;  %v2765_v51 = vadd.f32 %v10475_v48, %v2459_v39  ;;  %v12235_v32 = vld [vmem:[#allocation87_spill] sm:$0xff] }
 0x21b   : > { %3201 = vst [vmem:[#allocation3 + $0x61] sm:$0xff] %v3168_v0  ;;  %v3171_v20 = vmax.f32 %v3139_v19, 0.0  ;;  %v3138_v53 = vadd.f32 %v10575_v55, %v3101_v13  ;;  %v3104_v57 = vmul.f32 %v10557_v52, %v3067_v23  ;;  %v3066_v12 = vadd.f32 %v2947_v61, %v2760_v47  ;;  %8117 = vmatprep.mubr.f32.mxu0 %v10672_v44  ;;  %v12234_v47 = vld [vmem:[#allocation46_spill] sm:$0xff]  ;;  %v10705_v39 = vpop.f32.mrf.mxu1  ;;  %v12239_v18 = vld [vmem:[#allocation47_spill] sm:$0xff] }
 0x21c   : > { %8043 = vmatprep.mubr.f32.mxu1 %v3168_v0  ;;  %v7971_v45 = vpop.f32.mrf.mxu0  ;;  %8118 = vmatmul.mubr.f32.gmra.mxu0 %v10674_v21  ;;  %v1849_v46 = vadd.f32 %v12234_v47, %v10549_v4  ;;  %v2461_v29 = vadd.f32 %v12235_v32, %v2154_v1  ;;  %v12236_v4 = vld [vmem:[#allocation44_spill] sm:$0xff]  ;;  %v2764_v28 = vadd.f32 %v10490_v59, %v2458_v26  ;;  %v12240_v1 = vld [vmem:[#allocation50_spill] sm:$0xff] }
 0x21d   : > { %8044 = vmatmul.mubr.f32.gmra.mxu1 %v3169_v35  ;;  %3204 = vst [vmem:[#allocation3 + $0x81] sm:$0xff] %v3171_v20  ;;  %v3170_v10 = vmax.f32 %v3138_v53, 0.0  ;;  %v3141_v33 = vadd.f32 %v10575_v55, %v3104_v57  ;;  %v3103_v11 = vmul.f32 %v10557_v52, %v3066_v12  ;;  %v3069_v22 = vadd.f32 %v7971_v45, %v2763_v15 }
 0x21e   : > { %v2957_v0 = vpop.f32.mrf.mxu0  ;;  %v10693_v35 = vld [vmem:[#allocation3 + $0x48] sm:$0xff]  ;;  %v10695_v19 = vld [vmem:[#allocation3 + $0x50] sm:$0xff]  ;;  %v2156_v48 = vadd.f32 %v12237_v41, %v12236_v4  ;;  %v2460_v15 = vadd.f32 %v12238_v9, %v2153_v25  ;;  %v2155_v63 = vadd.f32 %v12239_v18, %v1849_v46  ;;  %v1851_v59 = vadd.f32 %v12240_v1, %v10560_v14  ;;  %v12243_v25 = vld [vmem:[#allocation49_spill] sm:$0xff] }
 0x21f   : > { %3203 = vst [vmem:[#allocation3 + $0x79] sm:$0xff] %v3170_v10  ;;  %v3173_v13 = vmax.f32 %v3141_v33, 0.0  ;;  %v3140_v23 = vadd.f32 %v10575_v55, %v3103_v11  ;;  %v3106_v5 = vmul.f32 %v10557_v52, %v3069_v22  ;;  %v3068_v40 = vadd.f32 %v2957_v0, %v2762_v54  ;;  %8120 = vmatprep.mubr.f32.mxu0 %v10693_v35  ;;  %v12242_v14 = vld [vmem:[#allocation48_spill] sm:$0xff]  ;;  %v12244_v46 = vld [vmem:[#allocation91_spill] sm:$0xff] }
 0x220   : > { %8046 = vmatprep.mubr.f32.mxu1 %v3170_v10  ;;  %v7974_v16 = vpop.f32.mrf.mxu0  ;;  %8121 = vmatmul.mubr.f32.gmra.mxu0 %v10695_v19  ;;  %v2767_v54 = vadd.f32 %v10526_v58, %v2461_v29  ;;  %v2463_v26 = vadd.f32 %v12241_v49, %v2156_v48  ;;  %v2158_v58 = vadd.f32 %v12243_v25, %v12242_v14  ;;  %v10726_v29 = vpop.f32.mrf.mxu1  ;;  %v12245_v4 = vld [vmem:[#allocation51_spill] sm:$0xff]  ;;  %v12246_v48 = vld [vmem:[#allocation54_spill] sm:$0xff]  ;;  %v12247_v9 = vld [vmem:[#allocation92_spill] sm:$0xff] }
 0x221   : > { %8047 = vmatmul.mubr.f32.gmra.mxu1 %v3171_v20  ;;  %3206 = vst [vmem:[#allocation3 + $0x99] sm:$0xff] %v3173_v13  ;;  %v3172_v61 = vmax.f32 %v3140_v23, 0.0  ;;  %v3143_v53 = vadd.f32 %v10575_v55, %v3106_v5  ;;  %v3105_v57 = vmul.f32 %v10557_v52, %v3068_v40  ;;  %v3071_v12 = vadd.f32 %v7974_v16, %v2765_v51  ;;  %v12251_v14 = vld [vmem:[#allocation55_spill] sm:$0xff] }
 0x222   : > { %v2967_v45 = vpop.f32.mrf.mxu0  ;;  %v10714_v20 = vld [vmem:[#allocation3 + $0x60] sm:$0xff]  ;;  %v10716_v10 = vld [vmem:[#allocation3 + $0x68] sm:$0xff]  ;;  %v2766_v47 = vadd.f32 %v10564_v62, %v2460_v15  ;;  %v2462_v51 = vadd.f32 %v12244_v46, %v2155_v63  ;;  %v2157_v41 = vadd.f32 %v12245_v4, %v1851_v59  ;;  %v1853_v62 = vadd.f32 %v12246_v48, %v10567_v27  ;;  %v12248_v27 = vld [vmem:[#allocation52_spill] sm:$0xff] }
 0x223   : > { %3205 = vst [vmem:[#allocation3 + $0x91] sm:$0xff] %v3172_v61  ;;  %v3175_v33 = vmax.f32 %v3143_v53, 0.0  ;;  %v3142_v11 = vadd.f32 %v10575_v55, %v3105_v57  ;;  %v3108_v22 = vmul.f32 %v10557_v52, %v3071_v12  ;;  %v3070_v56 = vadd.f32 %v2967_v45, %v2764_v28  ;;  %8123 = vmatprep.mubr.f32.mxu0 %v10714_v20  ;;  %v12249_v63 = vld [vmem:[#allocation53_spill] sm:$0xff]  ;;  %v12250_v59 = vld [vmem:[#allocation94_spill] sm:$0xff]  ;;  %v12253_v46 = vld [vmem:[#allocation95_spill] sm:$0xff] }
 0x224   : > { %8049 = vmatprep.mubr.f32.mxu1 %v3172_v61  ;;  %v7977_v32 = vpop.f32.mrf.mxu0  ;;  %8124 = vmatmul.mubr.f32.gmra.mxu0 %v10716_v10  ;;  %v2769_v28 = vadd.f32 %v10590_v31, %v2463_v26  ;;  %v2465_v15 = vadd.f32 %v12247_v9, %v2158_v58  ;;  %v2160_v31 = vadd.f32 %v12249_v63, %v12248_v27  ;;  %v10747_v26 = vpop.f32.mrf.mxu1  ;;  %v12252_v58 = vld [vmem:[#allocation58_spill] sm:$0xff]  ;;  %v12257_v27 = vld [vmem:[#allocation59_spill] sm:$0xff] }
 0x225   : > { %8050 = vmatmul.mubr.f32.gmra.mxu1 %v3173_v13  ;;  %3208 = vst [vmem:[#allocation3 + $0xb1] sm:$0xff] %v3175_v33  ;;  %v3174_v0 = vmax.f32 %v3142_v11, 0.0  ;;  %v3145_v23 = vadd.f32 %v10575_v55, %v3108_v22  ;;  %v3107_v5 = vmul.f32 %v10557_v52, %v3070_v56  ;;  %v3073_v40 = vadd.f32 %v7977_v32, %v2767_v54 }
 0x226   : > { %v2977_v16 = vpop.f32.mrf.mxu0  ;;  %v10735_v13 = vld [vmem:[#allocation3 + $0x78] sm:$0xff]  ;;  %v10737_v61 = vld [vmem:[#allocation3 + $0x80] sm:$0xff]  ;;  %v2768_v1 = vadd.f32 %v10607_v43, %v2462_v51  ;;  %v2464_v54 = vadd.f32 %v12250_v59, %v2157_v41  ;;  %v2159_v25 = vadd.f32 %v12251_v14, %v1853_v62  ;;  %v1855_v43 = vadd.f32 %v12252_v58, %v10578_v24  ;;  %v12254_v24 = vld [vmem:[#allocation56_spill] sm:$0xff] }
 0x227   : > { %3207 = vst [vmem:[#allocation3 + $0xa9] sm:$0xff] %v3174_v0  ;;  %v3177_v53 = vmax.f32 %v3145_v23, 0.0  ;;  %v3144_v57 = vadd.f32 %v10575_v55, %v3107_v5  ;;  %v3110_v12 = vmul.f32 %v10557_v52, %v3073_v40  ;;  %v3072_v18 = vadd.f32 %v2977_v16, %v2766_v47  ;;  %8126 = vmatprep.mubr.f32.mxu0 %v10735_v13  ;;  %v12255_v41 = vld [vmem:[#allocation57_spill] sm:$0xff]  ;;  %v12259_v59 = vld [vmem:[#allocation99_spill] sm:$0xff] }
 0x228   : > { %8052 = vmatprep.mubr.f32.mxu1 %v3174_v0  ;;  %v7980_v49 = vpop.f32.mrf.mxu0  ;;  %8127 = vmatmul.mubr.f32.gmra.mxu0 %v10737_v61  ;;  %v2771_v47 = vadd.f32 %v10624_v2, %v2465_v15  ;;  %v2467_v51 = vadd.f32 %v12253_v46, %v2160_v31  ;;  %v2162_v2 = vadd.f32 %v12255_v41, %v12254_v24  ;;  %v12256_v62 = vld [vmem:[#allocation97_spill] sm:$0xff]  ;;  %v10768_v15 = vpop.f32.mrf.mxu1  ;;  %v12258_v31 = vld [vmem:[#allocation62_spill] sm:$0xff] }
 0x229   : > { %8053 = vmatmul.mubr.f32.gmra.mxu1 %v3175_v33  ;;  %3210 = vst [vmem:[#allocation3 + $0xc9] sm:$0xff] %v3177_v53  ;;  %v3176_v45 = vmax.f32 %v3144_v57, 0.0  ;;  %v3147_v11 = vadd.f32 %v10575_v55, %v3110_v12  ;;  %v3109_v22 = vmul.f32 %v10557_v52, %v3072_v18  ;;  %v3075_v56 = vadd.f32 %v7980_v49, %v2769_v28  ;;  %v12263_v41 = vld [vmem:[#allocation66_spill] sm:$0xff] }
 0x22a   : > { %v2987_v32 = vpop.f32.mrf.mxu0  ;;  %v10756_v33 = vld [vmem:[#allocation3 + $0x90] sm:$0xff]  ;;  %v10758_v0 = vld [vmem:[#allocation3 + $0x98] sm:$0xff]  ;;  %v2770_v48 = vadd.f32 %v10642_v6, %v2464_v54  ;;  %v2466_v28 = vadd.f32 %v12256_v62, %v2159_v25  ;;  %v2161_v63 = vadd.f32 %v12257_v27, %v1855_v43  ;;  %v1857_v6 = vadd.f32 %v12258_v31, %v10583_v7  ;;  %v7915_v46 = vpop.f32.mrf.mxu1 }
 0x22b   : > { %3209 = vst [vmem:[#allocation3 + $0xc1] sm:$0xff] %v3176_v45  ;;  %v3179_v23 = vmax.f32 %v3147_v11, 0.0  ;;  %v3146_v5 = vadd.f32 %v10575_v55, %v3109_v22  ;;  %v3112_v40 = vmul.f32 %v10557_v52, %v3075_v56  ;;  %v3074_v4 = vadd.f32 %v2987_v32, %v2768_v1  ;;  %8129 = vmatprep.mubr.f32.mxu0 %v10756_v33  ;;  %v12260_v7 = vld [vmem:[#allocation60_spill] sm:$0xff]  ;;  %v12261_v25 = vld [vmem:[#allocation61_spill] sm:$0xff] }
 0x22c   : > { %8055 = vmatprep.mubr.f32.mxu1 %v3176_v45  ;;  %v7983_v9 = vpop.f32.mrf.mxu0  ;;  %8130 = vmatmul.mubr.f32.gmra.mxu0 %v10758_v0  ;;  %v2773_v1 = vadd.f32 %v10663_v37, %v2467_v51  ;;  %v2469_v54 = vadd.f32 %v12259_v59, %v2162_v2  ;;  %v2164_v37 = vadd.f32 %v12261_v25, %v12260_v7  ;;  %v12269_v7 = vld [vmem:[#allocation70_spill] sm:$0xff] }
 0x22d   : > { %8056 = vmatmul.mubr.f32.gmra.mxu1 %v3177_v53  ;;  %3212 = vst [vmem:[#allocation3 + $0xe1] sm:$0xff] %v3179_v23  ;;  %v3178_v16 = vmax.f32 %v3146_v5, 0.0  ;;  %v3149_v57 = vadd.f32 %v10575_v55, %v3112_v40  ;;  %v3111_v12 = vmul.f32 %v10557_v52, %v3074_v4  ;;  %v3077_v18 = vadd.f32 %v7983_v9, %v2771_v47  ;;  %v12262_v4 = vld [vmem:[#allocation63_spill] sm:$0xff] }
 0x22e   : > { %v2997_v49 = vpop.f32.mrf.mxu0  ;;  %v10777_v53 = vld [vmem:[#allocation3 + $0xa8] sm:$0xff]  ;;  %v10779_v45 = vld [vmem:[#allocation3 + $0xb0] sm:$0xff]  ;;  %v2772_v58 = vadd.f32 %v10684_v42, %v2466_v28  ;;  %v2468_v43 = vadd.f32 %v10469_v38, %v2161_v63  ;;  %v2163_v24 = vadd.f32 %v12262_v4, %v1857_v6  ;;  %v1859_v2 = vadd.f32 %v12263_v41, %v10601_v50  ;;  %v12267_v63 = vld [vmem:[#allocation101_spill] sm:$0xff] }
 0x22f   : > { %3211 = vst [vmem:[#allocation3 + $0xd9] sm:$0xff] %v3178_v16  ;;  %v3181_v11 = vmax.f32 %v3149_v57, 0.0  ;;  %v3148_v22 = vadd.f32 %v10575_v55, %v3111_v12  ;;  %v3114_v56 = vmul.f32 %v10557_v52, %v3077_v18  ;;  %v3076_v14 = vadd.f32 %v2997_v49, %v2770_v48  ;;  %8132 = vmatprep.mubr.f32.mxu0 %v10777_v53  ;;  %v12264_v38 = vld [vmem:[#allocation100_spill] sm:$0xff]  ;;  %v12266_v18 = vld [vmem:[#allocation65_spill] sm:$0xff] }
 0x230   : > { %8058 = vmatprep.mubr.f32.mxu1 %v3178_v16  ;;  %v7986_v47 = vpop.f32.mrf.mxu0  ;;  %8133 = vmatmul.mubr.f32.gmra.mxu0 %v10779_v45  ;;  %v2775_v42 = vadd.f32 %v10705_v39, %v2469_v54  ;;  %v2471_v48 = vadd.f32 %v12264_v38, %v2164_v37  ;;  %v12265_v50 = vld [vmem:[#allocation64_spill] sm:$0xff]  ;;  %v2774_v27 = vadd.f32 %v10726_v29, %v2468_v43 }
 0x231   : > { %8059 = vmatmul.mubr.f32.gmra.mxu1 %v3179_v23  ;;  %3214 = vst [vmem:[#allocation3 + $0xf9] sm:$0xff] %v3181_v11  ;;  %v3180_v51 = vmax.f32 %v3148_v22, 0.0  ;;  %v3151_v32 = vadd.f32 %v10575_v55, %v3114_v56  ;;  %v3113_v5 = vmul.f32 %v10557_v52, %v3076_v14  ;;  %v3079_v40 = vadd.f32 %v7986_v47, %v2773_v1  ;;  %v2731_v1 = vpop.f32.mrf.mxu1  ;;  %v12268_v56 = vld [vmem:[#allocation67_spill] sm:$0xff] }
 0x232   : > { %v3007_v62 = vpop.f32.mrf.mxu0  ;;  %v10796_v28 = vld [vmem:[#allocation3 + $0xc0] sm:$0xff]  ;;  %v10798_v23 = vld [vmem:[#allocation3 + $0xc8] sm:$0xff]  ;;  %v2166_v39 = vadd.f32 %v12266_v18, %v12265_v50  ;;  %v2470_v31 = vadd.f32 %v12267_v63, %v2163_v24  ;;  %v2165_v14 = vadd.f32 %v12268_v56, %v1859_v2  ;;  %v1861_v25 = vadd.f32 %v12269_v7, %v10636_v3  ;;  %v12270_v3 = vld [vmem:[#allocation68_spill] sm:$0xff] }
 0x233   : > { %3213 = vst [vmem:[#allocation3 + $0xf1] sm:$0xff] %v3180_v51  ;;  %v3183_v9 = vmax.f32 %v3151_v32, 0.0  ;;  %v3150_v16 = vadd.f32 %v10575_v55, %v3113_v5  ;;  %v3116_v57 = vmul.f32 %v10557_v52, %v3079_v40  ;;  %v3078_v12 = vadd.f32 %v3007_v62, %v2772_v58  ;;  %8135 = vmatprep.mubr.f32.mxu0 %v10796_v28  ;;  %v12271_v40 = vld [vmem:[#allocation69_spill] sm:$0xff]  ;;  %v7918_v41 = vpop.f32.mrf.mxu1  ;;  %v12272_v62 = vld [vmem:[#allocation71_spill] sm:$0xff] }
 0x234   : > { %8061 = vmatprep.mubr.f32.mxu1 %v3180_v51  ;;  %v7989_v6 = vpop.f32.mrf.mxu0  ;;  %8136 = vmatmul.mubr.f32.gmra.mxu0 %v10798_v23  ;;  %v2777_v29 = vadd.f32 %v10747_v26, %v2471_v48  ;;  %v2473_v37 = vadd.f32 %v10480_v17, %v2166_v39  ;;  %v2168_v26 = vadd.f32 %v12271_v40, %v12270_v3 }
 0x235   : > { %8062 = vmatmul.mubr.f32.gmra.mxu1 %v3181_v11  ;;  %3216 = vst [vmem:[#allocation3 + $0x111] sm:$0xff] %v3183_v9  ;;  %v3182_v59 = vmax.f32 %v3150_v16, 0.0  ;;  %v3153_v54 = vadd.f32 %v10575_v55, %v3116_v57  ;;  %v3115_v49 = vmul.f32 %v10557_v52, %v3078_v12  ;;  %v3081_v22 = vadd.f32 %v7989_v6, %v2775_v42 }
 0x236   : > { %v3017_v58 = vpop.f32.mrf.mxu0  ;;  %v10815_v43 = vld [vmem:[#allocation3 + $0xd8] sm:$0xff]  ;;  %v10817_v11 = vld [vmem:[#allocation3 + $0xe0] sm:$0xff]  ;;  %v2776_v17 = vadd.f32 %v10768_v15, %v2470_v31  ;;  %v2472_v4 = vadd.f32 %v10500_v30, %v2165_v14  ;;  %v2167_v16 = vadd.f32 %v12272_v62, %v1861_v25  ;;  %v2779_v57 = vadd.f32 %v7915_v46, %v2473_v37 }
 0x237   : > { %3215 = vst [vmem:[#allocation3 + $0x109] sm:$0xff] %v3182_v59  ;;  %v3185_v47 = vmax.f32 %v3153_v54, 0.0  ;;  %v3152_v51 = vadd.f32 %v10575_v55, %v3115_v49  ;;  %v3118_v32 = vmul.f32 %v10557_v52, %v3081_v22  ;;  %v3080_v5 = vadd.f32 %v3017_v58, %v2774_v27  ;;  %8138 = vmatprep.mubr.f32.mxu0 %v10815_v43 }
 0x238   : > { %8064 = vmatprep.mubr.f32.mxu1 %v3182_v59  ;;  %v7992_v24 = vpop.f32.mrf.mxu0  ;;  %8139 = vmatmul.mubr.f32.gmra.mxu0 %v10817_v11  ;;  %v2475_v12 = vadd.f32 %v10516_v8, %v2168_v26  ;;  %v2778_v63 = vadd.f32 %v2731_v1, %v2472_v4  ;;  %v2474_v46 = vadd.f32 %v10538_v34, %v2167_v16  ;;  %v2741_v8 = vpop.f32.mrf.mxu1  ;;  %v3774_v16 = vld [vmem:[#allocation3 + $0x2] sm:$0xff] }
 0x239   : > { %8065 = vmatmul.mubr.f32.gmra.mxu1 %v3183_v9  ;;  %3218 = vst [vmem:[#allocation3 + $0x129] sm:$0xff] %v3185_v47  ;;  %v3184_v2 = vmax.f32 %v3152_v51, 0.0  ;;  %v3155_v42 = vadd.f32 %v10575_v55, %v3118_v32  ;;  %v3117_v38 = vmul.f32 %v10557_v52, %v3080_v5  ;;  %v3083_v48 = vadd.f32 %v7992_v24, %v2777_v29 }
 0x23a   : > { %v3027_v15 = vpop.f32.mrf.mxu0  ;;  %v10831_v50 = vld [vmem:[#allocation3 + $0xf0] sm:$0xff]  ;;  %v10833_v30 = vld [vmem:[#allocation3 + $0xf8] sm:$0xff]  ;;  %v2781_v22 = vadd.f32 %v7918_v41, %v2475_v12  ;;  %v2780_v37 = vadd.f32 %v2741_v8, %v2474_v46 }
 0x23b   : > { %3217 = vst [vmem:[#allocation3 + $0x121] sm:$0xff] %v3184_v2  ;;  %v3187_v9 = vmax.f32 %v3155_v42, 0.0  ;;  %v3154_v18 = vadd.f32 %v10575_v55, %v3117_v38  ;;  %v3120_v39 = vmul.f32 %v10557_v52, %v3083_v48  ;;  %v3082_v27 = vadd.f32 %v3027_v15, %v2776_v17  ;;  %8141 = vmatprep.mubr.f32.mxu0 %v10831_v50  ;;  %v3775_v15 = vld [vmem:[#allocation3 + $0xa] sm:$0xff] }
 0x23c   : > { %8067 = vmatprep.mubr.f32.mxu1 %v3184_v2  ;;  %v7995_v31 = vpop.f32.mrf.mxu0  ;;  %8142 = vmatmul.mubr.f32.gmra.mxu0 %v10833_v30 }
 0x23d   : > { %8068 = vmatmul.mubr.f32.gmra.mxu1 %v3185_v47  ;;  %3220 = vst [vmem:[#allocation3 + $0x141] sm:$0xff] %v3187_v9  ;;  %v3186_v6 = vmax.f32 %v3154_v18, 0.0  ;;  %v3157_v59 = vadd.f32 %v10575_v55, %v3120_v39  ;;  %v3119_v54 = vmul.f32 %v10557_v52, %v3082_v27  ;;  %v3085_v49 = vadd.f32 %v7995_v31, %v2779_v57  ;;  %v10887_v39 = vld [vmem:[#allocation3 + $0x1a] sm:$0xff]  ;;  %v12273_v27 = vld [vmem:[#allocation75_spill] sm:$0xff] }
 0x23e   : > { %v3037_v56 = vpop.f32.mrf.mxu0  ;;  %v10842_v14 = vld [vmem:[#allocation3 + $0x108] sm:$0xff]  ;;  %v10844_v7 = vld [vmem:[#allocation3 + $0x110] sm:$0xff] }
 0x23f   : > { %3219 = vst [vmem:[#allocation3 + $0x139] sm:$0xff] %v3186_v6  ;;  %v3189_v34 = vmax.f32 %v3157_v59, 0.0  ;;  %v3156_v1 = vadd.f32 %v10575_v55, %v3119_v54  ;;  %v3122_v25 = vmul.f32 %v10557_v52, %v3085_v49  ;;  %v3084_v29 = vadd.f32 %v3037_v56, %v2778_v63  ;;  %8144 = vmatprep.mubr.f32.mxu0 %v10842_v14  ;;  %v6342_v59 = vld [vmem:[%s12072_s2 + $0x268] sm:$0xff]  ;;  %v6341_v56 = vld [vmem:[%s12072_s2 + $0x260] sm:$0xff] }
 0x240   : > { %8070 = vmatprep.mubr.f32.mxu1 %v3186_v6  ;;  %v7998_v58 = vpop.f32.mrf.mxu0  ;;  %8145 = vmatmul.mubr.f32.gmra.mxu0 %v10844_v7  ;;  %v10896_v6 = vld [vmem:[#allocation3 + $0x22] sm:$0xff]  ;;  %v10905_v49 = vld [vmem:[#allocation3 + $0x32] sm:$0xff] }
 0x241   : > { %8071 = vmatmul.mubr.f32.gmra.mxu1 %v3187_v9  ;;  %3222 = vst [vmem:[#allocation3 + $0x159] sm:$0xff] %v3189_v34  ;;  %v3188_v47 = vmax.f32 %v3156_v1, 0.0  ;;  %v3159_v51 = vadd.f32 %v10575_v55, %v3122_v25  ;;  %v3121_v32 = vmul.f32 %v10557_v52, %v3084_v29  ;;  %v3087_v5 = vadd.f32 %v7998_v58, %v2781_v22  ;;  %v10909_v22 = vld [vmem:[#allocation3 + $0x3a] sm:$0xff]  ;;  %v10924_v25 = vld [vmem:[#allocation3 + $0x52] sm:$0xff]  ;;  %v10931_v29 = vld [vmem:[#allocation3 + $0x62] sm:$0xff] }
 0x242   : > { %v3047_v3 = vpop.f32.mrf.mxu0  ;;  %v10852_v40 = vld [vmem:[#allocation3 + $0x120] sm:$0xff]  ;;  %v10854_v26 = vld [vmem:[#allocation3 + $0x128] sm:$0xff] }
 0x243   : > { %3221 = vst [vmem:[#allocation3 + $0x151] sm:$0xff] %v3188_v47  ;;  %v3191_v17 = vmax.f32 %v3159_v51, 0.0  ;;  %v3158_v4 = vadd.f32 %v10575_v55, %v3121_v32  ;;  %v3124_v24 = vmul.f32 %v10557_v52, %v3087_v5  ;;  %v3086_v41 = vadd.f32 %v3047_v3, %v2780_v37  ;;  %8147 = vmatprep.mubr.f32.mxu0 %v10852_v40  ;;  %v12274_v1 = vld [vmem:[#allocation98_spill] sm:$0xff]  ;;  %v10938_v37 = vld [vmem:[#allocation3 + $0x6a] sm:$0xff]  ;;  %v10959_v51 = vld [vmem:[#allocation3 + $0x92] sm:$0xff] }
 0x244   : > { %8073 = vmatprep.mubr.f32.mxu1 %v3188_v47  ;;  %8148 = vmatmul.mubr.f32.gmra.mxu0 %v10854_v26  ;;  %v10945_v58 = vld [vmem:[#allocation3 + $0x7a] sm:$0xff]  ;;  %v10952_v47 = vld [vmem:[#allocation3 + $0x82] sm:$0xff]  ;;  %v10973_v5 = vld [vmem:[#allocation3 + $0xaa] sm:$0xff] }
 0x245   : > { %8074 = vmatmul.mubr.f32.gmra.mxu1 %v3189_v34  ;;  %3224 = vst [vmem:[#allocation3 + $0x171] sm:$0xff] %v3191_v17  ;;  %v10860_v2 = vmax.f32 %v3158_v4, 0.0  ;;  %v3161_v42 = vadd.f32 %v10575_v55, %v3124_v24  ;;  %v3123_v38 = vmul.f32 %v10557_v52, %v3086_v41  ;;  %v10916_v34 = vld [vmem:[#allocation3 + $0x4a] sm:$0xff]  ;;  %v10966_v32 = vld [vmem:[#allocation3 + $0x9a] sm:$0xff]  ;;  %v10980_v3 = vld [vmem:[#allocation3 + $0xb2] sm:$0xff] }
 0x246   : > { %v10864_v48 = vld [vmem:[#allocation3 + $0x138] sm:$0xff]  ;;  %v10866_v62 = vld [vmem:[#allocation3 + $0x140] sm:$0xff]  ;;  %v10994_v4 = vld [vmem:[#allocation3 + $0xca] sm:$0xff] }
 0x247   : > { %3223 = vst [vmem:[#allocation3 + $0x169] sm:$0xff] %v10860_v2  ;;  %v3193_v57 = vmax.f32 %v3161_v42, 0.0  ;;  %v10870_v12 = vadd.f32 %v10575_v55, %v3123_v38  ;;  %8150 = vmatprep.mubr.f32.mxu0 %v10864_v48  ;;  %8076 = vmatprep.mubr.f32.mxu1 %v10860_v2  ;;  %v6343_v55 = vld [vmem:[%s12072_s2 + $0x270] sm:$0xff]  ;;  %v11015_v42 = vld [vmem:[#allocation3 + $0xf2] sm:$0xff] }
 0x248   : > { %8151 = vmatmul.mubr.f32.gmra.mxu0 %v10866_v62  ;;  %v11001_v24 = vld [vmem:[#allocation3 + $0xda] sm:$0xff]  ;;  %v11008_v41 = vld [vmem:[#allocation3 + $0xe2] sm:$0xff] }
 0x249   : > { %8077 = vmatmul.mubr.f32.gmra.mxu1 %v3191_v17  ;;  %3226 = vst [vmem:[#allocation3 + $0x189] sm:$0xff] %v3193_v57  ;;  %v3192_v52 = vmax.f32 %v10870_v12, 0.0  ;;  %v10987_v17 = vld [vmem:[#allocation3 + $0xc2] sm:$0xff]  ;;  %v11022_v38 = vld [vmem:[#allocation3 + $0xfa] sm:$0xff]  ;;  %v11036_v57 = vld [vmem:[#allocation3 + $0x112] sm:$0xff] }
 0x24a   : > { %8191 = vmatprep.mubr.f32.mxu1 %v3774_v16  ;;  %v10876_v9 = vld [vmem:[#allocation3 + $0x150] sm:$0xff]  ;;  %v10878_v18 = vld [vmem:[#allocation3 + $0x158] sm:$0xff] }
 0x24b   : > { %3225 = vst [vmem:[#allocation3 + $0x181] sm:$0xff] %v3192_v52  ;;  %8153 = vmatprep.mubr.f32.mxu0 %v10876_v9  ;;  %v8033_v31 = vpop.f32.mrf.mxu1  ;;  %v11029_v16 = vld [vmem:[#allocation3 + $0x10a] sm:$0xff] }
 0x24c   : > { %8154 = vmatmul.mubr.f32.gmra.mxu0 %v10878_v18  ;;  %v8113_v8 = vpop.f32.mrf.mxu0  ;;  %v4999_v12 = vld [vmem:[#allocation3 + $0x30] sm:$0xff] }
 0x24d   : > { %8192 = vmatmul.mubr.f32.vlgmr.msra.gmra.mxu1 %v3775_v15  ;;  %v10901_v54 = vadd.f32 %v8113_v8, %v8033_v31  ;;  %v11043_v15 = vld [vmem:[#allocation3 + $0x122] sm:$0xff]  ;;  %v11071_v8 = vld [vmem:[#allocation3 + $0x152] sm:$0xff] }
 0x24e   : > { %8194 = vmatprep.mubr.f32.mxu1 %v10887_v39  ;;  %8320 = vmatpush3.msra.mxu1 %v12273_v27  ;;  %v10891_v63 = vld [vmem:[#allocation3 + $0x168] sm:$0xff]  ;;  %v10893_v46 = vld [vmem:[#allocation3 + $0x170] sm:$0xff]  ;;  %v11057_v27 = vld [vmem:[#allocation3 + $0x13a] sm:$0xff] }
 0x24f   : > { %8321 = vmatprep.subr.mxu1 %v6343_v55  ;;  %8156 = vmatprep.mubr.f32.mxu0 %v10891_v63  ;;  %v11064_v31 = vld [vmem:[#allocation3 + $0x142] sm:$0xff] }
 0x250   : > { %8322 = vmatpush3.msra.mxu1 %v6343_v55  ;;  %8157 = vmatmul.mubr.f32.gmra.mxu0 %v10893_v46  ;;  %v11050_v55 = vld [vmem:[#allocation3 + $0x12a] sm:$0xff] }
 0x251   : > { %8195 = vmatmul.mubr.f32.gmra.mxu1 %v10896_v6  ;;  %8271 = vmatprep.mubr.f32.mxu0 %v10651_v36  ;;  %v6359_v36 = vld [vmem:[%s12072_s2 + $0x2f0] sm:$0xff] }
 0x252   : > { %8197 = vmatprep.mubr.f32.mxu1 %v10905_v49  ;;  %8323 = vmatprep.subr.mxu1 %v6342_v59 }
 0x253   : > { %8324 = vmatpush3.msra.mxu1 %v6342_v59  ;;  %v11078_v59 = vld [vmem:[#allocation3 + $0x15a] sm:$0xff] }
 0x254   : > { %8272 = vmatmul.mubr.f32.vlgmr.msra.gmra.mxu0 %v10653_v60  ;;  %8325 = vmatprep.subr.mxu1 %v6341_v56  ;;  %v6340_v60 = vld [vmem:[%s12072_s2 + $0x258] sm:$0xff] }
 0x255   : > { %8198 = vmatmul.mubr.f32.gmra.mxu1 %v10909_v22  ;;  %8274 = vmatprep.mubr.f32.mxu0 %v10672_v44  ;;  %v6358_v44 = vld [vmem:[%s12072_s2 + $0x2e8] sm:$0xff] }
 0x256   : > { %8200 = vmatprep.mubr.f32.mxu1 %v10916_v34  ;;  %8400 = vmatpush3.msra.mxu0 %v12274_v1  ;;  %v4386_v1 = vld [vmem:[#allocation3 + $0x19] sm:$0xff] }
 0x257   : > { %8326 = vmatpush3.msra.mxu1 %v6341_v56  ;;  %8401 = vmatprep.subr.mxu0 %v6359_v36  ;;  %v11085_v56 = vld [vmem:[#allocation3 + $0x16a] sm:$0xff] }
 0x258   : > { %8275 = vmatmul.mubr.f32.gmra.mxu0 %v10674_v21  ;;  %8327 = vmatprep.subr.mxu1 %v6340_v60  ;;  %v6339_v21 = vld [vmem:[%s12072_s2 + $0x250] sm:$0xff] }
 0x259   : > { %8201 = vmatmul.mubr.f32.gmra.mxu1 %v10924_v25  ;;  %8277 = vmatprep.mubr.f32.mxu0 %v10693_v35  ;;  %v6357_v35 = vld [vmem:[%s12072_s2 + $0x2e0] sm:$0xff] }
 0x25a   : > { %8203 = vmatprep.mubr.f32.mxu1 %v10931_v29  ;;  %8402 = vmatpush3.msra.mxu0 %v6359_v36  ;;  %v11092_v36 = vld [vmem:[#allocation3 + $0x172] sm:$0xff] }
 0x25b   : > { %8328 = vmatpush3.msra.mxu1 %v6340_v60  ;;  %8403 = vmatprep.subr.mxu0 %v6358_v44  ;;  %v6345_v60 = vld [vmem:[%s12072_s2 + $0x280] sm:$0xff] }
 0x25c   : > { %8278 = vmatmul.mubr.f32.gmra.mxu0 %v10695_v19  ;;  %8329 = vmatprep.subr.mxu1 %v6339_v21  ;;  %v6338_v19 = vld [vmem:[%s12072_s2 + $0x248] sm:$0xff] }
 0x25d   : > { %8204 = vmatmul.mubr.f32.gmra.mxu1 %v10938_v37  ;;  %8280 = vmatprep.mubr.f32.mxu0 %v10714_v20  ;;  %v6356_v20 = vld [vmem:[%s12072_s2 + $0x2d8] sm:$0xff] }
 0x25e   : > { %8206 = vmatprep.mubr.f32.mxu1 %v10945_v58  ;;  %8404 = vmatpush3.msra.mxu0 %v6358_v44  ;;  %v11112_v44 = vld [vmem:[#allocation3 + $0x180] sm:$0xff] }
 0x25f   : > { %8330 = vmatpush3.msra.mxu1 %v6339_v21  ;;  %8405 = vmatprep.subr.mxu0 %v6357_v35  ;;  %v6375_v21 = vld [vmem:[%s12072_s2 + $0x370] sm:$0xff] }
 0x260   : > { %8281 = vmatmul.mubr.f32.gmra.mxu0 %v10716_v10  ;;  %8331 = vmatprep.subr.mxu1 %v6338_v19  ;;  %v6337_v10 = vld [vmem:[%s12072_s2 + $0x240] sm:$0xff] }
 0x261   : > { %8207 = vmatmul.mubr.f32.gmra.mxu1 %v10952_v47  ;;  %8283 = vmatprep.mubr.f32.mxu0 %v10735_v13  ;;  %v6355_v13 = vld [vmem:[%s12072_s2 + $0x2d0] sm:$0xff] }
 0x262   : > { %8209 = vmatprep.mubr.f32.mxu1 %v10959_v51  ;;  %8406 = vmatpush3.msra.mxu0 %v6357_v35  ;;  %v11118_v35 = vld [vmem:[#allocation3 + $0x31] sm:$0xff] }
 0x263   : > { %8332 = vmatpush3.msra.mxu1 %v6338_v19  ;;  %8407 = vmatprep.subr.mxu0 %v6356_v20  ;;  %v11121_v19 = vld [vmem:[#allocation3 + $0x188] sm:$0xff] }
 0x264   : > { %8284 = vmatmul.mubr.f32.gmra.mxu0 %v10737_v61  ;;  %8333 = vmatprep.subr.mxu1 %v6337_v10  ;;  %v6336_v61 = vld [vmem:[%s12072_s2 + $0x238] sm:$0xff] }
 0x265   : > { %8210 = vmatmul.mubr.f32.gmra.mxu1 %v10966_v32  ;;  %8286 = vmatprep.mubr.f32.mxu0 %v10756_v33  ;;  %v6354_v33 = vld [vmem:[%s12072_s2 + $0x2c8] sm:$0xff] }
 0x266   : > { %8212 = vmatprep.mubr.f32.mxu1 %v10973_v5  ;;  %8408 = vmatpush3.msra.mxu0 %v6356_v20  ;;  %v11129_v20 = vld [vmem:[#allocation3 + $0x39] sm:$0xff] }
 0x267   : > { %8334 = vmatpush3.msra.mxu1 %v6337_v10  ;;  %8409 = vmatprep.subr.mxu0 %v6355_v13  ;;  %v6373_v10 = vld [vmem:[%s12072_s2 + $0x360] sm:$0xff] }
 0x268   : > { %8287 = vmatmul.mubr.f32.gmra.mxu0 %v10758_v0  ;;  %8335 = vmatprep.subr.mxu1 %v6336_v61  ;;  %v6335_v0 = vld [vmem:[%s12072_s2 + $0x230] sm:$0xff] }
 0x269   : > { %8213 = vmatmul.mubr.f32.gmra.mxu1 %v10980_v3  ;;  %8289 = vmatprep.mubr.f32.mxu0 %v10777_v53  ;;  %v6353_v53 = vld [vmem:[%s12072_s2 + $0x2c0] sm:$0xff] }
 0x26a   : > { %8215 = vmatprep.mubr.f32.mxu1 %v10987_v17  ;;  %8410 = vmatpush3.msra.mxu0 %v6355_v13  ;;  %v11135_v13 = vld [vmem:[#allocation3 + $0x49] sm:$0xff] }
 0x26b   : > { %8336 = vmatpush3.msra.mxu1 %v6336_v61  ;;  %8411 = vmatprep.subr.mxu0 %v6354_v33  ;;  %v6372_v61 = vld [vmem:[%s12072_s2 + $0x358] sm:$0xff] }
 0x26c   : > { %8290 = vmatmul.mubr.f32.gmra.mxu0 %v10779_v45  ;;  %8337 = vmatprep.subr.mxu1 %v6335_v0  ;;  %v6334_v45 = vld [vmem:[%s12072_s2 + $0x228] sm:$0xff] }
 0x26d   : > { %8216 = vmatmul.mubr.f32.gmra.mxu1 %v10994_v4  ;;  %8292 = vmatprep.mubr.f32.mxu0 %v10796_v28  ;;  %v6352_v28 = vld [vmem:[%s12072_s2 + $0x2b8] sm:$0xff] }
 0x26e   : > { %8218 = vmatprep.mubr.f32.mxu1 %v11001_v24  ;;  %8412 = vmatpush3.msra.mxu0 %v6354_v33  ;;  %v6371_v33 = vld [vmem:[%s12072_s2 + $0x350] sm:$0xff] }
 0x26f   : > { %8338 = vmatpush3.msra.mxu1 %v6335_v0  ;;  %8413 = vmatprep.subr.mxu0 %v6353_v53  ;;  %v11149_v0 = vld [vmem:[#allocation3 + $0x61] sm:$0xff] }
 0x270   : > { %8293 = vmatmul.mubr.f32.gmra.mxu0 %v10798_v23  ;;  %8339 = vmatprep.subr.mxu1 %v6334_v45  ;;  %v6333_v23 = vld [vmem:[%s12072_s2 + $0x220] sm:$0xff] }
 0x271   : > { %8219 = vmatmul.mubr.f32.gmra.mxu1 %v11008_v41  ;;  %8295 = vmatprep.mubr.f32.mxu0 %v10815_v43  ;;  %v6351_v43 = vld [vmem:[%s12072_s2 + $0x2b0] sm:$0xff] }
 0x272   : > { %8221 = vmatprep.mubr.f32.mxu1 %v11015_v42  ;;  %8414 = vmatpush3.msra.mxu0 %v6353_v53  ;;  %v6369_v53 = vld [vmem:[%s12072_s2 + $0x340] sm:$0xff] }
 0x273   : > { %8340 = vmatpush3.msra.mxu1 %v6334_v45  ;;  %8415 = vmatprep.subr.mxu0 %v6352_v28  ;;  %v11163_v45 = vld [vmem:[#allocation3 + $0x79] sm:$0xff] }
 0x274   : > { %8296 = vmatmul.mubr.f32.gmra.mxu0 %v10817_v11  ;;  %8341 = vmatprep.subr.mxu1 %v6333_v23  ;;  %v6332_v11 = vld [vmem:[%s12072_s2 + $0x218] sm:$0xff] }
 0x275   : > { %8222 = vmatmul.mubr.f32.gmra.mxu1 %v11022_v38  ;;  %8298 = vmatprep.mubr.f32.mxu0 %v10831_v50  ;;  %v6350_v50 = vld [vmem:[%s12072_s2 + $0x2a8] sm:$0xff] }
 0x276   : > { %8224 = vmatprep.mubr.f32.mxu1 %v11029_v16  ;;  %8416 = vmatpush3.msra.mxu0 %v6352_v28  ;;  %v6367_v28 = vld [vmem:[%s12072_s2 + $0x330] sm:$0xff] }
 0x277   : > { %8342 = vmatpush3.msra.mxu1 %v6333_v23  ;;  %8417 = vmatprep.subr.mxu0 %v6351_v43  ;;  %v11177_v23 = vld [vmem:[#allocation3 + $0x91] sm:$0xff] }
 0x278   : > { %8299 = vmatmul.mubr.f32.gmra.mxu0 %v10833_v30  ;;  %8343 = vmatprep.subr.mxu1 %v6332_v11  ;;  %v6331_v30 = vld [vmem:[%s12072_s2 + $0x210] sm:$0xff] }
 0x279   : > { %8225 = vmatmul.mubr.f32.gmra.mxu1 %v11036_v57  ;;  %8301 = vmatprep.mubr.f32.mxu0 %v10842_v14  ;;  %v6349_v14 = vld [vmem:[%s12072_s2 + $0x2a0] sm:$0xff] }
 0x27a   : > { %8227 = vmatprep.mubr.f32.mxu1 %v11043_v15  ;;  %8418 = vmatpush3.msra.mxu0 %v6351_v43  ;;  %v6390_v43 = vld [vmem:[%s12072_s2 + $0x3e8] sm:$0xff] }
 0x27b   : > { %8344 = vmatpush3.msra.mxu1 %v6332_v11  ;;  %8419 = vmatprep.subr.mxu0 %v6350_v50  ;;  %v11192_v11 = vld [vmem:[#allocation3 + $0xa9] sm:$0xff] }
 0x27c   : > { %8302 = vmatmul.mubr.f32.gmra.mxu0 %v10844_v7  ;;  %8345 = vmatprep.subr.mxu1 %v6331_v30  ;;  %v6330_v7 = vld [vmem:[%s12072_s2 + $0x208] sm:$0xff] }
 0x27d   : > { %8228 = vmatmul.mubr.f32.gmra.mxu1 %v11050_v55  ;;  %8304 = vmatprep.mubr.f32.mxu0 %v10852_v40  ;;  %v6348_v40 = vld [vmem:[%s12072_s2 + $0x298] sm:$0xff] }
 0x27e   : > { %8230 = vmatprep.mubr.f32.mxu1 %v11057_v27  ;;  %8420 = vmatpush3.msra.mxu0 %v6350_v50  ;;  %v6366_v50 = vld [vmem:[%s12072_s2 + $0x328] sm:$0xff] }
 0x27f   : > { %8346 = vmatpush3.msra.mxu1 %v6331_v30  ;;  %8421 = vmatprep.subr.mxu0 %v6349_v14  ;;  %v11206_v30 = vld [vmem:[#allocation3 + $0xc1] sm:$0xff] }
 0x280   : > { %8305 = vmatmul.mubr.f32.gmra.mxu0 %v10854_v26  ;;  %8347 = vmatprep.subr.mxu1 %v6330_v7  ;;  %v6329_v26 = vld [vmem:[%s12072_s2 + $0x200] sm:$0xff] }
 0x281   : > { %8231 = vmatmul.mubr.f32.gmra.mxu1 %v11064_v31  ;;  %8307 = vmatprep.mubr.f32.mxu0 %v10864_v48  ;;  %v6347_v48 = vld [vmem:[%s12072_s2 + $0x290] sm:$0xff] }
 0x282   : > { %8233 = vmatprep.mubr.f32.mxu1 %v11071_v8  ;;  %8422 = vmatpush3.msra.mxu0 %v6349_v14  ;;  %v6365_v14 = vld [vmem:[%s12072_s2 + $0x320] sm:$0xff] }
 0x283   : > { %8423 = vmatprep.subr.mxu0 %v6348_v40  ;;  %8348 = vmatpush3.msra.mxu1 %v6330_v7  ;;  %v11220_v7 = vld [vmem:[#allocation3 + $0xd9] sm:$0xff] }
 0x284   : > { %8308 = vmatmul.mubr.f32.gmra.mxu0 %v10866_v62  ;;  %8349 = vmatprep.subr.mxu1 %v6329_v26  ;;  %v6346_v62 = vld [vmem:[%s12072_s2 + $0x288] sm:$0xff] }
 0x285   : > { %8234 = vmatmul.mubr.f32.gmra.mxu1 %v11078_v59  ;;  %8310 = vmatprep.mubr.f32.mxu0 %v10876_v9  ;;  %v6376_v9 = vld [vmem:[%s12072_s2 + $0x378] sm:$0xff] }
 0x286   : > { %8236 = vmatprep.mubr.f32.mxu1 %v11085_v56  ;;  %8424 = vmatpush3.msra.mxu0 %v6348_v40  ;;  %v6386_v40 = vld [vmem:[%s12072_s2 + $0x3c8] sm:$0xff] }
 0x287   : > { %8425 = vmatprep.subr.mxu0 %v6347_v48  ;;  %8350 = vmatpush3.msra.mxu1 %v6329_v26  ;;  %v11234_v26 = vld [vmem:[#allocation3 + $0xf1] sm:$0xff] }
 0x288   : > { %8311 = vmatmul.mubr.f32.gmra.mxu0 %v10878_v18  ;;  %8479 = vmatprep.subr.mxu1 %v6376_v9  ;;  %v11109_v18 = vld [vmem:[%s12072_s2 + $0x3f8] sm:$0xff] }
 0x289   : > { %8237 = vmatmul.mubr.f32.gmra.mxu1 %v11092_v36  ;;  %8313 = vmatprep.mubr.f32.mxu0 %v10891_v63  ;;  %v4387_v63 = vld [vmem:[#allocation3 + $0x21] sm:$0xff] }
 0x28a   : > { %8426 = vmatpush3.msra.mxu0 %v6347_v48  ;;  %8351 = vmatprep.mubr.f32.mxu1 %v4386_v1  ;;  %v6364_v48 = vld [vmem:[%s12072_s2 + $0x318] sm:$0xff] }
 0x28b   : > { %8427 = vmatprep.subr.mxu0 %v6346_v62  ;;  %v11262_v1 = vld [vmem:[#allocation3 + $0x121] sm:$0xff] }
 0x28c   : > { %8428 = vmatpush3.msra.mxu0 %v6346_v62  ;;  %v11248_v62 = vld [vmem:[#allocation3 + $0x109] sm:$0xff] }
 0x28d   : > { %8314 = vmatmul.mubr.f32.gmra.mxu0 %v10893_v46  ;;  %8429 = vmatprep.subr.mxu0 %v6345_v60  ;;  %v6374_v46 = vld [vmem:[%s12072_s2 + $0x368] sm:$0xff] }
 0x28e   : > { %8316 = vmatprep.mubr.f32.mxu0 %v11112_v44  ;;  %8430 = vmatpush3.msra.mxu0 %v6345_v60  ;;  %v6382_v60 = vld [vmem:[%s12072_s2 + $0x3a8] sm:$0xff] }
 0x28f   : > { %8352 = vmatmul.mubr.f32.vlgmr.msra.gmra.mxu1 %v4387_v63  ;;  %8559 = vmatprep.subr.mxu0 %v11109_v18  ;;  %v6362_v63 = vld [vmem:[%s12072_s2 + $0x308] sm:$0xff] }
 0x290   : > { %8354 = vmatprep.mubr.f32.mxu1 %v11118_v35  ;;  %8480 = vmatpush3.msra.mxu1 %v6376_v9  ;;  %v6363_v9 = vld [vmem:[%s12072_s2 + $0x310] sm:$0xff] }
 0x291   : > { %8317 = vmatmul.mubr.f32.gmra.mxu0 %v11121_v19  ;;  %8481 = vmatprep.subr.mxu1 %v6375_v21 }
 0x292   : > { %8431 = vmatprep.mubr.f32.mxu0 %v10887_v39  ;;  %8482 = vmatpush3.msra.mxu1 %v6375_v21  ;;  %v11143_v39 = vld [vmem:[#allocation3 + $0x51] sm:$0xff] }
 0x293   : > { %8355 = vmatmul.mubr.f32.gmra.mxu1 %v11129_v20  ;;  %8483 = vmatprep.subr.mxu1 %v6374_v46  ;;  %v11290_v21 = vld [vmem:[#allocation3 + $0x151] sm:$0xff] }
 0x294   : > { %8357 = vmatprep.mubr.f32.mxu1 %v11135_v13  ;;  %8484 = vmatpush3.msra.mxu1 %v6374_v46  ;;  %v6361_v46 = vld [vmem:[%s12072_s2 + $0x300] sm:$0xff] }
 0x295   : > { %8432 = vmatmul.mubr.f32.vlgmr.msra.gmra.mxu0 %v10896_v6  ;;  %8485 = vmatprep.subr.mxu1 %v6373_v10  ;;  %v6370_v6 = vld [vmem:[%s12072_s2 + $0x348] sm:$0xff] }
 0x296   : > { %8434 = vmatprep.mubr.f32.mxu0 %v10905_v49  ;;  %8486 = vmatpush3.msra.mxu1 %v6373_v10  ;;  %v11157_v49 = vld [vmem:[#allocation3 + $0x69] sm:$0xff]  ;;  %v6378_v10 = vld [vmem:[%s12072_s2 + $0x388] sm:$0xff] }
 0x297   : > { %8358 = vmatmul.mubr.f32.gmra.mxu1 %v11143_v39  ;;  %8487 = vmatprep.subr.mxu1 %v6372_v61 }
 0x298   : > { %8360 = vmatprep.mubr.f32.mxu1 %v11149_v0  ;;  %8488 = vmatpush3.msra.mxu1 %v6372_v61  ;;  %v11336_v61 = vpop.f32.mrf.mxu1 }
 0x299   : > { %8435 = vmatmul.mubr.f32.gmra.mxu0 %v10909_v22  ;;  %8489 = vmatprep.subr.mxu1 %v6371_v33  ;;  %v6368_v22 = vld [vmem:[%s12072_s2 + $0x338] sm:$0xff] }
 0x29a   : > { %8437 = vmatprep.mubr.f32.mxu0 %v10916_v34  ;;  %8490 = vmatpush3.msra.mxu1 %v6371_v33  ;;  %v11171_v34 = vld [vmem:[#allocation3 + $0x81] sm:$0xff] }
 0x29b   : > { %8361 = vmatmul.mubr.f32.gmra.mxu1 %v11157_v49  ;;  %8491 = vmatprep.subr.mxu1 %v6370_v6  ;;  %v5001_v33 = vld [vmem:[#allocation3 + $0x48] sm:$0xff] }
 0x29c   : > { %8363 = vmatprep.mubr.f32.mxu1 %v11163_v45  ;;  %8492 = vmatpush3.msra.mxu1 %v6370_v6  ;;  %v11338_v6 = vld [vmem:[#allocation3 + $0x18a] sm:$0xff] }
 0x29d   : > { %8438 = vmatmul.mubr.f32.gmra.mxu0 %v10924_v25  ;;  %8493 = vmatprep.subr.mxu1 %v6369_v53  ;;  %v6391_v25 = vld [vmem:[%s12072_s2 + $0x3f0] sm:$0xff] }
 0x29e   : > { %8440 = vmatprep.mubr.f32.mxu0 %v10931_v29  ;;  %8494 = vmatpush3.msra.mxu1 %v6369_v53  ;;  %v11185_v29 = vld [vmem:[#allocation3 + $0x99] sm:$0xff] }
 0x29f   : > { %8364 = vmatmul.mubr.f32.gmra.mxu1 %v11171_v34  ;;  %8495 = vmatprep.subr.mxu1 %v6368_v22 }
 0x2a0   : > { %8366 = vmatprep.mubr.f32.mxu1 %v11177_v23  ;;  %8496 = vmatpush3.msra.mxu1 %v6368_v22  ;;  %v5002_v22 = vld [vmem:[#allocation3 + $0x50] sm:$0xff] }
 0x2a1   : > { %8441 = vmatmul.mubr.f32.gmra.mxu0 %v10938_v37  ;;  %8497 = vmatprep.subr.mxu1 %v6367_v28  ;;  %v6389_v37 = vld [vmem:[%s12072_s2 + $0x3e0] sm:$0xff] }
 0x2a2   : > { %8443 = vmatprep.mubr.f32.mxu0 %v10945_v58  ;;  %8560 = vmatpush3.msra.mxu0 %v11109_v18  ;;  %v11200_v58 = vld [vmem:[#allocation3 + $0xb1] sm:$0xff]  ;;  %v11276_v18 = vld [vmem:[#allocation3 + $0x139] sm:$0xff] }
 0x2a3   : > { %8367 = vmatmul.mubr.f32.gmra.mxu1 %v11185_v29  ;;  %8561 = vmatprep.subr.mxu0 %v6391_v25 }
 0x2a4   : > { %8369 = vmatprep.mubr.f32.mxu1 %v11192_v11  ;;  %8562 = vmatpush3.msra.mxu0 %v6391_v25  ;;  %v5003_v25 = vld [vmem:[#allocation3 + $0x60] sm:$0xff] }
 0x2a5   : > { %8444 = vmatmul.mubr.f32.gmra.mxu0 %v10952_v47  ;;  %8563 = vmatprep.subr.mxu0 %v6390_v43  ;;  %v6388_v47 = vld [vmem:[%s12072_s2 + $0x3d8] sm:$0xff] }
 0x2a6   : > { %8446 = vmatprep.mubr.f32.mxu0 %v10959_v51  ;;  %8498 = vmatpush3.msra.mxu1 %v6367_v28  ;;  %v11214_v51 = vld [vmem:[#allocation3 + $0xc9] sm:$0xff] }
 0x2a7   : > { %8370 = vmatmul.mubr.f32.gmra.mxu1 %v11200_v58  ;;  %8564 = vmatpush3.msra.mxu0 %v6390_v43  ;;  %v6405_v28 = vld [vmem:[%s12072_s2 + $0x460] sm:$0xff] }
 0x2a8   : > { %8372 = vmatprep.mubr.f32.mxu1 %v11206_v30  ;;  %8565 = vmatprep.subr.mxu0 %v6389_v37 }
 0x2a9   : > { %8447 = vmatmul.mubr.f32.gmra.mxu0 %v10966_v32  ;;  %8499 = vmatprep.subr.mxu1 %v6366_v50  ;;  %v6387_v32 = vld [vmem:[%s12072_s2 + $0x3d0] sm:$0xff] }
 0x2aa   : > { %8449 = vmatprep.mubr.f32.mxu0 %v10973_v5  ;;  %8566 = vmatpush3.msra.mxu0 %v6389_v37  ;;  %v11228_v5 = vld [vmem:[#allocation3 + $0xe1] sm:$0xff] }
 0x2ab   : > { %8373 = vmatmul.mubr.f32.gmra.mxu1 %v11214_v51  ;;  %8567 = vmatprep.subr.mxu0 %v6388_v47  ;;  %v6404_v37 = vld [vmem:[%s12072_s2 + $0x458] sm:$0xff] }
 0x2ac   : > { %8375 = vmatprep.mubr.f32.mxu1 %v11220_v7  ;;  %8500 = vmatpush3.msra.mxu1 %v6366_v50 }
 0x2ad   : > { %8450 = vmatmul.mubr.f32.gmra.mxu0 %v10980_v3  ;;  %8501 = vmatprep.subr.mxu1 %v6365_v14  ;;  %v6385_v3 = vld [vmem:[%s12072_s2 + $0x3c0] sm:$0xff] }
 0x2ae   : > { %8452 = vmatprep.mubr.f32.mxu0 %v10987_v17  ;;  %8568 = vmatpush3.msra.mxu0 %v6388_v47  ;;  %v11242_v17 = vld [vmem:[#allocation3 + $0xf9] sm:$0xff] }
 0x2af   : > { %8376 = vmatmul.mubr.f32.gmra.mxu1 %v11228_v5  ;;  %8569 = vmatprep.subr.mxu0 %v6387_v32  ;;  %v6403_v47 = vld [vmem:[%s12072_s2 + $0x450] sm:$0xff] }
 0x2b0   : > { %8378 = vmatprep.mubr.f32.mxu1 %v11234_v26  ;;  %8570 = vmatpush3.msra.mxu0 %v6387_v32  ;;  %v5005_v32 = vld [vmem:[#allocation3 + $0x78] sm:$0xff] }
 0x2b1   : > { %8453 = vmatmul.mubr.f32.gmra.mxu0 %v10994_v4  ;;  %8571 = vmatprep.subr.mxu0 %v6386_v40  ;;  %v6384_v4 = vld [vmem:[%s12072_s2 + $0x3b8] sm:$0xff] }
 0x2b2   : > { %8455 = vmatprep.mubr.f32.mxu0 %v11001_v24  ;;  %8502 = vmatpush3.msra.mxu1 %v6365_v14  ;;  %v11256_v24 = vld [vmem:[#allocation3 + $0x111] sm:$0xff]  ;;  %v11356_v14 = vpop.f32.mrf.mxu0 }
 0x2b3   : > { %8379 = vmatmul.mubr.f32.gmra.mxu1 %v11242_v17  ;;  %8572 = vmatpush3.msra.mxu0 %v6386_v40 }
 0x2b4   : > { %8381 = vmatprep.mubr.f32.mxu1 %v11248_v62  ;;  %8573 = vmatprep.subr.mxu0 %v6385_v3 }
 0x2b5   : > { %8456 = vmatmul.mubr.f32.gmra.mxu0 %v11008_v41  ;;  %8503 = vmatprep.subr.mxu1 %v6364_v48  ;;  %v6383_v41 = vld [vmem:[%s12072_s2 + $0x3b0] sm:$0xff] }
 0x2b6   : > { %8458 = vmatprep.mubr.f32.mxu0 %v11015_v42  ;;  %8574 = vmatpush3.msra.mxu0 %v6385_v3  ;;  %v11270_v42 = vld [vmem:[#allocation3 + $0x129] sm:$0xff] }
 0x2b7   : > { %8382 = vmatmul.mubr.f32.gmra.mxu1 %v11256_v24  ;;  %8575 = vmatprep.subr.mxu0 %v6384_v4 }
 0x2b8   : > { %8384 = vmatprep.mubr.f32.mxu1 %v11262_v1  ;;  %8504 = vmatpush3.msra.mxu1 %v6364_v48 }
 0x2b9   : > { %8459 = vmatmul.mubr.f32.gmra.mxu0 %v11022_v38  ;;  %8505 = vmatprep.subr.mxu1 %v6363_v9  ;;  %v6381_v38 = vld [vmem:[%s12072_s2 + $0x3a0] sm:$0xff] }
 0x2ba   : > { %8461 = vmatprep.mubr.f32.mxu0 %v11029_v16  ;;  %8576 = vmatpush3.msra.mxu0 %v6384_v4  ;;  %v11284_v16 = vld [vmem:[#allocation3 + $0x141] sm:$0xff] }
 0x2bb   : > { %8385 = vmatmul.mubr.f32.gmra.mxu1 %v11270_v42  ;;  %8577 = vmatprep.subr.mxu0 %v6383_v41  ;;  %v5006_v4 = vld [vmem:[#allocation3 + $0x80] sm:$0xff] }
 0x2bc   : > { %8387 = vmatprep.mubr.f32.mxu1 %v11276_v18  ;;  %8578 = vmatpush3.msra.mxu0 %v6383_v41 }
 0x2bd   : > { %8462 = vmatmul.mubr.f32.gmra.mxu0 %v11036_v57  ;;  %8579 = vmatprep.subr.mxu0 %v6382_v60  ;;  %v6380_v57 = vld [vmem:[%s12072_s2 + $0x398] sm:$0xff] }
 0x2be   : > { %8464 = vmatprep.mubr.f32.mxu0 %v11043_v15  ;;  %8506 = vmatpush3.msra.mxu1 %v6363_v9  ;;  %v11298_v15 = vld [vmem:[#allocation3 + $0x159] sm:$0xff]  ;;  %v6401_v9 = vld [vmem:[%s12072_s2 + $0x440] sm:$0xff] }
 0x2bf   : > { %8388 = vmatmul.mubr.f32.gmra.mxu1 %v11284_v16  ;;  %8580 = vmatpush3.msra.mxu0 %v6382_v60  ;;  %v5007_v60 = vld [vmem:[#allocation3 + $0x90] sm:$0xff] }
 0x2c0   : > { %8390 = vmatprep.mubr.f32.mxu1 %v11290_v21  ;;  %8581 = vmatprep.subr.mxu0 %v6381_v38 }
 0x2c1   : > { %8465 = vmatmul.mubr.f32.gmra.mxu0 %v11050_v55  ;;  %8507 = vmatprep.subr.mxu1 %v6362_v63  ;;  %v6379_v55 = vld [vmem:[%s12072_s2 + $0x390] sm:$0xff] }
 0x2c2   : > { %8467 = vmatprep.mubr.f32.mxu0 %v11057_v27  ;;  %8582 = vmatpush3.msra.mxu0 %v6381_v38  ;;  %v11310_v27 = vld [vmem:[#allocation3 + $0x171] sm:$0xff] }
 0x2c3   : > { %8391 = vmatmul.mubr.f32.gmra.mxu1 %v11298_v15  ;;  %8583 = vmatprep.subr.mxu0 %v6380_v57 }
 0x2c4   : > { %8393 = vmatprep.mubr.f32.mxu1 %v10860_v2  ;;  %8508 = vmatpush3.msra.mxu1 %v6362_v63  ;;  %v6377_v2 = vld [vmem:[%s12072_s2 + $0x380] sm:$0xff] }
 0x2c5   : > { %8468 = vmatmul.mubr.f32.gmra.mxu0 %v11064_v31  ;;  %8509 = vmatprep.subr.mxu1 %v6361_v46  ;;  %v11323_v31 = vld [vmem:[#allocation3 + $0x189] sm:$0xff] }
 0x2c6   : > { %8470 = vmatprep.mubr.f32.mxu0 %v11071_v8  ;;  %8584 = vmatpush3.msra.mxu0 %v6380_v57  ;;  %v6408_v8 = vld [vmem:[%s12072_s2 + $0x478] sm:$0xff] }
 0x2c7   : > { %8394 = vmatmul.mubr.f32.gmra.mxu1 %v11310_v27  ;;  %8585 = vmatprep.subr.mxu0 %v6379_v55 }
 0x2c8   : > { %8396 = vmatprep.mubr.f32.mxu1 %v3192_v52  ;;  %8586 = vmatpush3.msra.mxu0 %v6379_v55  ;;  %v11330_v52 = vld [vmem:[#allocation3 + $0x182] sm:$0xff]  ;;  %v5008_v55 = vld [vmem:[#allocation3 + $0x98] sm:$0xff] }
 0x2c9   : > { %8471 = vmatmul.mubr.f32.gmra.mxu0 %v11078_v59  ;;  %8587 = vmatprep.subr.mxu0 %v6378_v10  ;;  %v5000_v59 = vld [vmem:[#allocation3 + $0x38] sm:$0xff] }
 0x2ca   : > { %8473 = vmatprep.mubr.f32.mxu0 %v11085_v56  ;;  %8510 = vmatpush3.msra.mxu1 %v6361_v46  ;;  %v6407_v56 = vld [vmem:[%s12072_s2 + $0x470] sm:$0xff] }
 0x2cb   : > { %8397 = vmatmul.mubr.f32.gmra.mxu1 %v11323_v31  ;;  %8588 = vmatpush3.msra.mxu0 %v6378_v10  ;;  %v6399_v10 = vld [vmem:[%s12072_s2 + $0x430] sm:$0xff] }
 0x2cc   : > { %8511 = vmatprep.mubr.f32.mxu1 %v4999_v12  ;;  %8589 = vmatprep.subr.mxu0 %v6377_v2 }
 0x2cd   : > { %8474 = vmatmul.mubr.f32.gmra.mxu0 %v11092_v36  ;;  %8639 = vmatprep.subr.mxu1 %v6408_v8  ;;  %v6406_v36 = vld [vmem:[%s12072_s2 + $0x468] sm:$0xff] }
 0x2ce   : > { %8476 = vmatprep.mubr.f32.mxu0 %v11330_v52  ;;  %8590 = vmatpush3.msra.mxu0 %v6377_v2 }
 0x2cf   : > { %8512 = vmatmul.mubr.f32.vlgmr.msra.gmra.mxu1 %v5000_v59 }
 0x2d0   : > { %8514 = vmatprep.mubr.f32.mxu1 %v5001_v33  ;;  %8640 = vmatpush3.msra.mxu1 %v6408_v8  ;;  %v8036_v53 = vpop.f32.mrf.mxu1  ;;  %v5009_v8 = vld [vmem:[#allocation3 + $0xa8] sm:$0xff] }
 0x2d1   : > { %8477 = vmatmul.mubr.f32.gmra.mxu0 %v11338_v6  ;;  %8641 = vmatprep.subr.mxu1 %v6407_v56 }
 0x2d2   : > { %8591 = vmatprep.mubr.f32.mxu0 %v11118_v35  ;;  %8642 = vmatpush3.msra.mxu1 %v6407_v56  ;;  %v3400_v43 = vpop.f32.mrf.mxu1  ;;  %v5004_v35 = vld [vmem:[#allocation3 + $0x68] sm:$0xff] }
 0x2d3   : > { %8515 = vmatmul.mubr.f32.gmra.mxu1 %v5002_v22  ;;  %8643 = vmatprep.subr.mxu1 %v6406_v36 }
 0x2d4   : > { %8517 = vmatprep.mubr.f32.mxu1 %v5003_v25  ;;  %8644 = vmatpush3.msra.mxu1 %v6406_v36  ;;  %v8039_v50 = vpop.f32.mrf.mxu1  ;;  %v5010_v36 = vld [vmem:[#allocation3 + $0xb0] sm:$0xff] }
 0x2d5   : > { %8592 = vmatmul.mubr.f32.vlgmr.msra.gmra.mxu0 %v11129_v20  ;;  %8645 = vmatprep.subr.mxu1 %v6405_v28  ;;  %v6402_v20 = vld [vmem:[%s12072_s2 + $0x448] sm:$0xff] }
 0x2d6   : > { %8594 = vmatprep.mubr.f32.mxu0 %v11135_v13  ;;  %8646 = vmatpush3.msra.mxu1 %v6405_v28  ;;  %v3410_v40 = vpop.f32.mrf.mxu1  ;;  %v5011_v28 = vld [vmem:[#allocation3 + $0xc0] sm:$0xff] }
 0x2d7   : > { %8518 = vmatmul.mubr.f32.gmra.mxu1 %v5004_v35  ;;  %8647 = vmatprep.subr.mxu1 %v6404_v37  ;;  %v5012_v35 = vld [vmem:[#allocation3 + $0xc8] sm:$0xff] }
 0x2d8   : > { %8520 = vmatprep.mubr.f32.mxu1 %v5005_v32  ;;  %8648 = vmatpush3.msra.mxu1 %v6404_v37  ;;  %v8116_v3 = vpop.f32.mrf.mxu0 }
 0x2d9   : > { %8595 = vmatmul.mubr.f32.gmra.mxu0 %v11143_v39  ;;  %v8042_v13 = vpop.f32.mrf.mxu1  ;;  %8649 = vmatprep.subr.mxu1 %v6403_v47  ;;  %v11362_v48 = vadd.f32 %v8116_v3, %v8036_v53  ;;  %v6400_v39 = vld [vmem:[%s12072_s2 + $0x438] sm:$0xff]  ;;  %v6397_v53 = vld [vmem:[%s12072_s2 + $0x420] sm:$0xff] }
 0x2da   : > { %8597 = vmatprep.mubr.f32.mxu0 %v11149_v0  ;;  %8650 = vmatpush3.msra.mxu1 %v6403_v47  ;;  %v3625_v41 = vpop.f32.mrf.mxu0  ;;  %v6395_v47 = vld [vmem:[%s12072_s2 + $0x410] sm:$0xff] }
 0x2db   : > { %8521 = vmatmul.mubr.f32.gmra.mxu1 %v5006_v4  ;;  %v3420_v38 = vpop.f32.mrf.mxu1  ;;  %8651 = vmatprep.subr.mxu1 %v6402_v20  ;;  %v11368_v63 = vadd.f32 %v3625_v41, %v3400_v43  ;;  %v6393_v41 = vld [vmem:[%s12072_s2 + $0x400] sm:$0xff] }
 0x2dc   : > { %8523 = vmatprep.mubr.f32.mxu1 %v5007_v60  ;;  %8652 = vmatpush3.msra.mxu1 %v6402_v20  ;;  %v8119_v0 = vpop.f32.mrf.mxu0 }
 0x2dd   : > { %8598 = vmatmul.mubr.f32.gmra.mxu0 %v11157_v49  ;;  %v8045_v57 = vpop.f32.mrf.mxu1  ;;  %8653 = vmatprep.subr.mxu1 %v6401_v9  ;;  %v11374_v46 = vadd.f32 %v8119_v0, %v8039_v50  ;;  %v6398_v49 = vld [vmem:[%s12072_s2 + $0x428] sm:$0xff] }
 0x2de   : > { %8600 = vmatprep.mubr.f32.mxu0 %v11163_v45  ;;  %8654 = vmatpush3.msra.mxu1 %v6401_v9  ;;  %v3635_v2 = vpop.f32.mrf.mxu0  ;;  %v5014_v9 = vld [vmem:[#allocation3 + $0xe0] sm:$0xff] }
 0x2df   : > { %8524 = vmatmul.mubr.f32.gmra.mxu1 %v5008_v55  ;;  %v3430_v12 = vpop.f32.mrf.mxu1  ;;  %8655 = vmatprep.subr.mxu1 %v6400_v39  ;;  %v11380_v59 = vadd.f32 %v3635_v2, %v3410_v40  ;;  %v5013_v40 = vld [vmem:[#allocation3 + $0xd8] sm:$0xff]  ;;  %v5017_v2 = vld [vmem:[#allocation3 + $0x108] sm:$0xff] }
 0x2e0   : > { %8526 = vmatprep.mubr.f32.mxu1 %v5009_v8  ;;  %8656 = vmatpush3.msra.mxu1 %v6400_v39  ;;  %v8122_v45 = vpop.f32.mrf.mxu0  ;;  %v5016_v55 = vld [vmem:[#allocation3 + $0xf8] sm:$0xff] }
 0x2e1   : > { %8601 = vmatmul.mubr.f32.gmra.mxu0 %v11171_v34  ;;  %v8048_v56 = vpop.f32.mrf.mxu1  ;;  %8657 = vmatprep.subr.mxu1 %v6399_v10  ;;  %v11386_v33 = vadd.f32 %v8122_v45, %v8042_v13  ;;  %v6396_v34 = vld [vmem:[%s12072_s2 + $0x418] sm:$0xff] }
 0x2e2   : > { %8603 = vmatprep.mubr.f32.mxu0 %v11177_v23  ;;  %8658 = vmatpush3.msra.mxu1 %v6399_v10  ;;  %v3645_v22 = vpop.f32.mrf.mxu0 }
 0x2e3   : > { %8527 = vmatmul.mubr.f32.gmra.mxu1 %v5010_v36  ;;  %v3440_v25 = vpop.f32.mrf.mxu1  ;;  %8659 = vmatprep.subr.mxu1 %v6398_v49  ;;  %v11392_v43 = vadd.f32 %v3645_v22, %v3420_v38  ;;  %v5015_v38 = vld [vmem:[#allocation3 + $0xf0] sm:$0xff] }
 0x2e4   : > { %8529 = vmatprep.mubr.f32.mxu1 %v5011_v28  ;;  %8660 = vmatpush3.msra.mxu1 %v6398_v49  ;;  %v8125_v23 = vpop.f32.mrf.mxu0 }
 0x2e5   : > { %8604 = vmatmul.mubr.f32.gmra.mxu0 %v11185_v29  ;;  %v8051_v37 = vpop.f32.mrf.mxu1  ;;  %8661 = vmatprep.subr.mxu1 %v6397_v53  ;;  %v11398_v50 = vadd.f32 %v8125_v23, %v8045_v57  ;;  %v6394_v29 = vld [vmem:[%s12072_s2 + $0x408] sm:$0xff] }
 0x2e6   : > { %8606 = vmatprep.mubr.f32.mxu0 %v11192_v11  ;;  %8662 = vmatpush3.msra.mxu1 %v6397_v53  ;;  %v3655_v32 = vpop.f32.mrf.mxu0 }
 0x2e7   : > { %8530 = vmatmul.mubr.f32.gmra.mxu1 %v5012_v35  ;;  %v3450_v20 = vpop.f32.mrf.mxu1  ;;  %8663 = vmatprep.subr.mxu1 %v6396_v34  ;;  %v11404_v3 = vadd.f32 %v3655_v32, %v3430_v12 }
 0x2e8   : > { %8532 = vmatprep.mubr.f32.mxu1 %v5013_v40  ;;  %8664 = vmatpush3.msra.mxu1 %v6396_v34  ;;  %v8128_v11 = vpop.f32.mrf.mxu0 }
 0x2e9   : > { %8607 = vmatmul.mubr.f32.gmra.mxu0 %v11200_v58  ;;  %v8054_v13 = vpop.f32.mrf.mxu1  ;;  %8665 = vmatprep.subr.mxu1 %v6395_v47  ;;  %v11410_v4 = vadd.f32 %v8128_v11, %v8048_v56  ;;  %v5018_v56 = vld [vmem:[#allocation3 + $0x110] sm:$0xff] }
 0x2ea   : > { %8609 = vmatprep.mubr.f32.mxu0 %v11206_v30  ;;  %8666 = vmatpush3.msra.mxu1 %v6395_v47  ;;  %v3665_v60 = vpop.f32.mrf.mxu0 }
 0x2eb   : > { %8533 = vmatmul.mubr.f32.gmra.mxu1 %v5014_v9  ;;  %v3460_v39 = vpop.f32.mrf.mxu1  ;;  %8667 = vmatprep.subr.mxu1 %v6394_v29  ;;  %v11416_v0 = vadd.f32 %v3665_v60, %v3440_v25 }
 0x2ec   : > { %8535 = vmatprep.mubr.f32.mxu1 %v5015_v38  ;;  %8668 = vmatpush3.msra.mxu1 %v6394_v29  ;;  %v8131_v58 = vpop.f32.mrf.mxu0 }
 0x2ed   : > { %8610 = vmatmul.mubr.f32.gmra.mxu0 %v11214_v51  ;;  %v8057_v57 = vpop.f32.mrf.mxu1  ;;  %8669 = vmatprep.subr.mxu1 %v6393_v41  ;;  %v11419_v30 = vadd.f32 %v8131_v58, %v8051_v37 }
 0x2ee   : > { %8612 = vmatprep.mubr.f32.mxu0 %v11220_v7  ;;  %8670 = vmatpush3.msra.mxu1 %v6393_v41  ;;  %v3675_v10 = vpop.f32.mrf.mxu0  ;;  %v5019_v7 = vld [vmem:[#allocation3 + $0x120] sm:$0xff] }
 0x2ef   : > { %8536 = vmatmul.mubr.f32.gmra.mxu1 %v5016_v55  ;;  %v3470_v8 = vpop.f32.mrf.mxu1  ;;  %v11422_v12 = vadd.f32 %v3675_v10, %v3450_v20 }
 0x2f0   : > { %8538 = vmatprep.mubr.f32.mxu1 %v5017_v2  ;;  %v8134_v49 = vpop.f32.mrf.mxu0 }
 0x2f1   : > { %8613 = vmatmul.mubr.f32.gmra.mxu0 %v11228_v5  ;;  %v8060_v45 = vpop.f32.mrf.mxu1  ;;  %v11425_v51 = vadd.f32 %v8134_v49, %v8054_v13  ;;  %v5020_v5 = vld [vmem:[#allocation3 + $0x128] sm:$0xff] }
 0x2f2   : > { %8615 = vmatprep.mubr.f32.mxu0 %v11234_v26  ;;  %v3685_v36 = vpop.f32.mrf.mxu0  ;;  %v5021_v26 = vld [vmem:[#allocation3 + $0x138] sm:$0xff]  ;;  %v5331_v49 = vld [vmem:[#allocation3 + $0x169] sm:$0xff] }
 0x2f3   : > { %8539 = vmatmul.mubr.f32.gmra.mxu1 %v5018_v56  ;;  %v3480_v53 = vpop.f32.mrf.mxu1  ;;  %v11428_v22 = vadd.f32 %v3685_v36, %v3460_v39 }
 0x2f4   : > { %8541 = vmatprep.mubr.f32.mxu1 %v5019_v7  ;;  %v8137_v28 = vpop.f32.mrf.mxu0  ;;  %v8752_v7 = vld [vmem:[#allocation2] sm:$0xff] }
 0x2f5   : > { %8616 = vmatmul.mubr.f32.gmra.mxu0 %v11242_v17  ;;  %v8063_v25 = vpop.f32.mrf.mxu1  ;;  %v11431_v34 = vadd.f32 %v8137_v28, %v8057_v57  ;;  %v5022_v17 = vld [vmem:[#allocation3 + $0x140] sm:$0xff] }
 0x2f6   : > { %8618 = vmatprep.mubr.f32.mxu0 %v11248_v62  ;;  %v3695_v23 = vpop.f32.mrf.mxu0  ;;  %v5023_v62 = vld [vmem:[#allocation3 + $0x150] sm:$0xff] }
 0x2f7   : > { %8542 = vmatmul.mubr.f32.gmra.mxu1 %v5020_v5  ;;  %v3490_v37 = vpop.f32.mrf.mxu1  ;;  %v11434_v35 = vadd.f32 %v3695_v23, %v3470_v8  ;;  %v5335_v5 = vld [vmem:[#allocation3 + $0x199] sm:$0xff] }
 0x2f8   : > { %8544 = vmatprep.mubr.f32.mxu1 %v5021_v26  ;;  %v8140_v47 = vpop.f32.mrf.mxu0  ;;  %v5611_v23 = vld [vmem:[#allocation3 + $0x32] sm:$0xff] }
 0x2f9   : > { %8619 = vmatmul.mubr.f32.gmra.mxu0 %v11256_v24  ;;  %v8066_v32 = vpop.f32.mrf.mxu1  ;;  %v11437_v40 = vadd.f32 %v8140_v47, %v8060_v45  ;;  %v5024_v24 = vld [vmem:[#allocation3 + $0x158] sm:$0xff] }
 0x2fa   : > { %8621 = vmatprep.mubr.f32.mxu0 %v11262_v1  ;;  %v3705_v20 = vpop.f32.mrf.mxu0  ;;  %v5025_v1 = vld [vmem:[#allocation3 + $0x168] sm:$0xff] }
 0x2fb   : > { %8545 = vmatmul.mubr.f32.gmra.mxu1 %v5022_v17  ;;  %v3500_v29 = vpop.f32.mrf.mxu1  ;;  %v11440_v11 = vadd.f32 %v3705_v20, %v3480_v53  ;;  %v5612_v20 = vld [vmem:[#allocation3 + $0x3a] sm:$0xff] }
 0x2fc   : > { %8547 = vmatprep.mubr.f32.mxu1 %v5023_v62  ;;  %v8143_v13 = vpop.f32.mrf.mxu0 }
 0x2fd   : > { %8622 = vmatmul.mubr.f32.gmra.mxu0 %v11270_v42  ;;  %v8069_v9 = vpop.f32.mrf.mxu1  ;;  %v11443_v41 = vadd.f32 %v8143_v13, %v8063_v25  ;;  %v5026_v42 = vld [vmem:[#allocation3 + $0x170] sm:$0xff] }
 0x2fe   : > { %8624 = vmatprep.mubr.f32.mxu0 %v11276_v18  ;;  %v3715_v60 = vpop.f32.mrf.mxu0 }
 0x2ff   : > { %8548 = vmatmul.mubr.f32.gmra.mxu1 %v5024_v24  ;;  %v3510_v38 = vpop.f32.mrf.mxu1  ;;  %v11446_v39 = vadd.f32 %v3715_v60, %v3490_v37 }
 0x300   : > { %8550 = vmatprep.mubr.f32.mxu1 %v5025_v1  ;;  %v8146_v58 = vpop.f32.mrf.mxu0 }
 0x301   : > { %8625 = vmatmul.mubr.f32.gmra.mxu0 %v11284_v16  ;;  %v8072_v57 = vpop.f32.mrf.mxu1  ;;  %v11449_v55 = vadd.f32 %v8146_v58, %v8066_v32 }
 0x302   : > { %8627 = vmatprep.mubr.f32.mxu0 %v11290_v21  ;;  %v3725_v10 = vpop.f32.mrf.mxu0 }
 0x303   : > { %8551 = vmatmul.mubr.f32.gmra.mxu1 %v5026_v42  ;;  %v3520_v18 = vpop.f32.mrf.mxu1  ;;  %v11452_v2 = vadd.f32 %v3725_v10, %v3500_v29  ;;  %v5613_v29 = vld [vmem:[#allocation3 + $0x4a] sm:$0xff]  ;;  %v3616_v42 = vadd.f32 %v11356_v14, %v11336_v61 }
 0x304   : > { %8553 = vmatprep.mubr.f32.mxu1 %v11112_v44  ;;  %v8149_v8 = vpop.f32.mrf.mxu0  ;;  %v5333_v44 = vld [vmem:[#allocation3 + $0x181] sm:$0xff] }
 0x305   : > { %8628 = vmatmul.mubr.f32.gmra.mxu0 %v11298_v15  ;;  %v8075_v45 = vpop.f32.mrf.mxu1  ;;  %v11456_v56 = vadd.f32 %v8149_v8, %v8069_v9 }
 0x306   : > { %8630 = vmatprep.mubr.f32.mxu0 %v5331_v49  ;;  %v3735_v16 = vpop.f32.mrf.mxu0 }
 0x307   : > { %8554 = vmatmul.mubr.f32.gmra.mxu1 %v11121_v19  ;;  %v3530_v21 = vpop.f32.mrf.mxu1  ;;  %v11459_v36 = vadd.f32 %v3735_v16, %v3510_v38  ;;  %v5614_v38 = vld [vmem:[#allocation3 + $0x52] sm:$0xff] }
 0x308   : > { %8556 = vmatprep.mubr.f32.mxu1 %v8752_v7  ;;  %v8152_v53 = vpop.f32.mrf.mxu0 }
 0x309   : > { %8631 = vmatmul.mubr.f32.gmra.mxu0 %v11310_v27  ;;  %v8078_v28 = vpop.f32.mrf.mxu1  ;;  %v11462_v25 = vadd.f32 %v8152_v53, %v8072_v57  ;;  %v5336_v27 = vld [vmem:[#allocation3 + $0x1a1] sm:$0xff] }
 0x30a   : > { %8633 = vmatprep.mubr.f32.mxu0 %v5333_v44  ;;  %v3745_v15 = vpop.f32.mrf.mxu0  ;;  %v5615_v57 = vld [vmem:[#allocation3 + $0x62] sm:$0xff]  ;;  %v5617_v53 = vld [vmem:[#allocation3 + $0x7a] sm:$0xff] }
 0x30b   : > { %8557 = vmatmul.mubr.f32.gmra.mxu1 %v8752_v7  ;;  %v3540_v26 = vpop.f32.mrf.mxu1  ;;  %v11464_v37 = vadd.f32 %v3745_v15, %v3520_v18 }
 0x30c   : > { %8671 = vmatprep.mubr.f32.mxu1 %v5611_v23  ;;  %v8155_v19 = vpop.f32.mrf.mxu0  ;;  %v5618_v23 = vld [vmem:[#allocation3 + $0x82] sm:$0xff] }
 0x30d   : > { %8634 = vmatmul.mubr.f32.gmra.mxu0 %v11323_v31  ;;  %v8193_v47 = vpop.f32.mrf.mxu1  ;;  %v11467_v32 = vadd.f32 %v8155_v19, %v8075_v45 }
 0x30e   : > { %8636 = vmatprep.mubr.f32.mxu0 %v5335_v5  ;;  %v4049_v17 = vadd.f32 %v8193_v47, %v10901_v54  ;;  %v3755_v62 = vpop.f32.mrf.mxu0 }
 0x30f   : > { %8672 = vmatmul.mubr.f32.vlgmr.msra.gmra.mxu1 %v5612_v20  ;;  %v3889_v13 = vpop.f32.mrf.mxu1  ;;  %v11470_v9 = vadd.f32 %v3755_v62, %v3530_v21  ;;  %v5616_v21 = vld [vmem:[#allocation3 + $0x6a] sm:$0xff] }
 0x310   : > { %8674 = vmatprep.mubr.f32.mxu1 %v5613_v29  ;;  %v8158_v24 = vpop.f32.mrf.mxu0  ;;  %v4048_v16 = vadd.f32 %v3889_v13, %v3616_v42  ;;  %v5620_v29 = vld [vmem:[#allocation3 + $0x9a] sm:$0xff] }
 0x311   : > { %8637 = vmatmul.mubr.f32.gmra.mxu0 %v5336_v27  ;;  %v8196_v60 = vpop.f32.mrf.mxu1  ;;  %v11472_v1 = vadd.f32 %v8158_v24, %v8078_v28 }
 0x312   : > { %v4051_v31 = vadd.f32 %v8196_v60, %v11362_v48  ;;  %v3765_v58 = vpop.f32.mrf.mxu0 }
 0x313   : > { %8675 = vmatmul.mubr.f32.gmra.mxu1 %v5614_v38  ;;  %v3899_v54 = vpop.f32.mrf.mxu1  ;;  %v11477_v10 = vadd.f32 %v3765_v58, %v3540_v26 }
 0x314   : > { %8677 = vmatprep.mubr.f32.mxu1 %v5615_v57  ;;  %v4050_v18 = vadd.f32 %v3899_v54, %v11368_v63  ;;  %v8273_v8 = vpop.f32.mrf.mxu0  ;;  %v5622_v54 = vld [vmem:[#allocation3 + $0xb2] sm:$0xff] }
 0x315   : > { %v8199_v49 = vpop.f32.mrf.mxu1  ;;  %v11480_v45 = vadd.f32 %v8273_v8, %v4049_v17 }
 0x316   : > { %v4053_v48 = vadd.f32 %v8199_v49, %v11374_v46  ;;  %v4195_v7 = vpop.f32.mrf.mxu0  ;;  %v5619_v46 = vld [vmem:[#allocation3 + $0x92] sm:$0xff] }
 0x317   : > { %8678 = vmatmul.mubr.f32.gmra.mxu1 %v5616_v21  ;;  %v3909_v44 = vpop.f32.mrf.mxu1  ;;  %v11483_v28 = vadd.f32 %v4195_v7, %v4048_v16  ;;  %v5624_v7 = vld [vmem:[#allocation3 + $0xca] sm:$0xff] }
 0x318   : > { %8680 = vmatprep.mubr.f32.mxu1 %v5617_v53  ;;  %v4052_v61 = vadd.f32 %v3909_v44, %v11380_v59  ;;  %v8276_v14 = vpop.f32.mrf.mxu0 }
 0x319   : > { %v8202_v15 = vpop.f32.mrf.mxu1  ;;  %v11486_v63 = vadd.f32 %v8276_v14, %v4051_v31 }
 0x31a   : > { %v4055_v5 = vadd.f32 %v8202_v15, %v11386_v33  ;;  %v4205_v26 = vpop.f32.mrf.mxu0  ;;  %v5621_v33 = vld [vmem:[#allocation3 + $0xaa] sm:$0xff] }
 0x31b   : > { %8681 = vmatmul.mubr.f32.gmra.mxu1 %v5618_v23  ;;  %v3919_v19 = vpop.f32.mrf.mxu1  ;;  %v11489_v47 = vadd.f32 %v4205_v26, %v4050_v18  ;;  %v5626_v26 = vld [vmem:[#allocation3 + $0xe2] sm:$0xff] }
 0x31c   : > { %8683 = vmatprep.mubr.f32.mxu1 %v5619_v46  ;;  %v4054_v27 = vadd.f32 %v3919_v19, %v11392_v43  ;;  %v8279_v17 = vpop.f32.mrf.mxu0 }
 0x31d   : > { %v8205_v20 = vpop.f32.mrf.mxu1  ;;  %v11492_v62 = vadd.f32 %v8279_v17, %v4053_v48 }
 0x31e   : > { %v4057_v59 = vadd.f32 %v8205_v20, %v11398_v50  ;;  %v4215_v13 = vpop.f32.mrf.mxu0  ;;  %v5623_v50 = vld [vmem:[#allocation3 + $0xc2] sm:$0xff] }
 0x31f   : > { %8684 = vmatmul.mubr.f32.gmra.mxu1 %v5620_v29  ;;  %v3929_v24 = vpop.f32.mrf.mxu1  ;;  %v11495_v60 = vadd.f32 %v4215_v13, %v4052_v61  ;;  %v5628_v13 = vld [vmem:[#allocation3 + $0xfa] sm:$0xff] }
 0x320   : > { %8686 = vmatprep.mubr.f32.mxu1 %v5621_v33  ;;  %v4056_v31 = vadd.f32 %v3929_v24, %v11404_v3  ;;  %v8282_v38 = vpop.f32.mrf.mxu0 }
 0x321   : > { %v8208_v58 = vpop.f32.mrf.mxu1  ;;  %v11498_v57 = vadd.f32 %v8282_v38, %v4055_v5 }
 0x322   : > { %v4059_v43 = vadd.f32 %v8208_v58, %v11410_v4  ;;  %v4225_v42 = vpop.f32.mrf.mxu0  ;;  %v5625_v4 = vld [vmem:[#allocation3 + $0xda] sm:$0xff] }
 0x323   : > { %8687 = vmatmul.mubr.f32.gmra.mxu1 %v5622_v54  ;;  %v3939_v18 = vpop.f32.mrf.mxu1  ;;  %v11501_v8 = vadd.f32 %v4225_v42, %v4054_v27  ;;  %v5630_v42 = vld [vmem:[#allocation3 + $0x112] sm:$0xff] }
 0x324   : > { %8689 = vmatprep.mubr.f32.mxu1 %v5623_v50  ;;  %v4058_v49 = vadd.f32 %v3939_v18, %v11416_v0  ;;  %v8285_v16 = vpop.f32.mrf.mxu0 }
 0x325   : > { %v8211_v48 = vpop.f32.mrf.mxu1  ;;  %v11504_v21 = vadd.f32 %v8285_v16, %v4057_v59 }
 0x326   : > { %v4061_v3 = vadd.f32 %v8211_v48, %v11419_v30  ;;  %v4235_v53 = vpop.f32.mrf.mxu0  ;;  %v5627_v30 = vld [vmem:[#allocation3 + $0xf2] sm:$0xff] }
 0x327   : > { %8690 = vmatmul.mubr.f32.gmra.mxu1 %v5624_v7  ;;  %v3949_v44 = vpop.f32.mrf.mxu1  ;;  %v11507_v61 = vadd.f32 %v4235_v53, %v4056_v31  ;;  %v5632_v53 = vld [vmem:[#allocation3 + $0x12a] sm:$0xff] }
 0x328   : > { %8692 = vmatprep.mubr.f32.mxu1 %v5625_v4  ;;  %v4060_v14 = vadd.f32 %v3949_v44, %v11422_v12  ;;  %v8288_v15 = vpop.f32.mrf.mxu0 }
 0x329   : > { %v8214_v5 = vpop.f32.mrf.mxu1  ;;  %v11510_v23 = vadd.f32 %v8288_v15, %v4059_v43 }
 0x32a   : > { %v4063_v0 = vadd.f32 %v8214_v5, %v11425_v51  ;;  %v4245_v46 = vpop.f32.mrf.mxu0  ;;  %v5629_v51 = vld [vmem:[#allocation3 + $0x10a] sm:$0xff] }
 0x32b   : > { %8693 = vmatmul.mubr.f32.gmra.mxu1 %v5626_v26  ;;  %v3959_v19 = vpop.f32.mrf.mxu1  ;;  %v11513_v27 = vadd.f32 %v4245_v46, %v4058_v49  ;;  %v5634_v46 = vld [vmem:[#allocation3 + $0x142] sm:$0xff] }
 0x32c   : > { %8695 = vmatprep.mubr.f32.mxu1 %v5627_v30  ;;  %v4062_v17 = vadd.f32 %v3959_v19, %v11428_v22  ;;  %v8291_v20 = vpop.f32.mrf.mxu0 }
 0x32d   : > { %v8217_v59 = vpop.f32.mrf.mxu1  ;;  %v11516_v29 = vadd.f32 %v8291_v20, %v4061_v3 }
 0x32e   : > { %v4065_v12 = vadd.f32 %v8217_v59, %v11431_v34  ;;  %v4255_v33 = vpop.f32.mrf.mxu0  ;;  %v5631_v34 = vld [vmem:[#allocation3 + $0x122] sm:$0xff] }
 0x32f   : > { %8696 = vmatmul.mubr.f32.gmra.mxu1 %v5628_v13  ;;  %v3969_v24 = vpop.f32.mrf.mxu1  ;;  %v11519_v31 = vadd.f32 %v4255_v33, %v4060_v14  ;;  %v5636_v33 = vld [vmem:[#allocation3 + $0x15a] sm:$0xff] }
 0x330   : > { %8698 = vmatprep.mubr.f32.mxu1 %v5629_v51  ;;  %v4064_v38 = vadd.f32 %v3969_v24, %v11434_v35  ;;  %v8294_v58 = vpop.f32.mrf.mxu0 }
 0x331   : > { %v8220_v43 = vpop.f32.mrf.mxu1  ;;  %v11522_v54 = vadd.f32 %v8294_v58, %v4063_v0 }
 0x332   : > { %v4067_v22 = vadd.f32 %v8220_v43, %v11437_v40  ;;  %v4265_v50 = vpop.f32.mrf.mxu0  ;;  %v5633_v40 = vld [vmem:[#allocation3 + $0x13a] sm:$0xff] }
 0x333   : > { %8699 = vmatmul.mubr.f32.gmra.mxu1 %v5630_v42  ;;  %v3979_v18 = vpop.f32.mrf.mxu1  ;;  %v11525_v49 = vadd.f32 %v4265_v50, %v4062_v17  ;;  %v5638_v50 = vld [vmem:[#allocation3 + $0x172] sm:$0xff] }
 0x334   : > { %8701 = vmatprep.mubr.f32.mxu1 %v5631_v34  ;;  %v4066_v16 = vadd.f32 %v3979_v18, %v11440_v11  ;;  %v8297_v48 = vpop.f32.mrf.mxu0 }
 0x335   : > { %v8223_v3 = vpop.f32.mrf.mxu1  ;;  %v11528_v7 = vadd.f32 %v8297_v48, %v4065_v12 }
 0x336   : > { %v4069_v35 = vadd.f32 %v8223_v3, %v11443_v41  ;;  %v4275_v4 = vpop.f32.mrf.mxu0  ;;  %v5635_v41 = vld [vmem:[#allocation3 + $0x152] sm:$0xff] }
 0x337   : > { %8702 = vmatmul.mubr.f32.gmra.mxu1 %v5632_v53  ;;  %v3989_v44 = vpop.f32.mrf.mxu1  ;;  %v11531_v14 = vadd.f32 %v4275_v4, %v4064_v38 }
 0x338   : > { %8704 = vmatprep.mubr.f32.mxu1 %v5633_v40  ;;  %v4068_v15 = vadd.f32 %v3989_v44, %v11446_v39  ;;  %v8300_v5 = vpop.f32.mrf.mxu0 }
 0x339   : > { %v8226_v0 = vpop.f32.mrf.mxu1  ;;  %v11534_v26 = vadd.f32 %v8300_v5, %v4067_v22 }
 0x33a   : > { %v4071_v11 = vadd.f32 %v8226_v0, %v11449_v55  ;;  %v4285_v30 = vpop.f32.mrf.mxu0  ;;  %v5637_v55 = vld [vmem:[#allocation3 + $0x16a] sm:$0xff] }
 0x33b   : > { %8705 = vmatmul.mubr.f32.gmra.mxu1 %v5634_v46  ;;  %v3999_v19 = vpop.f32.mrf.mxu1  ;;  %v11537_v17 = vadd.f32 %v4285_v30, %v4066_v16 }
 0x33c   : > { %8707 = vmatprep.mubr.f32.mxu1 %v5635_v41  ;;  %v4070_v20 = vadd.f32 %v3999_v19, %v11452_v2  ;;  %v8303_v59 = vpop.f32.mrf.mxu0 }
 0x33d   : > { %v8229_v12 = vpop.f32.mrf.mxu1  ;;  %v11540_v13 = vadd.f32 %v8303_v59, %v4069_v35  ;;  %v5641_v35 = vld [vmem:[#allocation3 + $0x19a] sm:$0xff] }
 0x33e   : > { %v4073_v39 = vadd.f32 %v8229_v12, %v11456_v56  ;;  %v4295_v51 = vpop.f32.mrf.mxu0 }
 0x33f   : > { %8708 = vmatmul.mubr.f32.gmra.mxu1 %v5636_v33  ;;  %v4009_v24 = vpop.f32.mrf.mxu1  ;;  %v11543_v38 = vadd.f32 %v4295_v51, %v4068_v15  ;;  %v5642_v15 = vld [vmem:[#allocation3 + $0x1a2] sm:$0xff] }
 0x340   : > { %8710 = vmatprep.mubr.f32.mxu1 %v5637_v55  ;;  %v4072_v58 = vadd.f32 %v4009_v24, %v11459_v36  ;;  %v8306_v43 = vpop.f32.mrf.mxu0 }
 0x341   : > { %v8232_v22 = vpop.f32.mrf.mxu1  ;;  %v11546_v42 = vadd.f32 %v8306_v43, %v4071_v11 }
 0x342   : > { %v4075_v2 = vadd.f32 %v8232_v22, %v11462_v25  ;;  %v4305_v34 = vpop.f32.mrf.mxu0 }
 0x343   : > { %8711 = vmatmul.mubr.f32.gmra.mxu1 %v5638_v50  ;;  %v4019_v56 = vpop.f32.mrf.mxu1  ;;  %v11549_v18 = vadd.f32 %v4305_v34, %v4070_v20 }
 0x344   : > { %8713 = vmatprep.mubr.f32.mxu1 %v11330_v52  ;;  %v4074_v16 = vadd.f32 %v4019_v56, %v11464_v37  ;;  %v8309_v48 = vpop.f32.mrf.mxu0 }
 0x345   : > { %v8235_v3 = vpop.f32.mrf.mxu1  ;;  %v11553_v36 = vadd.f32 %v8309_v48, %v4073_v39 }
 0x346   : > { %v4077_v53 = vadd.f32 %v8235_v3, %v11467_v32  ;;  %v4315_v4 = vpop.f32.mrf.mxu0 }
 0x347   : > { %8714 = vmatmul.mubr.f32.gmra.mxu1 %v11338_v6  ;;  %v4029_v25 = vpop.f32.mrf.mxu1  ;;  %v11557_v40 = vadd.f32 %v4315_v4, %v4072_v58 }
 0x348   : > { %v4076_v44 = vadd.f32 %v4029_v25, %v11470_v9  ;;  %8716 = vmatprep.mubr.f32.mxu1 %v5641_v35  ;;  %v8312_v52 = vpop.f32.mrf.mxu0 }
 0x349   : > { %v8238_v5 = vpop.f32.mrf.mxu1  ;;  %v11560_v37 = vadd.f32 %v8312_v52, %v4075_v2 }
 0x34a   : > { %v4079_v0 = vadd.f32 %v8238_v5, %v11472_v1  ;;  %v4325_v11 = vpop.f32.mrf.mxu0 }
 0x34b   : > { %8717 = vmatmul.mubr.f32.gmra.mxu1 %v5642_v15  ;;  %v4039_v46 = vpop.f32.mrf.mxu1  ;;  %v11563_v32 = vadd.f32 %v4325_v11, %v4074_v16 }
 0x34c   : > { %v4078_v6 = vadd.f32 %v4039_v46, %v11477_v10 }
 0x34d   : > { %v8315_v30 = vpop.f32.mrf.mxu0 }
 0x34e   : > { %v11566_v41 = vadd.f32 %v8315_v30, %v4077_v53 }
 0x34f   : > { %v4335_v19 = vpop.f32.mrf.mxu0  ;;  %v8353_v9 = vpop.f32.mrf.mxu1 }
 0x350   : > { %v11568_v20 = vadd.f32 %v4335_v19, %v4076_v44  ;;  %v11571_v59 = vadd.f32 %v8353_v9, %v11480_v45 }
 0x351   : > { %v8318_v12 = vpop.f32.mrf.mxu0  ;;  %v4501_v39 = vpop.f32.mrf.mxu1 }
 0x352   : > { %v11573_v1 = vadd.f32 %v8318_v12, %v4079_v0  ;;  %v11576_v33 = vadd.f32 %v4501_v39, %v11483_v28 }
 0x353   : > { %v4345_v51 = vpop.f32.mrf.mxu0  ;;  %v8356_v55 = vpop.f32.mrf.mxu1 }
 0x354   : > { %v11578_v10 = vadd.f32 %v4345_v51, %v4078_v6  ;;  %v11581_v24 = vadd.f32 %v8356_v55, %v11486_v63 }
 0x355   : > { %v11583_v58 = vpop.f32.mrf.mxu0  ;;  %v4511_v43 = vpop.f32.mrf.mxu1 }
 0x356   : > { %v11586_v45 = vadd.f32 %v4511_v43, %v11489_v47 }
 0x357   : > { %v11588_v22 = vpop.f32.mrf.mxu0  ;;  %v8359_v2 = vpop.f32.mrf.mxu1 }
 0x358   : > { %v11591_v50 = vadd.f32 %v8359_v2, %v11492_v62 }
 0x359   : > { %v11593_v28 = vpop.f32.mrf.mxu0  ;;  %v4521_v34 = vpop.f32.mrf.mxu1 }
 0x35a   : > { %v11596_v56 = vadd.f32 %v4521_v34, %v11495_v60 }
 0x35b   : > { %v11598_v63 = vpop.f32.mrf.mxu0  ;;  %v8362_v16 = vpop.f32.mrf.mxu1 }
 0x35c   : > { %v11601_v48 = vadd.f32 %v8362_v16, %v11498_v57 }
 0x35d   : > { %v11603_v47 = vpop.f32.mrf.mxu0  ;;  %v4531_v3 = vpop.f32.mrf.mxu1 }
 0x35e   : > { %v11606_v35 = vadd.f32 %v4531_v3, %v11501_v8 }
 0x35f   : > { %v11608_v62 = vpop.f32.mrf.mxu0  ;;  %v8365_v53 = vpop.f32.mrf.mxu1 }
 0x360   : > { %v11611_v4 = vadd.f32 %v8365_v53, %v11504_v21 }
 0x361   : > { %v11613_v60 = vpop.f32.mrf.mxu0  ;;  %v4541_v25 = vpop.f32.mrf.mxu1 }
 0x362   : > { %v11616_v44 = vadd.f32 %v4541_v25, %v11507_v61 }
 0x363   : > { %v11618_v57 = vpop.f32.mrf.mxu0  ;;  %v8368_v15 = vpop.f32.mrf.mxu1 }
 0x364   : > { %v11621_v52 = vadd.f32 %v8368_v15, %v11510_v23 }
 0x365   : > { %v11623_v8 = vpop.f32.mrf.mxu0  ;;  %v4551_v5 = vpop.f32.mrf.mxu1 }
 0x366   : > { %v11626_v0 = vadd.f32 %v4551_v5, %v11513_v27 }
 0x367   : > { %v11628_v21 = vpop.f32.mrf.mxu0  ;;  %v8371_v11 = vpop.f32.mrf.mxu1 }
 0x368   : > { %v11631_v46 = vadd.f32 %v8371_v11, %v11516_v29 }
 0x369   : > { %v11633_v61 = vpop.f32.mrf.mxu0  ;;  %v4561_v6 = vpop.f32.mrf.mxu1 }
 0x36a   : > { %v11636_v30 = vadd.f32 %v4561_v6, %v11519_v31 }
 0x36b   : > { %v11638_v23 = vpop.f32.mrf.mxu0  ;;  %v8374_v19 = vpop.f32.mrf.mxu1 }
 0x36c   : > { %v11641_v9 = vadd.f32 %v8374_v19, %v11522_v54 }
 0x36d   : > { %v11643_v27 = vpop.f32.mrf.mxu0  ;;  %v4571_v12 = vpop.f32.mrf.mxu1 }
 0x36e   : > { %12275 = vst [vmem:[#allocation8_spill] sm:$0xff] %v11641_v9  ;;  %v11646_v39 = vadd.f32 %v4571_v12, %v11525_v49 }
 0x36f   : > { %v11648_v29 = vpop.f32.mrf.mxu0  ;;  %v8377_v51 = vpop.f32.mrf.mxu1 }
 0x370   : > { %12276 = vst [vmem:[#allocation10_spill] sm:$0xff] %v11646_v39  ;;  %v11651_v55 = vadd.f32 %v8377_v51, %v11528_v7 }
 0x371   : > { %v11653_v31 = vpop.f32.mrf.mxu0  ;;  %v4581_v43 = vpop.f32.mrf.mxu1 }
 0x372   : > { %12277 = vst [vmem:[#allocation18_spill] sm:$0xff] %v11651_v55  ;;  %12278 = vst [vmem:[#allocation4_spill] sm:$0xff] %v11653_v31  ;;  %v11656_v2 = vadd.f32 %v4581_v43, %v11531_v14 }
 0x373   : > { %v11658_v54 = vpop.f32.mrf.mxu0  ;;  %v8380_v34 = vpop.f32.mrf.mxu1 }
 0x374   : > { %12279 = vst [vmem:[#allocation5_spill] sm:$0xff] %v11656_v2  ;;  %12280 = vst [vmem:[#allocation6_spill] sm:$0xff] %v11658_v54  ;;  %v11661_v16 = vadd.f32 %v8380_v34, %v11534_v26 }
 0x375   : > { %v11663_v49 = vpop.f32.mrf.mxu0  ;;  %v4591_v3 = vpop.f32.mrf.mxu1 }
 0x376   : > { %12281 = vst [vmem:[#allocation12_spill] sm:$0xff] %v11661_v16  ;;  %12282 = vst [vmem:[#allocation19_spill] sm:$0xff] %v11663_v49  ;;  %v11666_v53 = vadd.f32 %v4591_v3, %v11537_v17 }
 0x377   : > { %v11668_v7 = vpop.f32.mrf.mxu0  ;;  %v8383_v25 = vpop.f32.mrf.mxu1 }
 0x378   : > { %12283 = vst [vmem:[#allocation20_spill] sm:$0xff] %v11666_v53  ;;  %12284 = vst [vmem:[#allocation7_spill] sm:$0xff] %v11668_v7  ;;  %v11671_v15 = vadd.f32 %v8383_v25, %v11540_v13 }
 0x379   : > { %v11673_v14 = vpop.f32.mrf.mxu0  ;;  %v4601_v5 = vpop.f32.mrf.mxu1 }
 0x37a   : > { %12285 = vst [vmem:[#allocation9_spill] sm:$0xff] %v11671_v15  ;;  %12286 = vst [vmem:[#allocation21_spill] sm:$0xff] %v11673_v14  ;;  %v11676_v11 = vadd.f32 %v4601_v5, %v11543_v38 }
 0x37b   : > { %v11678_v26 = vpop.f32.mrf.mxu0  ;;  %v8386_v6 = vpop.f32.mrf.mxu1 }
 0x37c   : > { %12287 = vst [vmem:[#allocation11_spill] sm:$0xff] %v11676_v11  ;;  %12288 = vst [vmem:[#allocation13_spill] sm:$0xff] %v11678_v26  ;;  %v11681_v19 = vadd.f32 %v8386_v6, %v11546_v42 }
 0x37d   : > { %v11683_v17 = vpop.f32.mrf.mxu0  ;;  %v4611_v12 = vpop.f32.mrf.mxu1 }
 0x37e   : > { %12289 = vst [vmem:[#allocation14_spill] sm:$0xff] %v11681_v19  ;;  %12290 = vst [vmem:[#allocation22_spill] sm:$0xff] %v11683_v17  ;;  %v11686_v51 = vadd.f32 %v4611_v12, %v11549_v18 }
 0x37f   : > { %v11688_v13 = vpop.f32.mrf.mxu0  ;;  %v8389_v43 = vpop.f32.mrf.mxu1 }
 0x380   : > { %12291 = vst [vmem:[#allocation23_spill] sm:$0xff] %v11686_v51  ;;  %12292 = vst [vmem:[#allocation24_spill] sm:$0xff] %v11688_v13  ;;  %v11691_v34 = vadd.f32 %v8389_v43, %v11553_v36 }
 0x381   : > { %v11693_v38 = vpop.f32.mrf.mxu0  ;;  %v4621_v3 = vpop.f32.mrf.mxu1 }
 0x382   : > { %12293 = vst [vmem:[#allocation72_spill] sm:$0xff] %v11691_v34  ;;  %12294 = vst [vmem:[#allocation15_spill] sm:$0xff] %v11693_v38  ;;  %v11696_v25 = vadd.f32 %v4621_v3, %v11557_v40 }
 0x383   : > { %v11698_v42 = vpop.f32.mrf.mxu0  ;;  %v8392_v5 = vpop.f32.mrf.mxu1 }
 0x384   : > { %12295 = vst [vmem:[#allocation25_spill] sm:$0xff] %v11696_v25  ;;  %12296 = vst [vmem:[#allocation26_spill] sm:$0xff] %v11698_v42  ;;  %v11701_v6 = vadd.f32 %v8392_v5, %v11560_v37 }
 0x385   : > { %v11703_v18 = vpop.f32.mrf.mxu0  ;;  %v4631_v12 = vpop.f32.mrf.mxu1 }
 0x386   : > { %12297 = vst [vmem:[#allocation76_spill] sm:$0xff] %v11701_v6  ;;  %12298 = vst [vmem:[#allocation73_spill] sm:$0xff] %v11703_v18  ;;  %v11706_v51 = vadd.f32 %v4631_v12, %v11563_v32 }
 0x387   : > { %v11708_v36 = vpop.f32.mrf.mxu0  ;;  %v8395_v43 = vpop.f32.mrf.mxu1 }
 0x388   : > { %12299 = vst [vmem:[#allocation27_spill] sm:$0xff] %v11706_v51  ;;  %12300 = vst [vmem:[#allocation30_spill] sm:$0xff] %v11708_v36  ;;  %v11711_v34 = vadd.f32 %v8395_v43, %v11566_v41 }
 0x389   : > { %v11713_v40 = vpop.f32.mrf.mxu0  ;;  %v4641_v3 = vpop.f32.mrf.mxu1 }
 0x38a   : > { %12301 = vst [vmem:[#allocation79_spill] sm:$0xff] %v11711_v34  ;;  %12302 = vst [vmem:[#allocation74_spill] sm:$0xff] %v11713_v40  ;;  %v11716_v25 = vadd.f32 %v4641_v3, %v11568_v20 }
 0x38b   : > { %v11718_v37 = vpop.f32.mrf.mxu0  ;;  %v8398_v5 = vpop.f32.mrf.mxu1 }
 0x38c   : > { %12303 = vst [vmem:[#allocation16_spill] sm:$0xff] %v11716_v25  ;;  %12304 = vst [vmem:[#allocation28_spill] sm:$0xff] %v11718_v37  ;;  %v11721_v6 = vadd.f32 %v8398_v5, %v11573_v1 }
 0x38d   : > { %v11723_v32 = vpop.f32.mrf.mxu0  ;;  %v4651_v12 = vpop.f32.mrf.mxu1 }
 0x38e   : > { %12305 = vst [vmem:[#allocation29_spill] sm:$0xff] %v11721_v6  ;;  %12306 = vst [vmem:[#allocation82_spill] sm:$0xff] %v11723_v32  ;;  %v11726_v51 = vadd.f32 %v4651_v12, %v11578_v10 }
 0x38f   : > { %v11728_v41 = vpop.f32.mrf.mxu0  ;;  %v8513_v43 = vpop.f32.mrf.mxu1 }
 0x390   : > { %12307 = vst [vmem:[#allocation77_spill] sm:$0xff] %v11726_v51  ;;  %12308 = vst [vmem:[#allocation31_spill] sm:$0xff] %v11728_v41 }
 0x391   : > { %v11730_v34 = vpop.f32.mrf.mxu0  ;;  %v5114_v40 = vpop.f32.mrf.mxu1 }
 0x392   : > { %12309 = vst [vmem:[#allocation34_spill] sm:$0xff] %v11730_v34 }
 0x393   : > { %v11732_v20 = vpop.f32.mrf.mxu0  ;;  %v8516_v3 = vpop.f32.mrf.mxu1 }
 0x394   : > { %12310 = vst [vmem:[#allocation85_spill] sm:$0xff] %v11732_v20 }
 0x395   : > { %v8593_v25 = vpop.f32.mrf.mxu0  ;;  %v5124_v37 = vpop.f32.mrf.mxu1 }
 0x397   : > { %v5420_v36 = vpop.f32.mrf.mxu0  ;;  %v11734_v1 = vpop.f32.mrf.mxu1 }
 0x399   : > { %v8596_v5 = vpop.f32.mrf.mxu0  ;;  %v11736_v6 = vpop.f32.mrf.mxu1 }
 0x39b   : > { %v5430_v32 = vpop.f32.mrf.mxu0  ;;  %v11738_v10 = vpop.f32.mrf.mxu1 }
 0x39d   : > { %v11740_v12 = vpop.f32.mrf.mxu0  ;;  %v11742_v51 = vpop.f32.mrf.mxu1 }
 0x39f   : > { %v11744_v34 = vpop.f32.mrf.mxu1  ;;  %v11746_v41 = vpop.f32.mrf.mxu0 }
 0x3a1   : > { %v11748_v20 = vpop.f32.mrf.mxu1  ;;  %v11752_v42 = vpop.f32.mrf.mxu0 }
 0x3a3   : > { %v11750_v18 = vpop.f32.mrf.mxu1  ;;  %v11758_v13 = vpop.f32.mrf.mxu0 }
 0x3a5   : > { %v11754_v38 = vpop.f32.mrf.mxu1  ;;  %v11764_v15 = vpop.f32.mrf.mxu0 }
 0x3a7   : > { %v11756_v19 = vpop.f32.mrf.mxu1  ;;  %v11770_v14 = vpop.f32.mrf.mxu0 }
 0x3a9   : > { %v11760_v11 = vpop.f32.mrf.mxu1  ;;  %v11776_v2 = vpop.f32.mrf.mxu0 }
 0x3aa   : > { %12311 = vst [vmem:[#allocation78_spill] sm:$0xff] %v11760_v11 }
 0x3ab   : > { %v11762_v17 = vpop.f32.mrf.mxu1  ;;  %v11782_v54 = vpop.f32.mrf.mxu0 }
 0x3ac   : > { %12312 = vst [vmem:[#allocation17_spill] sm:$0xff] %v11762_v17 }
 0x3ad   : > { %v11766_v26 = vpop.f32.mrf.mxu1 }
 0x3ae   : > { %12313 = vst [vmem:[#allocation32_spill] sm:$0xff] %v11766_v26  ;;  %v11788_v26 = vpop.f32.mrf.mxu0 }
 0x3af   : > { %v11768_v53 = vpop.f32.mrf.mxu1  ;;  %12321 = vst [vmem:[#allocation37_spill] sm:$0xff] %v11788_v26 }
 0x3b0   : > { %12314 = vst [vmem:[#allocation33_spill] sm:$0xff] %v11768_v53 }
 0x3b1   : > { %v11772_v16 = vpop.f32.mrf.mxu1 }
 0x3b2   : > { %12315 = vst [vmem:[#allocation80_spill] sm:$0xff] %v11772_v16  ;;  %v11794_v16 = vpop.f32.mrf.mxu0 }
 0x3b3   : > { %v11774_v7 = vpop.f32.mrf.mxu1  ;;  %12324 = vst [vmem:[#allocation39_spill] sm:$0xff] %v11794_v16 }
 0x3b4   : > { %12316 = vst [vmem:[#allocation35_spill] sm:$0xff] %v11774_v7 }
 0x3b5   : > { %v11778_v49 = vpop.f32.mrf.mxu1 }
 0x3b6   : > { %12317 = vst [vmem:[#allocation38_spill] sm:$0xff] %v11778_v49  ;;  %v11800_v49 = vpop.f32.mrf.mxu0 }
 0x3b7   : > { %v11780_v55 = vpop.f32.mrf.mxu1  ;;  %12327 = vst [vmem:[#allocation84_spill] sm:$0xff] %v11800_v49 }
 0x3b8   : > { %12318 = vst [vmem:[#allocation90_spill] sm:$0xff] %v11780_v55 }
 0x3b9   : > { %v11784_v17 = vpop.f32.mrf.mxu1 }
 0x3ba   : > { %12319 = vst [vmem:[#allocation81_spill] sm:$0xff] %v11784_v17  ;;  %v11806_v17 = vpop.f32.mrf.mxu0 }
 0x3bb   : > { %v11786_v39 = vpop.f32.mrf.mxu1  ;;  %12330 = vst [vmem:[#allocation86_spill] sm:$0xff] %v11806_v17 }
 0x3bc   : > { %12320 = vst [vmem:[#allocation36_spill] sm:$0xff] %v11786_v39 }
 0x3bd   : > { %v11790_v53 = vpop.f32.mrf.mxu1 }
 0x3be   : > { %12322 = vst [vmem:[#allocation93_spill] sm:$0xff] %v11790_v53  ;;  %v4967_v53 = vadd.f32 %v11583_v58, %v11571_v59  ;;  %v11825_v59 = vld [vmem:[%s12074_s4] ss:$0 sm:$0xff]  ;;  %v4968_v58 = vadd.f32 %v11598_v63, %v11586_v45  ;;  %v4970_v45 = vadd.f32 %v11608_v62, %v11596_v56 }
 0x3bf   : > { %v11792_v11 = vpop.f32.mrf.mxu1 }
 0x3c0   : > { %12323 = vst [vmem:[#allocation83_spill] sm:$0xff] %v11792_v11  ;;  %v5274_v16 = vadd.f32 %v8513_v43, %v4967_v53 }
 0x3c1   : > { %v11796_v7 = vpop.f32.mrf.mxu1 }
 0x3c2   : > { %12325 = vst [vmem:[#allocation42_spill] sm:$0xff] %v11796_v7  ;;  %v4966_v7 = vadd.f32 %v11588_v22, %v11576_v33 }
 0x3c3   : > { %v11798_v31 = vpop.f32.mrf.mxu1 }
 0x3c4   : > { %12326 = vst [vmem:[#allocation96_spill] sm:$0xff] %v11798_v31  ;;  %v11816_v31 = vpop.f32.mrf.mxu0  ;;  %v5273_v17 = vadd.f32 %v5114_v40, %v4966_v7  ;;  %v5275_v7 = vadd.f32 %v5124_v37, %v4968_v58  ;;  %v4973_v37 = vadd.f32 %v11613_v60, %v11601_v48 }
 0x3c5   : > { %v11802_v55 = vpop.f32.mrf.mxu1 }
 0x3c6   : > { %12328 = vst [vmem:[#allocation40_spill] sm:$0xff] %v11802_v55  ;;  %v5580_v55 = vadd.f32 %v8593_v25, %v5274_v16  ;;  %v5579_v33 = vadd.f32 %v5420_v36, %v5273_v17  ;;  %v11829_v53 = vpop.f32.mrf.mxu0  ;;  %v5280_v48 = vadd.f32 %v11738_v10, %v4973_v37  ;;  %v8756_v37 = vld [vmem:[#allocation2 + $0x31] sm:$0xff] }
 0x3c7   : > { %v11804_v9 = vpop.f32.mrf.mxu1 }
 0x3c8   : > { %12329 = vst [vmem:[#allocation41_spill] sm:$0xff] %v11804_v9  ;;  %v4969_v9 = vadd.f32 %v11593_v28, %v11581_v24  ;;  %v11834_v24 = vld [vmem:[%s12074_s4 + $0x1] ss:$0 sm:$0xff]  ;;  %v5586_v10 = vadd.f32 %v11752_v42, %v5280_v48 }
 0x3c9   : > { %v11808_v39 = vpop.f32.mrf.mxu1 }
 0x3ca   : > { %v5276_v22 = vadd.f32 %v8516_v3, %v4969_v9  ;;  %v5581_v9 = vadd.f32 %v5430_v32, %v5275_v7 }
 0x3cb   : > { %v11812_v11 = vpop.f32.mrf.mxu1 }
 0x3cc   : > { %v5582_v16 = vadd.f32 %v8596_v5, %v5276_v22  ;;  %v8753_v5 = vld [vmem:[#allocation2 + $0x21] sm:$0xff] }
 0x3cd   : > { %v11818_v49 = vpop.f32.mrf.mxu1 }
 0x3ce   : > { %12331 = vst [vmem:[#allocation43_spill] sm:$0xff] %v11818_v49  ;;  %v4971_v49 = vadd.f32 %v11603_v47, %v11591_v50  ;;  %v5277_v50 = vadd.f32 %v11736_v6, %v4970_v45 }
 0x3cf   : > { %v8673_v26 = vpop.f32.mrf.mxu1 }
 0x3d0   : > { %v5886_v43 = vadd.f32 %v8673_v26, %v5580_v55  ;;  %v11841_v55 = vpop.f32.mrf.mxu0  ;;  %v5278_v3 = vadd.f32 %v11734_v1, %v4971_v49  ;;  %v8754_v1 = vld [vmem:[#allocation2 + $0x19] sm:$0xff] }
 0x3d1   : > { %v5726_v28 = vpop.f32.mrf.mxu1 }
 0x3d2   : > { %v5923_v25 = vmul.f32 %v11825_v59, %v5886_v43  ;;  %v5885_v40 = vadd.f32 %v5726_v28, %v5579_v33  ;;  %v4972_v33 = vadd.f32 %v11618_v57, %v11606_v35  ;;  %v5584_v22 = vadd.f32 %v11740_v12, %v5278_v3  ;;  %v11863_v49 = vpop.f32.mrf.mxu0 }
 0x3d3   : > { %v8676_v63 = vpop.f32.mrf.mxu1  ;;  %v5583_v43 = vadd.f32 %v11746_v41, %v5277_v50  ;;  %v4975_v41 = vadd.f32 %v11623_v8, %v11611_v4 }
 0x3d4   : > { %v5960_v26 = vadd.f32 %v11834_v24, %v5923_v25  ;;  %v5922_v17 = vmul.f32 %v11825_v59, %v5885_v40  ;;  %v5888_v36 = vadd.f32 %v8676_v63, %v5582_v16  ;;  %v5279_v12 = vadd.f32 %v11742_v51, %v4972_v33  ;;  %v8755_v40 = vld [vmem:[#allocation2 + $0x39] sm:$0xff]  ;;  %v11878_v42 = vpop.f32.mrf.mxu0 }
 0x3d5   : > { %v5736_v47 = vpop.f32.mrf.mxu1  ;;  %v5282_v4 = vadd.f32 %v11744_v34, %v4975_v41  ;;  %v4979_v33 = vadd.f32 %v11643_v27, %v11631_v46 }
 0x3d6   : > { %v5992_v56 = vadd.f32 %v8753_v5, %v5960_v26  ;;  %v5959_v62 = vadd.f32 %v11834_v24, %v5922_v17  ;;  %v5925_v32 = vmul.f32 %v11825_v59, %v5888_v36  ;;  %v5887_v58 = vadd.f32 %v5736_v47, %v5581_v9 }
 0x3d7   : > { %v8679_v60 = vpop.f32.mrf.mxu1  ;;  %v4974_v26 = vadd.f32 %v11628_v21, %v11616_v44  ;;  %v5585_v17 = vadd.f32 %v11758_v13, %v5279_v12  ;;  %v4977_v44 = vadd.f32 %v11633_v61, %v11621_v52  ;;  %v4976_v21 = vadd.f32 %v11638_v23, %v11626_v0  ;;  %v8757_v61 = vld [vmem:[#allocation2 + $0x51] sm:$0xff] }
 0x3d8   : > { %v6024_v6 = vmax.f32 %v5992_v56, 0.0  ;;  %v5991_v28 = vadd.f32 %v8754_v1, %v5959_v62  ;;  %v5962_v35 = vadd.f32 %v11834_v24, %v5925_v32  ;;  %v5924_v57 = vmul.f32 %v11825_v59, %v5887_v58 }
 0x3d9   : > { %v5890_v16 = vadd.f32 %v8679_v60, %v5584_v22  ;;  %v5746_v7 = vpop.f32.mrf.mxu1  ;;  %v5588_v13 = vadd.f32 %v11764_v15, %v5282_v4  ;;  %v5281_v52 = vadd.f32 %v11748_v20, %v4974_v26  ;;  %v5284_v0 = vadd.f32 %v11750_v18, %v4977_v44  ;;  %v11895_v22 = vpop.f32.mrf.mxu0  ;;  %v12333_v4 = vld [vmem:[#allocation4_spill] sm:$0xff] }
 0x3da   : > { %6056 = vst [vmem:[%s11861_s16 + $0x8] sm:$0xff] %v6024_v6  ;;  %v6023_v25 = vmax.f32 %v5991_v28, 0.0  ;;  %v5994_v45 = vadd.f32 %v8755_v40, %v5962_v35  ;;  %v5961_v63 = vadd.f32 %v11834_v24, %v5924_v57  ;;  %v5889_v9 = vadd.f32 %v5746_v7, %v5583_v43  ;;  %v8758_v43 = vld [vmem:[#allocation2 + $0x49] sm:$0xff] }
 0x3db   : > { %v5927_v8 = vmul.f32 %v11825_v59, %v5890_v16  ;;  %v8682_v51 = vpop.f32.mrf.mxu1  ;;  %v5587_v46 = vadd.f32 %v11770_v14, %v5281_v52  ;;  %v5590_v27 = vadd.f32 %v11776_v2, %v5284_v0  ;;  %v5283_v18 = vadd.f32 %v11754_v38, %v4976_v21  ;;  %v8759_v57 = vld [vmem:[#allocation2 + $0x69] sm:$0xff] }
 0x3dc   : > { %6055 = vst [vmem:[%s11861_s16] sm:$0xff] %v6023_v25  ;;  %v6026_v36 = vmax.f32 %v5994_v45, 0.0  ;;  %v5993_v3 = vadd.f32 %v8756_v37, %v5961_v63  ;;  %v5926_v50 = vmul.f32 %v11825_v59, %v5889_v9  ;;  %v5892_v47 = vadd.f32 %v8682_v51, %v5586_v10  ;;  %v11910_v25 = vpop.f32.mrf.mxu0  ;;  %v8760_v45 = vld [vmem:[#allocation2 + $0x61] sm:$0xff]  ;;  %v12336_v21 = vld [vmem:[#allocation10_spill] sm:$0xff] }
 0x3dd   : > { %v5964_v34 = vadd.f32 %v11834_v24, %v5927_v8  ;;  %v5756_v5 = vpop.f32.mrf.mxu1  ;;  %v4978_v16 = vadd.f32 %v11648_v29, %v11636_v30  ;;  %v5589_v7 = vadd.f32 %v11782_v54, %v5283_v18  ;;  %v5286_v14 = vadd.f32 %v11756_v19, %v4979_v33  ;;  %v12334_v29 = vld [vmem:[#allocation37_spill] sm:$0xff]  ;;  %v12335_v8 = vld [vmem:[#allocation78_spill] sm:$0xff] }
 0x3de   : > { %6058 = vst [vmem:[%s11861_s16 + $0x18] sm:$0xff] %v6026_v36  ;;  %v6025_v56 = vmax.f32 %v5993_v3, 0.0  ;;  %v5963_v62 = vadd.f32 %v11834_v24, %v5926_v50  ;;  %v5929_v32 = vmul.f32 %v11825_v59, %v5892_v47  ;;  %v5891_v58 = vadd.f32 %v5756_v5, %v5585_v17  ;;  %v12332_v17 = vld [vmem:[#allocation8_spill] sm:$0xff]  ;;  %v12338_v5 = vld [vmem:[#allocation18_spill] sm:$0xff]  ;;  %v11927_v0 = vpop.f32.mrf.mxu0 }
 0x3df   : > { %v5996_v23 = vadd.f32 %v8757_v61, %v5964_v34  ;;  %v8685_v15 = vpop.f32.mrf.mxu1  ;;  %v4981_v30 = vadd.f32 %v12333_v4, %v12332_v17  ;;  %v5592_v54 = vadd.f32 %v12334_v29, %v5286_v14  ;;  %v5285_v19 = vadd.f32 %v12335_v8, %v4978_v16  ;;  %v8761_v3 = vld [vmem:[#allocation2 + $0x81] sm:$0xff]  ;;  %v8764_v4 = vld [vmem:[#allocation2 + $0x91] sm:$0xff] }
 0x3e0   : > { %6057 = vst [vmem:[%s11861_s16 + $0x10] sm:$0xff] %v6025_v56  ;;  %v5995_v48 = vadd.f32 %v8758_v43, %v5963_v62  ;;  %v5966_v60 = vadd.f32 %v11834_v24, %v5929_v32  ;;  %v5928_v6 = vmul.f32 %v11825_v59, %v5891_v58  ;;  %v5894_v1 = vadd.f32 %v8685_v15, %v5588_v13  ;;  %v12337_v13 = vld [vmem:[#allocation6_spill] sm:$0xff]  ;;  %v12339_v56 = vld [vmem:[#allocation19_spill] sm:$0xff]  ;;  %v12348_v8 = vld [vmem:[#allocation12_spill] sm:$0xff] }
 0x3e1   : > { %v6028_v20 = vmax.f32 %v5996_v23, 0.0  ;;  %v5766_v28 = vpop.f32.mrf.mxu1  ;;  %v4980_v34 = vadd.f32 %v12337_v13, %v12336_v21  ;;  %v4983_v62 = vadd.f32 %v12339_v56, %v12338_v5  ;;  %v12340_v32 = vld [vmem:[#allocation39_spill] sm:$0xff]  ;;  %v12351_v56 = vld [vmem:[#allocation20_spill] sm:$0xff] }
 0x3e2   : > { %v6027_v35 = vmax.f32 %v5995_v48, 0.0  ;;  %v5998_v41 = vadd.f32 %v8759_v57, %v5966_v60  ;;  %v5965_v10 = vadd.f32 %v11834_v24, %v5928_v6  ;;  %v5931_v12 = vmul.f32 %v11825_v59, %v5894_v1  ;;  %v12341_v48 = vld [vmem:[#allocation5_spill] sm:$0xff]  ;;  %v12342_v60 = vld [vmem:[#allocation7_spill] sm:$0xff] }
 0x3e3   : > { %6060 = vst [vmem:[%s11861_s16 + $0x28] sm:$0xff] %v6028_v20  ;;  %v5893_v2 = vadd.f32 %v5766_v28, %v5587_v46  ;;  %v8688_v38 = vpop.f32.mrf.mxu1  ;;  %v5591_v58 = vadd.f32 %v12340_v32, %v5285_v19  ;;  %v4982_v6 = vadd.f32 %v12342_v60, %v12341_v48  ;;  %v12343_v1 = vld [vmem:[#allocation17_spill] sm:$0xff]  ;;  %v8762_v20 = vld [vmem:[#allocation2 + $0x79] sm:$0xff]  ;;  %v8765_v21 = vld [vmem:[#allocation2 + $0xb1] sm:$0xff] }
 0x3e4   : > { %6059 = vst [vmem:[%s11861_s16 + $0x20] sm:$0xff] %v6027_v35  ;;  %v6030_v40 = vmax.f32 %v5998_v41, 0.0  ;;  %v5997_v63 = vadd.f32 %v8760_v45, %v5965_v10  ;;  %v5968_v9 = vadd.f32 %v11834_v24, %v5931_v12  ;;  %v5896_v26 = vadd.f32 %v8688_v38, %v5590_v27  ;;  %v12344_v27 = vld [vmem:[#allocation32_spill] sm:$0xff]  ;;  %v12349_v19 = vld [vmem:[#allocation21_spill] sm:$0xff] }
 0x3e5   : > { %v5930_v51 = vmul.f32 %v11825_v59, %v5893_v2  ;;  %v5776_v36 = vpop.f32.mrf.mxu1  ;;  %v5288_v46 = vadd.f32 %v12343_v1, %v4981_v30  ;;  %v5287_v18 = vadd.f32 %v12344_v27, %v4980_v34  ;;  %v8763_v57 = vld [vmem:[#allocation2 + $0x99] sm:$0xff]  ;;  %v12346_v2 = vld [vmem:[#allocation86_spill] sm:$0xff]  ;;  %v12354_v1 = vld [vmem:[#allocation9_spill] sm:$0xff] }
 0x3e6   : > { %6062 = vst [vmem:[%s11861_s16 + $0x38] sm:$0xff] %v6030_v40  ;;  %v6029_v37 = vmax.f32 %v5997_v63, 0.0  ;;  %v6000_v50 = vadd.f32 %v8761_v3, %v5968_v9  ;;  %v5933_v47 = vmul.f32 %v11825_v59, %v5896_v26  ;;  %v5895_v44 = vadd.f32 %v5776_v36, %v5589_v7  ;;  %v12345_v7 = vld [vmem:[#allocation84_spill] sm:$0xff]  ;;  %v12347_v40 = vld [vmem:[#allocation33_spill] sm:$0xff]  ;;  %v11942_v26 = vpop.f32.mrf.mxu0 }
 0x3e7   : > { %v5967_v33 = vadd.f32 %v11834_v24, %v5930_v51  ;;  %v8691_v52 = vpop.f32.mrf.mxu1  ;;  %v5594_v14 = vadd.f32 %v12345_v7, %v5288_v46  ;;  %v5593_v38 = vadd.f32 %v12346_v2, %v5287_v18  ;;  %v5290_v45 = vadd.f32 %v12347_v40, %v4983_v62  ;;  %v12352_v62 = vld [vmem:[#allocation13_spill] sm:$0xff]  ;;  %v12355_v46 = vld [vmem:[#allocation22_spill] sm:$0xff]  ;;  %v12356_v18 = vld [vmem:[#allocation11_spill] sm:$0xff] }
 0x3e8   : > { %6061 = vst [vmem:[%s11861_s16 + $0x30] sm:$0xff] %v6029_v37  ;;  %v6032_v61 = vmax.f32 %v6000_v50, 0.0  ;;  %v5970_v23 = vadd.f32 %v11834_v24, %v5933_v47  ;;  %v5932_v15 = vmul.f32 %v11825_v59, %v5895_v44  ;;  %v5898_v43 = vadd.f32 %v8691_v52, %v5592_v54  ;;  %v12350_v37 = vld [vmem:[#allocation80_spill] sm:$0xff]  ;;  %v12358_v7 = vld [vmem:[#allocation14_spill] sm:$0xff] }
 0x3e9   : > { %v5999_v28 = vadd.f32 %v8762_v20, %v5967_v33  ;;  %v5786_v35 = vpop.f32.mrf.mxu1  ;;  %v4985_v51 = vadd.f32 %v12349_v19, %v12348_v8  ;;  %v5596_v36 = vadd.f32 %v11816_v31, %v5290_v45  ;;  %v5289_v3 = vadd.f32 %v12350_v37, %v4982_v6  ;;  %v12353_v33 = vld [vmem:[#allocation35_spill] sm:$0xff]  ;;  %v12361_v45 = vld [vmem:[#allocation90_spill] sm:$0xff]  ;;  %v12362_v37 = vld [vmem:[#allocation81_spill] sm:$0xff] }
 0x3ea   : > { %6064 = vst [vmem:[%s11861_s16 + $0x48] sm:$0xff] %v6032_v61  ;;  %v6002_v41 = vadd.f32 %v8763_v57, %v5970_v23  ;;  %v5969_v10 = vadd.f32 %v11834_v24, %v5932_v15  ;;  %v5935_v12 = vmul.f32 %v11825_v59, %v5898_v43  ;;  %v5897_v16 = vadd.f32 %v5786_v35, %v5591_v58  ;;  %v11958_v23 = vpop.f32.mrf.mxu0  ;;  %v8766_v43 = vld [vmem:[#allocation2 + $0xa9] sm:$0xff] }
 0x3eb   : > { %v6031_v63 = vmax.f32 %v5999_v28, 0.0  ;;  %v8694_v9 = vpop.f32.mrf.mxu1  ;;  %v4984_v32 = vadd.f32 %v12352_v62, %v12351_v56  ;;  %v5595_v58 = vadd.f32 %v11829_v53, %v5289_v3  ;;  %v5292_v31 = vadd.f32 %v12353_v33, %v4985_v51  ;;  %v12357_v53 = vld [vmem:[#allocation24_spill] sm:$0xff]  ;;  %v12363_v56 = vld [vmem:[#allocation23_spill] sm:$0xff]  ;;  %v12364_v62 = vld [vmem:[#allocation26_spill] sm:$0xff] }
 0x3ec   : > { %v6034_v17 = vmax.f32 %v6002_v41, 0.0  ;;  %v6001_v30 = vadd.f32 %v8764_v4, %v5969_v10  ;;  %v5972_v29 = vadd.f32 %v11834_v24, %v5935_v12  ;;  %v5934_v54 = vmul.f32 %v11825_v59, %v5897_v16  ;;  %v11975_v4 = vpop.f32.mrf.mxu0 }
 0x3ed   : > { %6063 = vst [vmem:[%s11861_s16 + $0x40] sm:$0xff] %v6031_v63  ;;  %v5900_v50 = vadd.f32 %v8694_v9, %v5594_v14  ;;  %v5796_v47 = vpop.f32.mrf.mxu1  ;;  %v4987_v27 = vadd.f32 %v12355_v46, %v12354_v1  ;;  %v4986_v20 = vadd.f32 %v12357_v53, %v12356_v18  ;;  %v5598_v28 = vadd.f32 %v11841_v55, %v5292_v31  ;;  %v12359_v14 = vld [vmem:[#allocation15_spill] sm:$0xff]  ;;  %v8767_v9 = vld [vmem:[#allocation2 + $0xc9] sm:$0xff] }
 0x3ee   : > { %6066 = vst [vmem:[%s11861_s16 + $0x58] sm:$0xff] %v6034_v17  ;;  %v6033_v44 = vmax.f32 %v6001_v30, 0.0  ;;  %v6004_v13 = vadd.f32 %v8765_v21, %v5972_v29  ;;  %v5971_v34 = vadd.f32 %v11834_v24, %v5934_v54  ;;  %v5899_v5 = vadd.f32 %v5796_v47, %v5593_v38  ;;  %v12360_v38 = vld [vmem:[#allocation38_spill] sm:$0xff]  ;;  %v8768_v30 = vld [vmem:[#allocation2 + $0xc1] sm:$0xff] }
 0x3ef   : > { %v5937_v52 = vmul.f32 %v11825_v59, %v5900_v50  ;;  %v8697_v61 = vpop.f32.mrf.mxu1  ;;  %v4989_v2 = vadd.f32 %v12359_v14, %v12358_v7  ;;  %v5291_v40 = vadd.f32 %v12360_v38, %v4984_v32  ;;  %v5294_v63 = vadd.f32 %v12361_v45, %v4987_v27  ;;  %v8769_v21 = vld [vmem:[#allocation2 + $0xe1] sm:$0xff] }
 0x3f0   : > { %6065 = vst [vmem:[%s11861_s16 + $0x50] sm:$0xff] %v6033_v44  ;;  %v6036_v15 = vmax.f32 %v6004_v13, 0.0  ;;  %v6003_v48 = vadd.f32 %v8766_v43, %v5971_v34  ;;  %v5936_v60 = vmul.f32 %v11825_v59, %v5899_v5  ;;  %v5902_v6 = vadd.f32 %v8697_v61, %v5596_v36  ;;  %v12367_v1 = vld [vmem:[#allocation73_spill] sm:$0xff]  ;;  %v12371_v14 = vld [vmem:[#allocation76_spill] sm:$0xff] }
 0x3f1   : > { %v5974_v35 = vadd.f32 %v11834_v24, %v5937_v52  ;;  %v5806_v57 = vpop.f32.mrf.mxu1  ;;  %v5597_v51 = vadd.f32 %v11863_v49, %v5291_v40  ;;  %v5600_v36 = vadd.f32 %v11878_v42, %v5294_v63  ;;  %v5293_v3 = vadd.f32 %v12362_v37, %v4986_v20  ;;  %v12365_v49 = vld [vmem:[#allocation36_spill] sm:$0xff]  ;;  %v11990_v52 = vpop.f32.mrf.mxu0  ;;  %v12368_v27 = vld [vmem:[#allocation93_spill] sm:$0xff] }
 0x3f2   : > { %6068 = vst [vmem:[%s11861_s16 + $0x68] sm:$0xff] %v6036_v15  ;;  %v6035_v41 = vmax.f32 %v6003_v48, 0.0  ;;  %v5973_v10 = vadd.f32 %v11834_v24, %v5936_v60  ;;  %v5939_v12 = vmul.f32 %v11825_v59, %v5902_v6  ;;  %v5901_v16 = vadd.f32 %v5806_v57, %v5595_v58  ;;  %v8770_v15 = vld [vmem:[#allocation2 + $0xd9] sm:$0xff] }
 0x3f3   : > { %v6006_v17 = vadd.f32 %v8767_v9, %v5974_v35  ;;  %v8700_v55 = vpop.f32.mrf.mxu1  ;;  %v4988_v32 = vadd.f32 %v12364_v62, %v12363_v56  ;;  %v5599_v58 = vadd.f32 %v11895_v22, %v5293_v3  ;;  %v5296_v33 = vadd.f32 %v12365_v49, %v4989_v2  ;;  %v12366_v6 = vld [vmem:[#allocation72_spill] sm:$0xff]  ;;  %v12372_v2 = vld [vmem:[#allocation74_spill] sm:$0xff]  ;;  %v8635_v63 = vpop.f32.mrf.mxu0 }
 0x3f4   : > { %6067 = vst [vmem:[%s11861_s16 + $0x60] sm:$0xff] %v6035_v41  ;;  %v6005_v29 = vadd.f32 %v8768_v30, %v5973_v10  ;;  %v5976_v54 = vadd.f32 %v11834_v24, %v5939_v12  ;;  %v5938_v8 = vmul.f32 %v11825_v59, %v5901_v16  ;;  %v5904_v19 = vadd.f32 %v8700_v55, %v5598_v28  ;;  %v8771_v35 = vld [vmem:[#allocation2 + $0xf9] sm:$0xff]  ;;  %v12369_v12 = vld [vmem:[#allocation25_spill] sm:$0xff]  ;;  %v12370_v16 = vld [vmem:[#allocation30_spill] sm:$0xff] }
 0x3f5   : > { %v6038_v50 = vmax.f32 %v6006_v17, 0.0  ;;  %v5816_v47 = vpop.f32.mrf.mxu1  ;;  %v4991_v46 = vadd.f32 %v12367_v1, %v12366_v6  ;;  %v5602_v22 = vadd.f32 %v11910_v25, %v5296_v33  ;;  %v5295_v18 = vadd.f32 %v12368_v27, %v4988_v32  ;;  %v8772_v3 = vld [vmem:[#allocation2 + $0xf1] sm:$0xff]  ;;  %v12377_v62 = vld [vmem:[#allocation96_spill] sm:$0xff]  ;;  %v5560_v33 = vpop.f32.mrf.mxu0 }
 0x3f6   : > { %v6037_v44 = vmax.f32 %v6005_v29, 0.0  ;;  %v6008_v13 = vadd.f32 %v8769_v21, %v5976_v54  ;;  %v5975_v34 = vadd.f32 %v11834_v24, %v5938_v8  ;;  %v5941_v5 = vmul.f32 %v11825_v59, %v5904_v19  ;;  %v12373_v29 = vld [vmem:[#allocation27_spill] sm:$0xff]  ;;  %v12374_v54 = vld [vmem:[#allocation28_spill] sm:$0xff] }
 0x3f7   : > { %6070 = vst [vmem:[%s11861_s16 + $0x78] sm:$0xff] %v6038_v50  ;;  %v5903_v42 = vadd.f32 %v5816_v47, %v5597_v51  ;;  %v8703_v31 = vpop.f32.mrf.mxu1  ;;  %v4990_v7 = vadd.f32 %v12370_v16, %v12369_v12  ;;  %v4993_v38 = vadd.f32 %v12372_v2, %v12371_v14  ;;  %v5601_v25 = vadd.f32 %v11927_v0, %v5295_v18  ;;  %v12375_v19 = vld [vmem:[#allocation83_spill] sm:$0xff]  ;;  %v12380_v1 = vld [vmem:[#allocation40_spill] sm:$0xff]  ;;  %v8775_v18 = vld [vmem:[#allocation2 + $0x129] sm:$0xff]  ;;  %v8638_v12 = vpop.f32.mrf.mxu0 }
 0x3f8   : > { %6069 = vst [vmem:[%s11861_s16 + $0x70] sm:$0xff] %v6037_v44  ;;  %v6040_v61 = vmax.f32 %v6008_v13, 0.0  ;;  %v6007_v43 = vadd.f32 %v8770_v15, %v5975_v34  ;;  %v5978_v48 = vadd.f32 %v11834_v24, %v5941_v5  ;;  %v5906_v60 = vadd.f32 %v8703_v31, %v5600_v36  ;;  %v12376_v36 = vld [vmem:[#allocation42_spill] sm:$0xff] }
 0x3f9   : > { %v5940_v53 = vmul.f32 %v11825_v59, %v5903_v42  ;;  %v5826_v20 = vpop.f32.mrf.mxu1  ;;  %v4992_v8 = vadd.f32 %v12374_v54, %v12373_v29  ;;  %v5298_v51 = vadd.f32 %v12375_v19, %v4991_v46  ;;  %v5297_v37 = vadd.f32 %v12376_v36, %v4990_v7  ;;  %v8773_v47 = vld [vmem:[#allocation2 + $0x111] sm:$0xff]  ;;  %v8774_v31 = vld [vmem:[#allocation2 + $0x109] sm:$0xff]  ;;  %v8776_v7 = vld [vmem:[#allocation2 + $0x121] sm:$0xff] }
 0x3fa   : > { %6072 = vst [vmem:[%s11861_s16 + $0x88] sm:$0xff] %v6040_v61  ;;  %v6039_v28 = vmax.f32 %v6007_v43, 0.0  ;;  %v6010_v57 = vadd.f32 %v8771_v35, %v5978_v48  ;;  %v5943_v41 = vmul.f32 %v11825_v59, %v5906_v60  ;;  %v5905_v10 = vadd.f32 %v5826_v20, %v5599_v58  ;;  %v12378_v48 = vld [vmem:[#allocation79_spill] sm:$0xff]  ;;  %v12379_v60 = vld [vmem:[#allocation82_spill] sm:$0xff]  ;;  %v12386_v36 = vld [vmem:[#allocation77_spill] sm:$0xff] }
 0x3fb   : > { %v5977_v40 = vadd.f32 %v11834_v24, %v5940_v53  ;;  %v8706_v45 = vpop.f32.mrf.mxu1  ;;  %v5604_v5 = vadd.f32 %v11942_v26, %v5298_v51  ;;  %v5603_v56 = vadd.f32 %v11958_v23, %v5297_v37  ;;  %v5300_v32 = vadd.f32 %v12377_v62, %v4993_v38  ;;  %v12387_v37 = vld [vmem:[#allocation85_spill] sm:$0xff] }
 0x3fc   : > { %6071 = vst [vmem:[%s11861_s16 + $0x80] sm:$0xff] %v6039_v28  ;;  %v6042_v9 = vmax.f32 %v6010_v57, 0.0  ;;  %v5980_v17 = vadd.f32 %v11834_v24, %v5943_v41  ;;  %v5942_v55 = vmul.f32 %v11825_v59, %v5905_v10  ;;  %v5908_v30 = vadd.f32 %v8706_v45, %v5602_v22  ;;  %v12381_v57 = vld [vmem:[#allocation41_spill] sm:$0xff] }
 0x3fd   : > { %v6009_v0 = vadd.f32 %v8772_v3, %v5977_v40  ;;  %v5836_v50 = vpop.f32.mrf.mxu1  ;;  %v4995_v6 = vadd.f32 %v12379_v60, %v12378_v48  ;;  %v5606_v26 = vadd.f32 %v11975_v4, %v5300_v32  ;;  %v5299_v23 = vadd.f32 %v12380_v1, %v4992_v8  ;;  %v12383_v40 = vld [vmem:[#allocation31_spill] sm:$0xff] }
 0x3fe   : > { %6074 = vst [vmem:[%s11861_s16 + $0x98] sm:$0xff] %v6042_v9  ;;  %v6012_v44 = vadd.f32 %v8773_v47, %v5980_v17  ;;  %v5979_v21 = vadd.f32 %v11834_v24, %v5942_v55  ;;  %v5945_v13 = vmul.f32 %v11825_v59, %v5908_v30  ;;  %v5907_v34 = vadd.f32 %v5836_v50, %v5601_v25  ;;  %v12382_v25 = vld [vmem:[#allocation16_spill] sm:$0xff]  ;;  %v12384_v9 = vld [vmem:[#allocation29_spill] sm:$0xff]  ;;  %v12385_v17 = vld [vmem:[#allocation34_spill] sm:$0xff] }
 0x3ff   : > { %v6041_v58 = vmax.f32 %v6009_v0, 0.0  ;;  %v8709_v49 = vpop.f32.mrf.mxu1  ;;  %v5605_v35 = vadd.f32 %v11990_v52, %v5299_v23  ;;  %v5302_v41 = vadd.f32 %v12381_v57, %v4995_v6  ;;  %v4994_v45 = vadd.f32 %v12383_v40, %v12382_v25  ;;  %v8777_v47 = vld [vmem:[#allocation2 + $0x141] sm:$0xff]  ;;  %v8780_v1 = vld [vmem:[#allocation2 + $0x151] sm:$0xff] }
 0x400   : > { %v6044_v42 = vmax.f32 %v6012_v44, 0.0  ;;  %v6011_v61 = vadd.f32 %v8774_v31, %v5979_v21  ;;  %v5982_v15 = vadd.f32 %v11834_v24, %v5945_v13  ;;  %v5944_v43 = vmul.f32 %v11825_v59, %v5907_v34  ;;  %v5570_v21 = vpop.f32.mrf.mxu0  ;;  %v8778_v13 = vld [vmem:[#allocation2 + $0x139] sm:$0xff] }
 0x401   : > { %6073 = vst [vmem:[%s11861_s16 + $0x90] sm:$0xff] %v6041_v58  ;;  %v5910_v46 = vadd.f32 %v8709_v49, %v5604_v5  ;;  %v5846_v22 = vpop.f32.mrf.mxu1  ;;  %v4997_v52 = vadd.f32 %v12385_v17, %v12384_v9  ;;  %v5608_v55 = vadd.f32 %v8635_v63, %v5302_v41  ;;  %v4996_v3 = vadd.f32 %v12387_v37, %v12386_v36  ;;  %v12388_v58 = vld [vmem:[#allocation43_spill] sm:$0xff] }
 0x402   : > { %6076 = vst [vmem:[%s11861_s16 + $0xa8] sm:$0xff] %v6044_v42  ;;  %v6043_v27 = vmax.f32 %v6011_v61, 0.0  ;;  %v6014_v53 = vadd.f32 %v8775_v18, %v5982_v15  ;;  %v5981_v20 = vadd.f32 %v11834_v24, %v5944_v43  ;;  %v5909_v28 = vadd.f32 %v5846_v22, %v5603_v56  ;;  %v8779_v61 = vld [vmem:[#allocation2 + $0x159] sm:$0xff] }
 0x403   : > { %v5947_v4 = vmul.f32 %v11825_v59, %v5910_v46  ;;  %v8712_v10 = vpop.f32.mrf.mxu1  ;;  %v5301_v0 = vadd.f32 %v11808_v39, %v4994_v45  ;;  %v5304_v50 = vadd.f32 %v11812_v11, %v4997_v52  ;;  %v5303_v49 = vadd.f32 %v12388_v58, %v4996_v3  ;;  %v8784_v45 = vld [vmem:[#allocation2 + $0x181] sm:$0xff] }
 0x404   : > { %6075 = vst [vmem:[%s11861_s16 + $0xa0] sm:$0xff] %v6043_v27  ;;  %v6046_v16 = vmax.f32 %v6014_v53, 0.0  ;;  %v6013_v14 = vadd.f32 %v8776_v7, %v5981_v20  ;;  %v5946_v2 = vmul.f32 %v11825_v59, %v5909_v28  ;;  %v5912_v38 = vadd.f32 %v8712_v10, %v5606_v26  ;;  %v8781_v20 = vld [vmem:[#allocation2 + $0x171] sm:$0xff] }
 0x405   : > { %v5984_v30 = vadd.f32 %v11834_v24, %v5947_v4  ;;  %v5856_v29 = vpop.f32.mrf.mxu1  ;;  %v5607_v32 = vadd.f32 %v5560_v33, %v5301_v0  ;;  %v5610_v39 = vadd.f32 %v8638_v12, %v5304_v50  ;;  %v5609_v60 = vadd.f32 %v5570_v21, %v5303_v49 }
 0x406   : > { %6078 = vst [vmem:[%s11861_s16 + $0xb8] sm:$0xff] %v6046_v16  ;;  %v6045_v54 = vmax.f32 %v6013_v14, 0.0  ;;  %v5983_v8 = vadd.f32 %v11834_v24, %v5946_v2  ;;  %v5949_v19 = vmul.f32 %v11825_v59, %v5912_v38  ;;  %v5911_v51 = vadd.f32 %v5856_v29, %v5605_v35  ;;  %v8782_v16 = vld [vmem:[#allocation2 + $0x169] sm:$0xff] }
 0x407   : > { %v6016_v44 = vadd.f32 %v8777_v47, %v5984_v30  ;;  %v8715_v63 = vpop.f32.mrf.mxu1  ;;  %v8783_v14 = vld [vmem:[#allocation2 + $0x189] sm:$0xff] }
 0x408   : > { %6077 = vst [vmem:[%s11861_s16 + $0xb0] sm:$0xff] %v6045_v54  ;;  %v6015_v34 = vadd.f32 %v8778_v13, %v5983_v8  ;;  %v5986_v5 = vadd.f32 %v11834_v24, %v5949_v19  ;;  %v5948_v56 = vmul.f32 %v11825_v59, %v5911_v51  ;;  %v5914_v62 = vadd.f32 %v8715_v63, %v5608_v55 }
 0x409   : > { %v6048_v42 = vmax.f32 %v6016_v44, 0.0  ;;  %v5866_v11 = vpop.f32.mrf.mxu1 }
 0x40a   : > { %v6047_v31 = vmax.f32 %v6015_v34, 0.0  ;;  %v6018_v15 = vadd.f32 %v8779_v61, %v5986_v5  ;;  %v5985_v43 = vadd.f32 %v11834_v24, %v5948_v56  ;;  %v5951_v48 = vmul.f32 %v11825_v59, %v5914_v62 }
 0x40b   : > { %6080 = vst [vmem:[%s11861_s16 + $0xc8] sm:$0xff] %v6048_v42  ;;  %v5913_v6 = vadd.f32 %v5866_v11, %v5607_v32  ;;  %v8718_v26 = vpop.f32.mrf.mxu1 }
 0x40c   : > { %6079 = vst [vmem:[%s11861_s16 + $0xc0] sm:$0xff] %v6047_v31  ;;  %v6050_v33 = vmax.f32 %v6018_v15, 0.0  ;;  %v6017_v23 = vadd.f32 %v8780_v1, %v5985_v43  ;;  %v5988_v46 = vadd.f32 %v11834_v24, %v5951_v48  ;;  %v5916_v22 = vadd.f32 %v8718_v26, %v5610_v39 }
 0x40d   : > { %v5950_v27 = vmul.f32 %v11825_v59, %v5913_v6  ;;  %v5876_v18 = vpop.f32.mrf.mxu1 }
 0x40e   : > { %6082 = vst [vmem:[%s11861_s16 + $0xd8] sm:$0xff] %v6050_v33  ;;  %v6049_v53 = vmax.f32 %v6017_v23, 0.0  ;;  %v6020_v28 = vadd.f32 %v8781_v20, %v5988_v46  ;;  %v5953_v35 = vmul.f32 %v11825_v59, %v5916_v22  ;;  %v5915_v57 = vadd.f32 %v5876_v18, %v5609_v60 }
 0x40f   : > { %v5987_v41 = vadd.f32 %v11834_v24, %v5950_v27 }
 0x410   : > { %6081 = vst [vmem:[%s11861_s16 + $0xd0] sm:$0xff] %v6049_v53  ;;  %v6052_v4 = vmax.f32 %v6020_v28, 0.0  ;;  %v5990_v10 = vadd.f32 %v11834_v24, %v5953_v35  ;;  %v5952_v12 = vmul.f32 %v11825_v59, %v5915_v57 }
 0x411   : > { %v6019_v7 = vadd.f32 %v8782_v16, %v5987_v41 }
 0x412   : > { %6084 = vst [vmem:[%s11861_s16 + $0xe8] sm:$0xff] %v6052_v4  ;;  %v6022_v2 = vadd.f32 %v8783_v14, %v5990_v10  ;;  %v5989_v38 = vadd.f32 %v11834_v24, %v5952_v12 }
 0x413   : > { %v6051_v25 = vmax.f32 %v6019_v7, 0.0 }
 0x414   : > { %v6054_v40 = vmax.f32 %v6022_v2, 0.0  ;;  %v6021_v9 = vadd.f32 %v8784_v45, %v5989_v38 }
 0x415   : > { %6083 = vst [vmem:[%s11861_s16 + $0xe0] sm:$0xff] %v6051_v25 }
 0x416   : > { %6086 = vst [vmem:[%s11861_s16 + $0xf8] sm:$0xff] %v6054_v40  ;;  %v6053_v17 = vmax.f32 %v6021_v9, 0.0 }
 0x418   : > { %6085 = vst [vmem:[%s11861_s16 + $0xf0] sm:$0xff] %v6053_v17 }
 0x419 PF: > { %s15_s18 = sadd.s32 1, %s8791_s18  }
 0x41a   : > { %p12_p4 = scmp.ge.s32.totalorder %s15_s18, 4  }
 0x41c   :  { %14 = sbr.rel (!%p12_p4) target bundleno = 1 (0x1), region = 90 }

</bundles_post_ra>
